<compile_context>
chip_gen: v7x
topology: tpu7x:2x2x1
jax: 0.10.0
libtpu: 0.0.40
codegen_flags: <defaults>
</compile_context>

<pallas_src>
import jax
import jax.numpy as jnp
from jax import lax
from jax.experimental import pallas as pl
from jax.experimental.pallas import tpu as pltpu


def _round_up(x, m):
    return (x + m - 1) // m * m


KERNEL_SIZE = 7
DILATIONS = (1, 3, 5)
LEAKY_SLOPE = 0.2
PADS = tuple(d * (KERNEL_SIZE - 1) // 2 for d in DILATIONS)   # (3, 9, 15)
HALO_L = 2 * sum(PADS)                                        # 54: receptive radius
WIN_EXTRA = _round_up(2 * HALO_L, 128)                        # 128: lane-aligned halo
HALO_R = WIN_EXTRA - HALO_L                                   # 74


def _leaky_relu(x):
    return jnp.where(x >= 0, x, LEAKY_SLOPE * x)


def _make_kernel(*, t_tile, win, n_t, t_true, add_first_res, matmul_dtype,
                 fuse_taps, prefetch):
    """Fused LReLU -> conv (x6) -> residual chain for one (batch, time) tile."""

    def kernel(x_hbm, wf_ref, wr_ref, b_ref, o_ref, xwin, dma_sem):
        b_i = pl.program_id(0)
        t_i = pl.program_id(1)
        slot = t_i % 2

        def start_fetch(tile, s):
            start = pl.multiple_of(tile * t_tile, 128)
            pltpu.make_async_copy(x_hbm.at[b_i, :, pl.ds(start, win)],
                                  xwin.at[s], dma_sem.at[s]).start()

        def wait_fetch(s):
            pltpu.make_async_copy(x_hbm.at[b_i, :, pl.ds(0, win)],
                                  xwin.at[s], dma_sem.at[s]).wait()

        if prefetch:
            # Double-buffered halo DMA.  The time axis is "arbitrary", so the
            # t-sweep of one batch row runs sequentially on a single core even
            # when the (parallel) batch axis is split across megacore TCs.
            @pl.when(t_i == 0)
            def _():
                start_fetch(t_i, slot)            # prime this batch row

            wait_fetch(slot)

            @pl.when(t_i + 1 < n_t)
            def _():
                start_fetch(t_i + 1, 1 - slot)    # hide next tile's HBM latency
        else:
            start_fetch(t_i, slot)
            wait_fetch(slot)

        # Boundary validity for the whole window, computed ONCE per grid step.
        # Reproduces PyTorch's per-conv zero padding at the true sequence edges
        # for the recomputed halo columns.
        pos = (t_i * t_tile - HALO_L
               + lax.broadcasted_iota(jnp.int32, (1, win), 1))
        valid = jnp.where(jnp.logical_and(pos >= 0, pos < t_true), 1.0, 0.0)
        # TODO(synk): skip the mask multiplies on interior tiles (scalar
        # predicate + lax.cond) once verified on all target generations.

        def conv(xin, get_w, bias, d, w_out):
            xc = xin.astype(matmul_dtype)         # one cast per conv, pre-slice
            if fuse_taps:
                # im2col over the 7 taps -> single MXU contraction of K*C_in.
                xcat = jnp.concatenate(
                    [xc[:, k * d:k * d + w_out] for k in range(KERNEL_SIZE)],
                    axis=0)
                return jnp.dot(get_w(), xcat,
                               preferred_element_type=jnp.float32) + bias
            # Per-tap matmuls, bias folded into the accumulator init.
            # TODO(synk): on v7x verify this chain accumulates in the MRB; if
            # it pops to vregs + VALU adds, prefer fuse_taps=True instead.
            acc = jnp.broadcast_to(bias, (bias.shape[0], w_out))
            for k in range(KERNEL_SIZE):
                acc = acc + jnp.dot(get_w(k), xc[:, k * d:k * d + w_out],
                                    preferred_element_type=jnp.float32)
            return acc

        x = xwin[slot]                             # (C_in_pad, win) f32
        width, cum, ci = win, 0, 0                 # cum = columns shaved on the left
        for idx, d in enumerate(DILATIONS):
            p = d * (KERNEL_SIZE - 1) // 2
            xt = x
            for _half in range(2):
                xt = _leaky_relu(xt)
                if ci > 0:     # conv-0 inputs are already zero outside [0, T)
                    xt = xt * valid[:, cum:cum + width]
                if fuse_taps:
                    gw = ((lambda: wf_ref[...]) if ci == 0
                          else (lambda j=ci - 1: wr_ref[j]))
                else:
                    gw = ((lambda k: wf_ref[k]) if ci == 0
                          else (lambda k, j=ci - 1: wr_ref[j, k]))
                xt = conv(xt, gw, b_ref[ci], d, width - 2 * p)
                width, cum, ci = width - 2 * p, cum + p, ci + 1
            if idx != 0 or add_first_res:          # torch: skip 1st residual iff Cin!=Cout
                x = xt + x[:, 2 * p:2 * p + width]
            else:
                x = xt

        # width == t_tile + (WIN_EXTRA - 2*HALO_L); the first t_tile columns
        # are exactly this output tile (aligned prefix slice, no lane rotate).
        o_ref[0] = x[:, :t_tile].astype(o_ref.dtype)

    return kernel


def fold_weight_norm(g, v):
    """Effective conv weight of torch weight_norm (dim=0): g * v / ||v||."""
    norm = jnp.sqrt(jnp.sum(jnp.square(v), axis=(1, 2), keepdims=True))
    return jnp.reshape(g, (-1, 1, 1)) * v / norm


def resblock_forward(x, params, *, t_tile=1024, matmul_dtype=jnp.float32,
                     fuse_taps=None, out_dtype=None, prefetch_halo=True,
                     vmem_budget_bytes=None):
    """Fused ResBlock forward.  x: (B, C_in, T).

    `params` holds *effective* conv weights (use fold_weight_norm() when
    loading a trained weight-norm checkpoint).  matmul_dtype=bf16 halves the
    resident-weight VMEM/DMA and feeds the MXU natively on v6e/v7x; the
    accumulation and all VPU work stay f32.
    """
    B, c_in, T = x.shape
    c_out = params["w1"][0].shape[0]
    K = KERNEL_SIZE
    out_dtype = x.dtype if out_dtype is None else out_dtype

    c_in_p = _round_up(c_in, 8)          # f32 sublane tile
    c_out_p = _round_up(c_out, 8)
    if fuse_taps is None:
        # Tap fusion multiplies the MXU contraction dim by 7; worthwhile while
        # channels are below the systolic contraction width (128 / 256).
        fuse_taps = max(c_in_p, c_out_p) <= 128

    mm_bytes = jnp.dtype(matmul_dtype).itemsize
    out_bytes = jnp.dtype(out_dtype).itemsize
    w_elems = K * c_out_p * (c_in_p + 5 * c_out_p)

    def vmem_estimate(tt):
        win_ = tt + WIN_EXTRA
        c_max = max(c_in_p, c_out_p)
        est = w_elems * mm_bytes + 6 * c_out_p * 4      # resident weights + biases
        est += 2 * c_in_p * win_ * 4                    # double-buffered halo window
        est += 2 * c_out_p * tt * out_bytes             # double-buffered output tile
        est += 4 * c_max * win_ * 4                     # live f32 intermediates
        if fuse_taps:
            est += K * c_max * win_ * mm_bytes          # im2col operand
        return est + (4 << 20)                          # compiler scratch headroom

    if vmem_budget_bytes is None:
        try:    # per-generation VMEM (v5e/v6e: 128 MiB, v7x: 64 MiB per core)
            cap = pltpu.get_tpu_info().vmem_capacity_bytes
        except Exception:
            cap = 64 * 1024 * 1024
        vmem_budget_bytes = max(min(cap - (8 << 20), 100 << 20), 32 << 20)
    vmem_budget_bytes = int(vmem_budget_bytes)

    t_tile = _round_up(max(int(t_tile), 128), 128)
    t_tile = min(t_tile, _round_up(T, 128))
    while t_tile > 128 and vmem_estimate(t_tile) > vmem_budget_bytes:
        t_tile -= 128

    n_t = -(-T // t_tile)
    t_out = n_t * t_tile
    win = t_tile + WIN_EXTRA

    # Zero-pad channels to the sublane tile and time by the (asymmetric,
    # lane-aligned) halo + tail.
    # TODO(synk): drop this HBM copy by clamping the DMA window in-kernel and
    # zeroing the edge columns of xwin (saves ~2x input-side HBM traffic).
    x_p = jnp.pad(x.astype(jnp.float32),
                  ((0, 0), (0, c_in_p - c_in), (HALO_L, HALO_R + t_out - T)))

    def prep_w(w, ci_p):
        co, ci, _ = w.shape
        w = jnp.pad(w.astype(jnp.float32),
                    ((0, c_out_p - co), (0, ci_p - ci), (0, 0)))
        if fuse_taps:   # (C_out_p, K*ci_p): column k*ci_p + c  <->  tap k, chan c
            w = jnp.transpose(w, (0, 2, 1)).reshape(c_out_p, K * ci_p)
        else:           # (K, C_out_p, ci_p): the tap is a free leading index
            w = jnp.transpose(w, (2, 0, 1))
        return w.astype(matmul_dtype)   # pre-cast once (bf16 halves VMEM/DMA)

    wf = prep_w(params["w1"][0], c_in_p)
    wr = jnp.stack([prep_w(params["w2"][0], c_out_p),
                    prep_w(params["w1"][1], c_out_p),
                    prep_w(params["w2"][1], c_out_p),
                    prep_w(params["w1"][2], c_out_p),
                    prep_w(params["w2"][2], c_out_p)])

    def prep_b(b):
        return jnp.pad(b.astype(jnp.float32), (0, c_out_p - b.shape[0]))

    biases = jnp.stack([prep_b(params["b1"][0]), prep_b(params["b2"][0]),
                        prep_b(params["b1"][1]), prep_b(params["b2"][1]),
                        prep_b(params["b1"][2]), prep_b(params["b2"][2])])
    biases = biases.reshape(6, c_out_p, 1)

    kernel = _make_kernel(t_tile=t_tile, win=win, n_t=n_t, t_true=T,
                          add_first_res=(c_in == c_out),
                          matmul_dtype=matmul_dtype, fuse_taps=fuse_taps,
                          prefetch=prefetch_halo)

    dims = ("parallel", "arbitrary") if prefetch_halo else ("parallel", "parallel")

    def run(weight_pm):
        def wspec(shape):
            zeros = (0,) * len(shape)
            if weight_pm is None:
                return pl.BlockSpec(shape, lambda b, t: zeros)
            return pl.BlockSpec(shape, lambda b, t: zeros, pipeline_mode=weight_pm)

        return pl.pallas_call(
            kernel,
            grid=(B, n_t),
            in_specs=[
                pl.BlockSpec(memory_space=pl.ANY),   # raw HBM; manual halo DMA
                wspec(wf.shape), wspec(wr.shape), wspec(biases.shape),
            ],
            out_specs=pl.BlockSpec((1, c_out_p, t_tile), lambda b, t: (b, 0, t)),
            out_shape=jax.ShapeDtypeStruct((B, c_out_p, t_out), out_dtype),
            scratch_shapes=[pltpu.VMEM((2, c_in_p, win), jnp.float32),
                            pltpu.SemaphoreType.DMA((2,))],
            compiler_params=pltpu.CompilerParams(
                dimension_semantics=dims,
                vmem_limit_bytes=vmem_budget_bytes),
        )(x_p, wf, wr, biases)

    try:
        # Constant-index weight/bias blocks don't need a revolving buffer.
        out = run(pl.Buffered(1))
    except Exception:
        out = run(None)   # fall back to default double buffering

    if c_out_p != c_out or t_out != T:
        out = out[:, :c_out, :T]
    return out


def init_params(key, in_channels, out_channels):
    ks = jax.random.split(key, 2 * len(DILATIONS))
    w1, b1, w2, b2 = [], [], [], []
    for i, _ in enumerate(DILATIONS):
        cin = in_channels if i == 0 else out_channels
        w1.append(0.01 * jax.random.normal(
            ks[i], (out_channels, cin, KERNEL_SIZE), jnp.float32))
        b1.append(jnp.zeros((out_channels,), jnp.float32))
        w2.append(0.01 * jax.random.normal(
            ks[len(DILATIONS) + i],
            (out_channels, out_channels, KERNEL_SIZE), jnp.float32))
        b2.append(jnp.zeros((out_channels,), jnp.float32))
    return {"w1": w1, "b1": b1, "w2": w2, "b2": b2}


# --- pure-JAX reference (correctness check only) ----------------------------
def _ref_conv(x, w, b, d):
    pad = d * (KERNEL_SIZE - 1) // 2
    y = lax.conv_general_dilated(
        x, w, window_strides=(1,), padding=[(pad, pad)],
        rhs_dilation=(d,), dimension_numbers=("NCH", "OIH", "NCH"))
    return y + b[None, :, None]


def ref_forward(x, params):
    in_c = x.shape[1]
    out_c = params["w1"][0].shape[0]
    for idx, d in enumerate(DILATIONS):
        xt = _leaky_relu(x)
        xt = _ref_conv(xt, params["w1"][idx], params["b1"][idx], d)
        xt = _leaky_relu(xt)
        xt = _ref_conv(xt, params["w2"][idx], params["b2"][idx], d)
        x = xt + x if (idx != 0 or in_c == out_c) else xt
    return x


if __name__ == "__main__":
    key = jax.random.PRNGKey(0)
    kx, kp, kp2 = jax.random.split(key, 3)

    # Case 1: in != out channels (no residual on block 0), several time tiles:
    # exercises boundary masking, the double-buffered halo prefetch and the
    # fused-tap (im2col) MXU path (auto-selected at small channel counts).
    B, C_IN, C_OUT, T = 2, 4, 8, 300
    x = jax.random.normal(kx, (B, C_IN, T), jnp.float32)
    params = init_params(kp, C_IN, C_OUT)
    out = jax.block_until_ready(resblock_forward(x, params, t_tile=128))
    ref = ref_forward(x, params)
    assert out.shape == (B, C_OUT, T), out.shape
    assert jnp.allclose(out, ref, atol=1e-5, rtol=1e-5), float(
        jnp.max(jnp.abs(out - ref)))

    # Case 2: in == out channels (residual on every block), single larger tile,
    # per-tap matmul path (fuse_taps=False).
    params2 = init_params(kp2, C_OUT, C_OUT)
    x2 = jax.random.normal(kp, (B, C_OUT, T), jnp.float32)
    out2 = jax.block_until_ready(resblock_forward(x2, params2, fuse_taps=False))
    ref2 = ref_forward(x2, params2)
    assert out2.shape == (B, C_OUT, T), out2.shape
    assert jnp.allclose(out2, ref2, atol=1e-5, rtol=1e-5), float(
        jnp.max(jnp.abs(out2 - ref2)))

    # Case 3: bf16 weights/activations on the MXU (f32 accumulation) -- looser
    # tolerance because conv operands are rounded to bf16.
    out3 = jax.block_until_ready(
        resblock_forward(x2, params2, t_tile=256, matmul_dtype=jnp.bfloat16))
    assert out3.shape == (B, C_OUT, T), out3.shape
    assert jnp.allclose(out3, ref2, atol=5e-2, rtol=5e-2), float(
        jnp.max(jnp.abs(out3 - ref2)))

    print("KERNEL_OK")
</pallas_src>

<mosaic_0001>
module attributes {stable_mosaic.version = 11 : i64} {
  func.func @kernel(%arg0: i32, %arg1: i32, %arg2: memref<2x8x512xf32, #tpu.memory_space<any>>, %arg3: memref<8x56xf32, #tpu.memory_space<vmem>>, %arg4: memref<5x8x56xf32, #tpu.memory_space<vmem>>, %arg5: memref<6x8x1xf32, #tpu.memory_space<vmem>>, %arg6: memref<1x8x128xf32, #tpu.memory_space<vmem>>, %arg7: memref<2x8x256xf32, #tpu.memory_space<vmem>>, %arg8: memref<2x!tpu.dma_semaphore, #tpu.memory_space<semaphore_mem>>) attributes {dimension_semantics = [#tpu.dimension_semantics<parallel>, #tpu.dimension_semantics<arbitrary>], iteration_bounds = array<i64: 2, 3>, scalar_prefetch = 0 : i64, scratch_operands = 2 : i64, tpu.core_type = #tpu.core_type<tc>, window_params = [{}, {pipeline_mode = #tpu.pipeline_mode<synchronous>, transform_indices = @transform_1, window_bounds = array<i64: 8, 56>}, {pipeline_mode = #tpu.pipeline_mode<synchronous>, transform_indices = @transform_2, window_bounds = array<i64: 5, 8, 56>}, {pipeline_mode = #tpu.pipeline_mode<synchronous>, transform_indices = @transform_3, window_bounds = array<i64: 6, 8, 1>}, {transform_indices = @transform_4, window_bounds = array<i64: 1, 8, 128>}]} {
    %c2_i32 = arith.constant 2 : i32
    %c0_i32 = arith.constant 0 : i32
    %0 = arith.cmpi eq, %c2_i32, %c0_i32 : i32
    %c1_i32 = arith.constant 1 : i32
    %1 = arith.select %0, %c1_i32, %c2_i32 : i32
    %2 = arith.remsi %arg1, %1 : i32
    %c0_i32_0 = arith.constant 0 : i32
    %3 = arith.cmpi ne, %2, %c0_i32_0 : i32
    %c0_i32_1 = arith.constant 0 : i32
    %4 = arith.cmpi slt, %2, %c0_i32_1 : i32
    %c0_i32_2 = arith.constant 0 : i32
    %5 = arith.cmpi slt, %1, %c0_i32_2 : i32
    %6 = arith.xori %4, %5 : i1
    %7 = arith.andi %6, %3 : i1
    %8 = arith.addi %2, %1 : i32
    %9 = arith.select %7, %8, %2 : i32
    %c0_i32_3 = arith.constant 0 : i32
    %10 = arith.cmpi eq, %arg1, %c0_i32_3 : i32
    %11 = arith.extui %10 : i1 to i32
    %c0_i32_4 = arith.constant 0 : i32
    %12 = arith.cmpi ne, %11, %c0_i32_4 : i32
    scf.if %12 {
      %c128_i32_65 = arith.constant 128 : i32
      %181 = arith.muli %arg1, %c128_i32_65 : i32
      %182 = tpu.assume_multiple %181, 128 : i32
      %c0_i32_66 = arith.constant 0 : i32
      %183 = tpu.memref_slice %arg2[%arg0, %c0_i32_66, %182] : memref<2x8x512xf32, #tpu.memory_space<any>> -> memref<1x8x256xf32, #tpu.memory_space<any>>
      %184 = tpu.memref_squeeze %183 : memref<1x8x256xf32, #tpu.memory_space<any>> -> memref<8x256xf32, #tpu.memory_space<any>>
      %c0_i32_67 = arith.constant 0 : i32
      %c0_i32_68 = arith.constant 0 : i32
      %185 = tpu.memref_slice %arg7[%9, %c0_i32_67, %c0_i32_68] : memref<2x8x256xf32, #tpu.memory_space<vmem>> -> memref<1x8x256xf32, #tpu.memory_space<vmem>>
      %186 = tpu.memref_squeeze %185 : memref<1x8x256xf32, #tpu.memory_space<vmem>> -> memref<8x256xf32, #tpu.memory_space<vmem>>
      %187 = tpu.memref_slice %arg8[%9] : memref<2x!tpu.dma_semaphore, #tpu.memory_space<semaphore_mem>> -> memref<1x!tpu.dma_semaphore, #tpu.memory_space<semaphore_mem>>
      %188 = tpu.memref_squeeze %187 : memref<1x!tpu.dma_semaphore, #tpu.memory_space<semaphore_mem>> -> memref<!tpu.dma_semaphore, #tpu.memory_space<semaphore_mem>>
      tpu.enqueue_dma source(%184 : memref<8x256xf32, #tpu.memory_space<any>>) target(%186 : memref<8x256xf32, #tpu.memory_space<vmem>>) target_semaphore(%188 : memref<!tpu.dma_semaphore, #tpu.memory_space<semaphore_mem>>)
    } else {
    }
    %c0_i32_5 = arith.constant 0 : i32
    %c0_i32_6 = arith.constant 0 : i32
    %13 = tpu.memref_slice %arg2[%arg0, %c0_i32_5, %c0_i32_6] : memref<2x8x512xf32, #tpu.memory_space<any>> -> memref<1x8x256xf32, #tpu.memory_space<any>>
    %14 = tpu.memref_squeeze %13 : memref<1x8x256xf32, #tpu.memory_space<any>> -> memref<8x256xf32, #tpu.memory_space<any>>
    %c0_i32_7 = arith.constant 0 : i32
    %c0_i32_8 = arith.constant 0 : i32
    %15 = tpu.memref_slice %arg7[%9, %c0_i32_7, %c0_i32_8] : memref<2x8x256xf32, #tpu.memory_space<vmem>> -> memref<1x8x256xf32, #tpu.memory_space<vmem>>
    %16 = tpu.memref_squeeze %15 : memref<1x8x256xf32, #tpu.memory_space<vmem>> -> memref<8x256xf32, #tpu.memory_space<vmem>>
    %17 = tpu.memref_slice %arg8[%9] : memref<2x!tpu.dma_semaphore, #tpu.memory_space<semaphore_mem>> -> memref<1x!tpu.dma_semaphore, #tpu.memory_space<semaphore_mem>>
    %18 = tpu.memref_squeeze %17 : memref<1x!tpu.dma_semaphore, #tpu.memory_space<semaphore_mem>> -> memref<!tpu.dma_semaphore, #tpu.memory_space<semaphore_mem>>
    tpu.wait_dma2 semaphore(%18 : memref<!tpu.dma_semaphore, #tpu.memory_space<semaphore_mem>>) src(%14 : memref<8x256xf32, #tpu.memory_space<any>>) dst(%16 : memref<8x256xf32, #tpu.memory_space<vmem>>)
    %c1_i32_9 = arith.constant 1 : i32
    %19 = arith.addi %arg1, %c1_i32_9 : i32
    %c3_i32 = arith.constant 3 : i32
    %20 = arith.cmpi slt, %19, %c3_i32 : i32
    %21 = arith.extui %20 : i1 to i32
    %c0_i32_10 = arith.constant 0 : i32
    %22 = arith.cmpi ne, %21, %c0_i32_10 : i32
    scf.if %22 {
      %c1_i32_65 = arith.constant 1 : i32
      %181 = arith.addi %arg1, %c1_i32_65 : i32
      %c1_i32_66 = arith.constant 1 : i32
      %182 = arith.subi %c1_i32_66, %9 : i32
      %c128_i32_67 = arith.constant 128 : i32
      %183 = arith.muli %181, %c128_i32_67 : i32
      %184 = tpu.assume_multiple %183, 128 : i32
      %c0_i32_68 = arith.constant 0 : i32
      %185 = tpu.memref_slice %arg2[%arg0, %c0_i32_68, %184] : memref<2x8x512xf32, #tpu.memory_space<any>> -> memref<1x8x256xf32, #tpu.memory_space<any>>
      %186 = tpu.memref_squeeze %185 : memref<1x8x256xf32, #tpu.memory_space<any>> -> memref<8x256xf32, #tpu.memory_space<any>>
      %c0_i32_69 = arith.constant 0 : i32
      %c0_i32_70 = arith.constant 0 : i32
      %187 = tpu.memref_slice %arg7[%182, %c0_i32_69, %c0_i32_70] : memref<2x8x256xf32, #tpu.memory_space<vmem>> -> memref<1x8x256xf32, #tpu.memory_space<vmem>>
      %188 = tpu.memref_squeeze %187 : memref<1x8x256xf32, #tpu.memory_space<vmem>> -> memref<8x256xf32, #tpu.memory_space<vmem>>
      %189 = tpu.memref_slice %arg8[%182] : memref<2x!tpu.dma_semaphore, #tpu.memory_space<semaphore_mem>> -> memref<1x!tpu.dma_semaphore, #tpu.memory_space<semaphore_mem>>
      %190 = tpu.memref_squeeze %189 : memref<1x!tpu.dma_semaphore, #tpu.memory_space<semaphore_mem>> -> memref<!tpu.dma_semaphore, #tpu.memory_space<semaphore_mem>>
      tpu.enqueue_dma source(%186 : memref<8x256xf32, #tpu.memory_space<any>>) target(%188 : memref<8x256xf32, #tpu.memory_space<vmem>>) target_semaphore(%190 : memref<!tpu.dma_semaphore, #tpu.memory_space<semaphore_mem>>)
    } else {
    }
    %c128_i32 = arith.constant 128 : i32
    %23 = arith.muli %arg1, %c128_i32 : i32
    %c54_i32 = arith.constant 54 : i32
    %24 = arith.subi %23, %c54_i32 : i32
    %25 = tpu.iota {dimensions = array<i32: 1>} : vector<1x256xi32>
    %26 = vector.broadcast %24 : i32 to vector<1x256xi32>
    %27 = arith.addi %26, %25 : vector<1x256xi32>
    %c0_i32_11 = arith.constant 0 : i32
    %28 = vector.broadcast %c0_i32_11 : i32 to vector<1x256xi32>
    %29 = arith.cmpi sge, %27, %28 : vector<1x256xi32>
    %c300_i32 = arith.constant 300 : i32
    %30 = vector.broadcast %c300_i32 : i32 to vector<1x256xi32>
    %31 = arith.cmpi slt, %27, %30 : vector<1x256xi32>
    %32 = arith.andi %29, %31 : vector<1x256xi1>
    %cst = arith.constant 1.000000e+00 : f32
    %cst_12 = arith.constant 0.000000e+00 : f32
    %33 = vector.broadcast %cst : f32 to vector<1x256xf32>
    %34 = vector.broadcast %cst_12 : f32 to vector<1x256xf32>
    %35 = arith.select %32, %33, %34 : vector<1x256xi1>, vector<1x256xf32>
    %36 = arith.index_cast %9 : i32 to index
    %c0 = arith.constant 0 : index
    %c0_13 = arith.constant 0 : index
    %37 = vector.load %arg7[%36, %c0, %c0_13] : memref<2x8x256xf32, #tpu.memory_space<vmem>>, vector<1x8x256xf32>
    %38 = vector.shape_cast %37 : vector<1x8x256xf32> to vector<8x256xf32>
    %cst_14 = arith.constant 0.000000e+00 : f32
    %39 = vector.broadcast %cst_14 : f32 to vector<8x256xf32>
    %40 = arith.cmpf oge, %38, %39 : vector<8x256xf32>
    %cst_15 = arith.constant 2.000000e-01 : f32
    %41 = vector.broadcast %cst_15 : f32 to vector<8x256xf32>
    %42 = arith.mulf %41, %38 : vector<8x256xf32>
    %43 = arith.select %40, %38, %42 : vector<8x256xi1>, vector<8x256xf32>
    %c0_16 = arith.constant 0 : index
    %c0_17 = arith.constant 0 : index
    %c0_18 = arith.constant 0 : index
    %44 = vector.load %arg5[%c0_16, %c0_17, %c0_18] : memref<6x8x1xf32, #tpu.memory_space<vmem>>, vector<1x8x1xf32>
    %45 = vector.shape_cast %44 : vector<1x8x1xf32> to vector<8x1xf32>
    %46 = vector.extract_strided_slice %43 {offsets = [0, 0], sizes = [8, 250], strides = [1, 1]} : vector<8x256xf32> to vector<8x250xf32>
    %47 = vector.extract_strided_slice %43 {offsets = [0, 1], sizes = [8, 250], strides = [1, 1]} : vector<8x256xf32> to vector<8x250xf32>
    %48 = vector.extract_strided_slice %43 {offsets = [0, 2], sizes = [8, 250], strides = [1, 1]} : vector<8x256xf32> to vector<8x250xf32>
    %49 = vector.extract_strided_slice %43 {offsets = [0, 3], sizes = [8, 250], strides = [1, 1]} : vector<8x256xf32> to vector<8x250xf32>
    %50 = vector.extract_strided_slice %43 {offsets = [0, 4], sizes = [8, 250], strides = [1, 1]} : vector<8x256xf32> to vector<8x250xf32>
    %51 = vector.extract_strided_slice %43 {offsets = [0, 5], sizes = [8, 250], strides = [1, 1]} : vector<8x256xf32> to vector<8x250xf32>
    %52 = vector.extract_strided_slice %43 {offsets = [0, 6], sizes = [8, 250], strides = [1, 1]} : vector<8x256xf32> to vector<8x250xf32>
    %53 = tpu.concatenate %46, %47, %48, %49, %50, %51, %52 in 0 : vector<8x250xf32>, vector<8x250xf32>, vector<8x250xf32>, vector<8x250xf32>, vector<8x250xf32>, vector<8x250xf32>, vector<8x250xf32> -> vector<56x250xf32>
    %c0_19 = arith.constant 0 : index
    %c0_20 = arith.constant 0 : index
    %54 = vector.load %arg3[%c0_19, %c0_20] : memref<8x56xf32, #tpu.memory_space<vmem>>, vector<8x56xf32>
    %cst_21 = arith.constant dense<0.000000e+00> : vector<8x250xf32>
    %55 = tpu.matmul %54, %53, %cst_21 {dimension_numbers = #tpu.dot_dimension_numbers<[1], [0], [0], [1], [0, 0, 1, 1], [], []>} : vector<8x56xf32>, vector<56x250xf32>, vector<8x250xf32> -> vector<8x250xf32>
    %56 = vector.broadcast %45 : vector<8x1xf32> to vector<8x250xf32>
    %57 = arith.addf %55, %56 : vector<8x250xf32>
    %cst_22 = arith.constant 0.000000e+00 : f32
    %58 = vector.broadcast %cst_22 : f32 to vector<8x250xf32>
    %59 = arith.cmpf oge, %57, %58 : vector<8x250xf32>
    %cst_23 = arith.constant 2.000000e-01 : f32
    %60 = vector.broadcast %cst_23 : f32 to vector<8x250xf32>
    %61 = arith.mulf %60, %57 : vector<8x250xf32>
    %62 = arith.select %59, %57, %61 : vector<8x250xi1>, vector<8x250xf32>
    %63 = vector.extract_strided_slice %35 {offsets = [0, 3], sizes = [1, 250], strides = [1, 1]} : vector<1x256xf32> to vector<1x250xf32>
    %64 = vector.broadcast %63 : vector<1x250xf32> to vector<8x250xf32>
    %65 = arith.mulf %62, %64 : vector<8x250xf32>
    %c1 = arith.constant 1 : index
    %c0_24 = arith.constant 0 : index
    %c0_25 = arith.constant 0 : index
    %66 = vector.load %arg5[%c1, %c0_24, %c0_25] : memref<6x8x1xf32, #tpu.memory_space<vmem>>, vector<1x8x1xf32>
    %67 = vector.shape_cast %66 : vector<1x8x1xf32> to vector<8x1xf32>
    %68 = vector.extract_strided_slice %65 {offsets = [0, 0], sizes = [8, 244], strides = [1, 1]} : vector<8x250xf32> to vector<8x244xf32>
    %69 = vector.extract_strided_slice %65 {offsets = [0, 1], sizes = [8, 244], strides = [1, 1]} : vector<8x250xf32> to vector<8x244xf32>
    %70 = vector.extract_strided_slice %65 {offsets = [0, 2], sizes = [8, 244], strides = [1, 1]} : vector<8x250xf32> to vector<8x244xf32>
    %71 = vector.extract_strided_slice %65 {offsets = [0, 3], sizes = [8, 244], strides = [1, 1]} : vector<8x250xf32> to vector<8x244xf32>
    %72 = vector.extract_strided_slice %65 {offsets = [0, 4], sizes = [8, 244], strides = [1, 1]} : vector<8x250xf32> to vector<8x244xf32>
    %73 = vector.extract_strided_slice %65 {offsets = [0, 5], sizes = [8, 244], strides = [1, 1]} : vector<8x250xf32> to vector<8x244xf32>
    %74 = vector.extract_strided_slice %65 {offsets = [0, 6], sizes = [8, 244], strides = [1, 1]} : vector<8x250xf32> to vector<8x244xf32>
    %75 = tpu.concatenate %68, %69, %70, %71, %72, %73, %74 in 0 : vector<8x244xf32>, vector<8x244xf32>, vector<8x244xf32>, vector<8x244xf32>, vector<8x244xf32>, vector<8x244xf32>, vector<8x244xf32> -> vector<56x244xf32>
    %c0_26 = arith.constant 0 : index
    %c0_27 = arith.constant 0 : index
    %c0_28 = arith.constant 0 : index
    %76 = vector.load %arg4[%c0_26, %c0_27, %c0_28] : memref<5x8x56xf32, #tpu.memory_space<vmem>>, vector<1x8x56xf32>
    %77 = vector.shape_cast %76 : vector<1x8x56xf32> to vector<8x56xf32>
    %cst_29 = arith.constant dense<0.000000e+00> : vector<8x244xf32>
    %78 = tpu.matmul %77, %75, %cst_29 {dimension_numbers = #tpu.dot_dimension_numbers<[1], [0], [0], [1], [0, 0, 1, 1], [], []>} : vector<8x56xf32>, vector<56x244xf32>, vector<8x244xf32> -> vector<8x244xf32>
    %79 = vector.broadcast %67 : vector<8x1xf32> to vector<8x244xf32>
    %80 = arith.addf %78, %79 : vector<8x244xf32>
    %cst_30 = arith.constant 0.000000e+00 : f32
    %81 = vector.broadcast %cst_30 : f32 to vector<8x244xf32>
    %82 = arith.cmpf oge, %80, %81 : vector<8x244xf32>
    %cst_31 = arith.constant 2.000000e-01 : f32
    %83 = vector.broadcast %cst_31 : f32 to vector<8x244xf32>
    %84 = arith.mulf %83, %80 : vector<8x244xf32>
    %85 = arith.select %82, %80, %84 : vector<8x244xi1>, vector<8x244xf32>
    %86 = vector.extract_strided_slice %35 {offsets = [0, 6], sizes = [1, 244], strides = [1, 1]} : vector<1x256xf32> to vector<1x244xf32>
    %87 = vector.broadcast %86 : vector<1x244xf32> to vector<8x244xf32>
    %88 = arith.mulf %85, %87 : vector<8x244xf32>
    %c2 = arith.constant 2 : index
    %c0_32 = arith.constant 0 : index
    %c0_33 = arith.constant 0 : index
    %89 = vector.load %arg5[%c2, %c0_32, %c0_33] : memref<6x8x1xf32, #tpu.memory_space<vmem>>, vector<1x8x1xf32>
    %90 = vector.shape_cast %89 : vector<1x8x1xf32> to vector<8x1xf32>
    %91 = vector.extract_strided_slice %88 {offsets = [0, 0], sizes = [8, 226], strides = [1, 1]} : vector<8x244xf32> to vector<8x226xf32>
    %92 = vector.extract_strided_slice %88 {offsets = [0, 3], sizes = [8, 226], strides = [1, 1]} : vector<8x244xf32> to vector<8x226xf32>
    %93 = vector.extract_strided_slice %88 {offsets = [0, 6], sizes = [8, 226], strides = [1, 1]} : vector<8x244xf32> to vector<8x226xf32>
    %94 = vector.extract_strided_slice %88 {offsets = [0, 9], sizes = [8, 226], strides = [1, 1]} : vector<8x244xf32> to vector<8x226xf32>
    %95 = vector.extract_strided_slice %88 {offsets = [0, 12], sizes = [8, 226], strides = [1, 1]} : vector<8x244xf32> to vector<8x226xf32>
    %96 = vector.extract_strided_slice %88 {offsets = [0, 15], sizes = [8, 226], strides = [1, 1]} : vector<8x244xf32> to vector<8x226xf32>
    %97 = vector.extract_strided_slice %88 {offsets = [0, 18], sizes = [8, 226], strides = [1, 1]} : vector<8x244xf32> to vector<8x226xf32>
    %98 = tpu.concatenate %91, %92, %93, %94, %95, %96, %97 in 0 : vector<8x226xf32>, vector<8x226xf32>, vector<8x226xf32>, vector<8x226xf32>, vector<8x226xf32>, vector<8x226xf32>, vector<8x226xf32> -> vector<56x226xf32>
    %c1_34 = arith.constant 1 : index
    %c0_35 = arith.constant 0 : index
    %c0_36 = arith.constant 0 : index
    %99 = vector.load %arg4[%c1_34, %c0_35, %c0_36] : memref<5x8x56xf32, #tpu.memory_space<vmem>>, vector<1x8x56xf32>
    %100 = vector.shape_cast %99 : vector<1x8x56xf32> to vector<8x56xf32>
    %cst_37 = arith.constant dense<0.000000e+00> : vector<8x226xf32>
    %101 = tpu.matmul %100, %98, %cst_37 {dimension_numbers = #tpu.dot_dimension_numbers<[1], [0], [0], [1], [0, 0, 1, 1], [], []>} : vector<8x56xf32>, vector<56x226xf32>, vector<8x226xf32> -> vector<8x226xf32>
    %102 = vector.broadcast %90 : vector<8x1xf32> to vector<8x226xf32>
    %103 = arith.addf %101, %102 : vector<8x226xf32>
    %cst_38 = arith.constant 0.000000e+00 : f32
    %104 = vector.broadcast %cst_38 : f32 to vector<8x226xf32>
    %105 = arith.cmpf oge, %103, %104 : vector<8x226xf32>
    %cst_39 = arith.constant 2.000000e-01 : f32
    %106 = vector.broadcast %cst_39 : f32 to vector<8x226xf32>
    %107 = arith.mulf %106, %103 : vector<8x226xf32>
    %108 = arith.select %105, %103, %107 : vector<8x226xi1>, vector<8x226xf32>
    %109 = vector.extract_strided_slice %35 {offsets = [0, 15], sizes = [1, 226], strides = [1, 1]} : vector<1x256xf32> to vector<1x226xf32>
    %110 = vector.broadcast %109 : vector<1x226xf32> to vector<8x226xf32>
    %111 = arith.mulf %108, %110 : vector<8x226xf32>
    %c3 = arith.constant 3 : index
    %c0_40 = arith.constant 0 : index
    %c0_41 = arith.constant 0 : index
    %112 = vector.load %arg5[%c3, %c0_40, %c0_41] : memref<6x8x1xf32, #tpu.memory_space<vmem>>, vector<1x8x1xf32>
    %113 = vector.shape_cast %112 : vector<1x8x1xf32> to vector<8x1xf32>
    %114 = vector.extract_strided_slice %111 {offsets = [0, 0], sizes = [8, 208], strides = [1, 1]} : vector<8x226xf32> to vector<8x208xf32>
    %115 = vector.extract_strided_slice %111 {offsets = [0, 3], sizes = [8, 208], strides = [1, 1]} : vector<8x226xf32> to vector<8x208xf32>
    %116 = vector.extract_strided_slice %111 {offsets = [0, 6], sizes = [8, 208], strides = [1, 1]} : vector<8x226xf32> to vector<8x208xf32>
    %117 = vector.extract_strided_slice %111 {offsets = [0, 9], sizes = [8, 208], strides = [1, 1]} : vector<8x226xf32> to vector<8x208xf32>
    %118 = vector.extract_strided_slice %111 {offsets = [0, 12], sizes = [8, 208], strides = [1, 1]} : vector<8x226xf32> to vector<8x208xf32>
    %119 = vector.extract_strided_slice %111 {offsets = [0, 15], sizes = [8, 208], strides = [1, 1]} : vector<8x226xf32> to vector<8x208xf32>
    %120 = vector.extract_strided_slice %111 {offsets = [0, 18], sizes = [8, 208], strides = [1, 1]} : vector<8x226xf32> to vector<8x208xf32>
    %121 = tpu.concatenate %114, %115, %116, %117, %118, %119, %120 in 0 : vector<8x208xf32>, vector<8x208xf32>, vector<8x208xf32>, vector<8x208xf32>, vector<8x208xf32>, vector<8x208xf32>, vector<8x208xf32> -> vector<56x208xf32>
    %c2_42 = arith.constant 2 : index
    %c0_43 = arith.constant 0 : index
    %c0_44 = arith.constant 0 : index
    %122 = vector.load %arg4[%c2_42, %c0_43, %c0_44] : memref<5x8x56xf32, #tpu.memory_space<vmem>>, vector<1x8x56xf32>
    %123 = vector.shape_cast %122 : vector<1x8x56xf32> to vector<8x56xf32>
    %cst_45 = arith.constant dense<0.000000e+00> : vector<8x208xf32>
    %124 = tpu.matmul %123, %121, %cst_45 {dimension_numbers = #tpu.dot_dimension_numbers<[1], [0], [0], [1], [0, 0, 1, 1], [], []>} : vector<8x56xf32>, vector<56x208xf32>, vector<8x208xf32> -> vector<8x208xf32>
    %125 = vector.broadcast %113 : vector<8x1xf32> to vector<8x208xf32>
    %126 = arith.addf %124, %125 : vector<8x208xf32>
    %127 = vector.extract_strided_slice %80 {offsets = [0, 18], sizes = [8, 208], strides = [1, 1]} : vector<8x244xf32> to vector<8x208xf32>
    %128 = arith.addf %126, %127 : vector<8x208xf32>
    %cst_46 = arith.constant 0.000000e+00 : f32
    %129 = vector.broadcast %cst_46 : f32 to vector<8x208xf32>
    %130 = arith.cmpf oge, %128, %129 : vector<8x208xf32>
    %cst_47 = arith.constant 2.000000e-01 : f32
    %131 = vector.broadcast %cst_47 : f32 to vector<8x208xf32>
    %132 = arith.mulf %131, %128 : vector<8x208xf32>
    %133 = arith.select %130, %128, %132 : vector<8x208xi1>, vector<8x208xf32>
    %134 = vector.extract_strided_slice %35 {offsets = [0, 24], sizes = [1, 208], strides = [1, 1]} : vector<1x256xf32> to vector<1x208xf32>
    %135 = vector.broadcast %134 : vector<1x208xf32> to vector<8x208xf32>
    %136 = arith.mulf %133, %135 : vector<8x208xf32>
    %c4 = arith.constant 4 : index
    %c0_48 = arith.constant 0 : index
    %c0_49 = arith.constant 0 : index
    %137 = vector.load %arg5[%c4, %c0_48, %c0_49] : memref<6x8x1xf32, #tpu.memory_space<vmem>>, vector<1x8x1xf32>
    %138 = vector.shape_cast %137 : vector<1x8x1xf32> to vector<8x1xf32>
    %139 = vector.extract_strided_slice %136 {offsets = [0, 0], sizes = [8, 178], strides = [1, 1]} : vector<8x208xf32> to vector<8x178xf32>
    %140 = vector.extract_strided_slice %136 {offsets = [0, 5], sizes = [8, 178], strides = [1, 1]} : vector<8x208xf32> to vector<8x178xf32>
    %141 = vector.extract_strided_slice %136 {offsets = [0, 10], sizes = [8, 178], strides = [1, 1]} : vector<8x208xf32> to vector<8x178xf32>
    %142 = vector.extract_strided_slice %136 {offsets = [0, 15], sizes = [8, 178], strides = [1, 1]} : vector<8x208xf32> to vector<8x178xf32>
    %143 = vector.extract_strided_slice %136 {offsets = [0, 20], sizes = [8, 178], strides = [1, 1]} : vector<8x208xf32> to vector<8x178xf32>
    %144 = vector.extract_strided_slice %136 {offsets = [0, 25], sizes = [8, 178], strides = [1, 1]} : vector<8x208xf32> to vector<8x178xf32>
    %145 = vector.extract_strided_slice %136 {offsets = [0, 30], sizes = [8, 178], strides = [1, 1]} : vector<8x208xf32> to vector<8x178xf32>
    %146 = tpu.concatenate %139, %140, %141, %142, %143, %144, %145 in 0 : vector<8x178xf32>, vector<8x178xf32>, vector<8x178xf32>, vector<8x178xf32>, vector<8x178xf32>, vector<8x178xf32>, vector<8x178xf32> -> vector<56x178xf32>
    %c3_50 = arith.constant 3 : index
    %c0_51 = arith.constant 0 : index
    %c0_52 = arith.constant 0 : index
    %147 = vector.load %arg4[%c3_50, %c0_51, %c0_52] : memref<5x8x56xf32, #tpu.memory_space<vmem>>, vector<1x8x56xf32>
    %148 = vector.shape_cast %147 : vector<1x8x56xf32> to vector<8x56xf32>
    %cst_53 = arith.constant dense<0.000000e+00> : vector<8x178xf32>
    %149 = tpu.matmul %148, %146, %cst_53 {dimension_numbers = #tpu.dot_dimension_numbers<[1], [0], [0], [1], [0, 0, 1, 1], [], []>} : vector<8x56xf32>, vector<56x178xf32>, vector<8x178xf32> -> vector<8x178xf32>
    %150 = vector.broadcast %138 : vector<8x1xf32> to vector<8x178xf32>
    %151 = arith.addf %149, %150 : vector<8x178xf32>
    %cst_54 = arith.constant 0.000000e+00 : f32
    %152 = vector.broadcast %cst_54 : f32 to vector<8x178xf32>
    %153 = arith.cmpf oge, %151, %152 : vector<8x178xf32>
    %cst_55 = arith.constant 2.000000e-01 : f32
    %154 = vector.broadcast %cst_55 : f32 to vector<8x178xf32>
    %155 = arith.mulf %154, %151 : vector<8x178xf32>
    %156 = arith.select %153, %151, %155 : vector<8x178xi1>, vector<8x178xf32>
    %157 = vector.extract_strided_slice %35 {offsets = [0, 39], sizes = [1, 178], strides = [1, 1]} : vector<1x256xf32> to vector<1x178xf32>
    %158 = vector.broadcast %157 : vector<1x178xf32> to vector<8x178xf32>
    %159 = arith.mulf %156, %158 : vector<8x178xf32>
    %c5 = arith.constant 5 : index
    %c0_56 = arith.constant 0 : index
    %c0_57 = arith.constant 0 : index
    %160 = vector.load %arg5[%c5, %c0_56, %c0_57] : memref<6x8x1xf32, #tpu.memory_space<vmem>>, vector<1x8x1xf32>
    %161 = vector.shape_cast %160 : vector<1x8x1xf32> to vector<8x1xf32>
    %162 = vector.extract_strided_slice %159 {offsets = [0, 0], sizes = [8, 148], strides = [1, 1]} : vector<8x178xf32> to vector<8x148xf32>
    %163 = vector.extract_strided_slice %159 {offsets = [0, 5], sizes = [8, 148], strides = [1, 1]} : vector<8x178xf32> to vector<8x148xf32>
    %164 = vector.extract_strided_slice %159 {offsets = [0, 10], sizes = [8, 148], strides = [1, 1]} : vector<8x178xf32> to vector<8x148xf32>
    %165 = vector.extract_strided_slice %159 {offsets = [0, 15], sizes = [8, 148], strides = [1, 1]} : vector<8x178xf32> to vector<8x148xf32>
    %166 = vector.extract_strided_slice %159 {offsets = [0, 20], sizes = [8, 148], strides = [1, 1]} : vector<8x178xf32> to vector<8x148xf32>
    %167 = vector.extract_strided_slice %159 {offsets = [0, 25], sizes = [8, 148], strides = [1, 1]} : vector<8x178xf32> to vector<8x148xf32>
    %168 = vector.extract_strided_slice %159 {offsets = [0, 30], sizes = [8, 148], strides = [1, 1]} : vector<8x178xf32> to vector<8x148xf32>
    %169 = tpu.concatenate %162, %163, %164, %165, %166, %167, %168 in 0 : vector<8x148xf32>, vector<8x148xf32>, vector<8x148xf32>, vector<8x148xf32>, vector<8x148xf32>, vector<8x148xf32>, vector<8x148xf32> -> vector<56x148xf32>
    %c4_58 = arith.constant 4 : index
    %c0_59 = arith.constant 0 : index
    %c0_60 = arith.constant 0 : index
    %170 = vector.load %arg4[%c4_58, %c0_59, %c0_60] : memref<5x8x56xf32, #tpu.memory_space<vmem>>, vector<1x8x56xf32>
    %171 = vector.shape_cast %170 : vector<1x8x56xf32> to vector<8x56xf32>
    %cst_61 = arith.constant dense<0.000000e+00> : vector<8x148xf32>
    %172 = tpu.matmul %171, %169, %cst_61 {dimension_numbers = #tpu.dot_dimension_numbers<[1], [0], [0], [1], [0, 0, 1, 1], [], []>} : vector<8x56xf32>, vector<56x148xf32>, vector<8x148xf32> -> vector<8x148xf32>
    %173 = vector.broadcast %161 : vector<8x1xf32> to vector<8x148xf32>
    %174 = arith.addf %172, %173 : vector<8x148xf32>
    %175 = vector.extract_strided_slice %128 {offsets = [0, 30], sizes = [8, 148], strides = [1, 1]} : vector<8x208xf32> to vector<8x148xf32>
    %176 = arith.addf %174, %175 : vector<8x148xf32>
    %177 = vector.extract_strided_slice %176 {offsets = [0, 0], sizes = [8, 128], strides = [1, 1]} : vector<8x148xf32> to vector<8x128xf32>
    %c0_62 = arith.constant 0 : index
    %c0_63 = arith.constant 0 : index
    %c0_64 = arith.constant 0 : index
    %178 = vector.load %arg6[%c0_62, %c0_63, %c0_64] : memref<1x8x128xf32, #tpu.memory_space<vmem>>, vector<1x8x128xf32>
    %179 = vector.shape_cast %178 : vector<1x8x128xf32> to vector<8x128xf32>
    %180 = vector.shape_cast %177 : vector<8x128xf32> to vector<1x8x128xf32>
    tpu.vector_store %arg6[%c0_62, %c0_63, %c0_64], %180 {strides = array<i32>} : memref<1x8x128xf32, #tpu.memory_space<vmem>>, vector<1x8x128xf32>,
    return
  }
  func.func @transform_1(%arg0: i32, %arg1: i32) -> (i32, i32) {
    %c0_i32 = arith.constant 0 : i32
    %c0_i32_0 = arith.constant 0 : i32
    %c0_i32_1 = arith.constant 0 : i32
    return %c0_i32, %c0_i32_0 : i32, i32
  }
  func.func @transform_2(%arg0: i32, %arg1: i32) -> (i32, i32, i32) {
    %c0_i32 = arith.constant 0 : i32
    %c0_i32_0 = arith.constant 0 : i32
    %c0_i32_1 = arith.constant 0 : i32
    %c0_i32_2 = arith.constant 0 : i32
    return %c0_i32, %c0_i32_0, %c0_i32_1 : i32, i32, i32
  }
  func.func @transform_3(%arg0: i32, %arg1: i32) -> (i32, i32, i32) {
    %c0_i32 = arith.constant 0 : i32
    %c0_i32_0 = arith.constant 0 : i32
    %c0_i32_1 = arith.constant 0 : i32
    %c0_i32_2 = arith.constant 0 : i32
    return %c0_i32, %c0_i32_0, %c0_i32_1 : i32, i32, i32
  }
  func.func @transform_4(%arg0: i32, %arg1: i32) -> (i32, i32, i32) {
    %c0_i32 = arith.constant 0 : i32
    %c0_i32_0 = arith.constant 0 : i32
    return %arg0, %c0_i32, %arg1 : i32, i32, i32
  }
}

module attributes {stable_mosaic.version = 11 : i64} {
  func.func @kernel(%arg0: i32, %arg1: i32, %arg2: memref<2x8x512xf32, #tpu.memory_space<any>>, %arg3: memref<8x56xf32, #tpu.memory_space<vmem>>, %arg4: memref<5x8x56xf32, #tpu.memory_space<vmem>>, %arg5: memref<6x8x1xf32, #tpu.memory_space<vmem>>, %arg6: memref<1x8x128xf32, #tpu.memory_space<vmem>>, %arg7: memref<2x8x256xf32, #tpu.memory_space<vmem>>, %arg8: memref<2x!tpu.dma_semaphore, #tpu.memory_space<semaphore_mem>>) attributes {dimension_semantics = [#tpu.dimension_semantics<parallel>, #tpu.dimension_semantics<arbitrary>], iteration_bounds = array<i64: 2, 3>, scalar_prefetch = 0 : i64, scratch_operands = 2 : i64, tpu.core_type = #tpu.core_type<tc>, window_params = [{}, {pipeline_mode = #tpu.pipeline_mode<synchronous>, transform_indices = @transform_1, window_bounds = array<i64: 8, 56>}, {pipeline_mode = #tpu.pipeline_mode<synchronous>, transform_indices = @transform_2, window_bounds = array<i64: 5, 8, 56>}, {pipeline_mode = #tpu.pipeline_mode<synchronous>, transform_indices = @transform_3, window_bounds = array<i64: 6, 8, 1>}, {transform_indices = @transform_4, window_bounds = array<i64: 1, 8, 128>}]} {
    %c2_i32 = arith.constant 2 : i32
    %c0_i32 = arith.constant 0 : i32
    %0 = arith.cmpi eq, %c2_i32, %c0_i32 : i32
    %c1_i32 = arith.constant 1 : i32
    %1 = arith.select %0, %c1_i32, %c2_i32 : i32
    %2 = arith.remsi %arg1, %1 : i32
    %c0_i32_0 = arith.constant 0 : i32
    %3 = arith.cmpi ne, %2, %c0_i32_0 : i32
    %c0_i32_1 = arith.constant 0 : i32
    %4 = arith.cmpi slt, %2, %c0_i32_1 : i32
    %c0_i32_2 = arith.constant 0 : i32
    %5 = arith.cmpi slt, %1, %c0_i32_2 : i32
    %6 = arith.xori %4, %5 : i1
    %7 = arith.andi %6, %3 : i1
    %8 = arith.addi %2, %1 : i32
    %9 = arith.select %7, %8, %2 : i32
    %c0_i32_3 = arith.constant 0 : i32
    %10 = arith.cmpi eq, %arg1, %c0_i32_3 : i32
    %11 = arith.extui %10 : i1 to i32
    %c0_i32_4 = arith.constant 0 : i32
    %12 = arith.cmpi ne, %11, %c0_i32_4 : i32
    scf.if %12 {
      %c128_i32_65 = arith.constant 128 : i32
      %181 = arith.muli %arg1, %c128_i32_65 : i32
      %182 = tpu.assume_multiple %181, 128 : i32
      %c0_i32_66 = arith.constant 0 : i32
      %183 = tpu.memref_slice %arg2[%arg0, %c0_i32_66, %182] : memref<2x8x512xf32, #tpu.memory_space<any>> -> memref<1x8x256xf32, #tpu.memory_space<any>>
      %184 = tpu.memref_squeeze %183 : memref<1x8x256xf32, #tpu.memory_space<any>> -> memref<8x256xf32, #tpu.memory_space<any>>
      %c0_i32_67 = arith.constant 0 : i32
      %c0_i32_68 = arith.constant 0 : i32
      %185 = tpu.memref_slice %arg7[%9, %c0_i32_67, %c0_i32_68] : memref<2x8x256xf32, #tpu.memory_space<vmem>> -> memref<1x8x256xf32, #tpu.memory_space<vmem>>
      %186 = tpu.memref_squeeze %185 : memref<1x8x256xf32, #tpu.memory_space<vmem>> -> memref<8x256xf32, #tpu.memory_space<vmem>>
      %187 = tpu.memref_slice %arg8[%9] : memref<2x!tpu.dma_semaphore, #tpu.memory_space<semaphore_mem>> -> memref<1x!tpu.dma_semaphore, #tpu.memory_space<semaphore_mem>>
      %188 = tpu.memref_squeeze %187 : memref<1x!tpu.dma_semaphore, #tpu.memory_space<semaphore_mem>> -> memref<!tpu.dma_semaphore, #tpu.memory_space<semaphore_mem>>
      tpu.enqueue_dma source(%184 : memref<8x256xf32, #tpu.memory_space<any>>) target(%186 : memref<8x256xf32, #tpu.memory_space<vmem>>) target_semaphore(%188 : memref<!tpu.dma_semaphore, #tpu.memory_space<semaphore_mem>>)
    } else {
    }
    %c0_i32_5 = arith.constant 0 : i32
    %c0_i32_6 = arith.constant 0 : i32
    %13 = tpu.memref_slice %arg2[%arg0, %c0_i32_5, %c0_i32_6] : memref<2x8x512xf32, #tpu.memory_space<any>> -> memref<1x8x256xf32, #tpu.memory_space<any>>
    %14 = tpu.memref_squeeze %13 : memref<1x8x256xf32, #tpu.memory_space<any>> -> memref<8x256xf32, #tpu.memory_space<any>>
    %c0_i32_7 = arith.constant 0 : i32
    %c0_i32_8 = arith.constant 0 : i32
    %15 = tpu.memref_slice %arg7[%9, %c0_i32_7, %c0_i32_8] : memref<2x8x256xf32, #tpu.memory_space<vmem>> -> memref<1x8x256xf32, #tpu.memory_space<vmem>>
    %16 = tpu.memref_squeeze %15 : memref<1x8x256xf32, #tpu.memory_space<vmem>> -> memref<8x256xf32, #tpu.memory_space<vmem>>
    %17 = tpu.memref_slice %arg8[%9] : memref<2x!tpu.dma_semaphore, #tpu.memory_space<semaphore_mem>> -> memref<1x!tpu.dma_semaphore, #tpu.memory_space<semaphore_mem>>
    %18 = tpu.memref_squeeze %17 : memref<1x!tpu.dma_semaphore, #tpu.memory_space<semaphore_mem>> -> memref<!tpu.dma_semaphore, #tpu.memory_space<semaphore_mem>>
    tpu.wait_dma2 semaphore(%18 : memref<!tpu.dma_semaphore, #tpu.memory_space<semaphore_mem>>) src(%14 : memref<8x256xf32, #tpu.memory_space<any>>) dst(%16 : memref<8x256xf32, #tpu.memory_space<vmem>>)
    %c1_i32_9 = arith.constant 1 : i32
    %19 = arith.addi %arg1, %c1_i32_9 : i32
    %c3_i32 = arith.constant 3 : i32
    %20 = arith.cmpi slt, %19, %c3_i32 : i32
    %21 = arith.extui %20 : i1 to i32
    %c0_i32_10 = arith.constant 0 : i32
    %22 = arith.cmpi ne, %21, %c0_i32_10 : i32
    scf.if %22 {
      %c1_i32_65 = arith.constant 1 : i32
      %181 = arith.addi %arg1, %c1_i32_65 : i32
      %c1_i32_66 = arith.constant 1 : i32
      %182 = arith.subi %c1_i32_66, %9 : i32
      %c128_i32_67 = arith.constant 128 : i32
      %183 = arith.muli %181, %c128_i32_67 : i32
      %184 = tpu.assume_multiple %183, 128 : i32
      %c0_i32_68 = arith.constant 0 : i32
      %185 = tpu.memref_slice %arg2[%arg0, %c0_i32_68, %184] : memref<2x8x512xf32, #tpu.memory_space<any>> -> memref<1x8x256xf32, #tpu.memory_space<any>>
      %186 = tpu.memref_squeeze %185 : memref<1x8x256xf32, #tpu.memory_space<any>> -> memref<8x256xf32, #tpu.memory_space<any>>
      %c0_i32_69 = arith.constant 0 : i32
      %c0_i32_70 = arith.constant 0 : i32
      %187 = tpu.memref_slice %arg7[%182, %c0_i32_69, %c0_i32_70] : memref<2x8x256xf32, #tpu.memory_space<vmem>> -> memref<1x8x256xf32, #tpu.memory_space<vmem>>
      %188 = tpu.memref_squeeze %187 : memref<1x8x256xf32, #tpu.memory_space<vmem>> -> memref<8x256xf32, #tpu.memory_space<vmem>>
      %189 = tpu.memref_slice %arg8[%182] : memref<2x!tpu.dma_semaphore, #tpu.memory_space<semaphore_mem>> -> memref<1x!tpu.dma_semaphore, #tpu.memory_space<semaphore_mem>>
      %190 = tpu.memref_squeeze %189 : memref<1x!tpu.dma_semaphore, #tpu.memory_space<semaphore_mem>> -> memref<!tpu.dma_semaphore, #tpu.memory_space<semaphore_mem>>
      tpu.enqueue_dma source(%186 : memref<8x256xf32, #tpu.memory_space<any>>) target(%188 : memref<8x256xf32, #tpu.memory_space<vmem>>) target_semaphore(%190 : memref<!tpu.dma_semaphore, #tpu.memory_space<semaphore_mem>>)
    } else {
    }
    %c128_i32 = arith.constant 128 : i32
    %23 = arith.muli %arg1, %c128_i32 : i32
    %c54_i32 = arith.constant 54 : i32
    %24 = arith.subi %23, %c54_i32 : i32
    %25 = tpu.iota {dimensions = array<i32: 1>} : vector<1x256xi32>
    %26 = vector.broadcast %24 : i32 to vector<1x256xi32>
    %27 = arith.addi %26, %25 : vector<1x256xi32>
    %c0_i32_11 = arith.constant 0 : i32
    %28 = vector.broadcast %c0_i32_11 : i32 to vector<1x256xi32>
    %29 = arith.cmpi sge, %27, %28 : vector<1x256xi32>
    %c300_i32 = arith.constant 300 : i32
    %30 = vector.broadcast %c300_i32 : i32 to vector<1x256xi32>
    %31 = arith.cmpi slt, %27, %30 : vector<1x256xi32>
    %32 = arith.andi %29, %31 : vector<1x256xi1>
    %cst = arith.constant 1.000000e+00 : f32
    %cst_12 = arith.constant 0.000000e+00 : f32
    %33 = vector.broadcast %cst : f32 to vector<1x256xf32>
    %34 = vector.broadcast %cst_12 : f32 to vector<1x256xf32>
    %35 = arith.select %32, %33, %34 : vector<1x256xi1>, vector<1x256xf32>
    %36 = arith.index_cast %9 : i32 to index
    %c0 = arith.constant 0 : index
    %c0_13 = arith.constant 0 : index
    %37 = vector.load %arg7[%36, %c0, %c0_13] : memref<2x8x256xf32, #tpu.memory_space<vmem>>, vector<1x8x256xf32>
    %38 = vector.shape_cast %37 : vector<1x8x256xf32> to vector<8x256xf32>
    %cst_14 = arith.constant 0.000000e+00 : f32
    %39 = vector.broadcast %cst_14 : f32 to vector<8x256xf32>
    %40 = arith.cmpf oge, %38, %39 : vector<8x256xf32>
    %cst_15 = arith.constant 2.000000e-01 : f32
    %41 = vector.broadcast %cst_15 : f32 to vector<8x256xf32>
    %42 = arith.mulf %41, %38 : vector<8x256xf32>
    %43 = arith.select %40, %38, %42 : vector<8x256xi1>, vector<8x256xf32>
    %c0_16 = arith.constant 0 : index
    %c0_17 = arith.constant 0 : index
    %c0_18 = arith.constant 0 : index
    %44 = vector.load %arg5[%c0_16, %c0_17, %c0_18] : memref<6x8x1xf32, #tpu.memory_space<vmem>>, vector<1x8x1xf32>
    %45 = vector.shape_cast %44 : vector<1x8x1xf32> to vector<8x1xf32>
    %46 = vector.extract_strided_slice %43 {offsets = [0, 0], sizes = [8, 250], strides = [1, 1]} : vector<8x256xf32> to vector<8x250xf32>
    %47 = vector.extract_strided_slice %43 {offsets = [0, 1], sizes = [8, 250], strides = [1, 1]} : vector<8x256xf32> to vector<8x250xf32>
    %48 = vector.extract_strided_slice %43 {offsets = [0, 2], sizes = [8, 250], strides = [1, 1]} : vector<8x256xf32> to vector<8x250xf32>
    %49 = vector.extract_strided_slice %43 {offsets = [0, 3], sizes = [8, 250], strides = [1, 1]} : vector<8x256xf32> to vector<8x250xf32>
    %50 = vector.extract_strided_slice %43 {offsets = [0, 4], sizes = [8, 250], strides = [1, 1]} : vector<8x256xf32> to vector<8x250xf32>
    %51 = vector.extract_strided_slice %43 {offsets = [0, 5], sizes = [8, 250], strides = [1, 1]} : vector<8x256xf32> to vector<8x250xf32>
    %52 = vector.extract_strided_slice %43 {offsets = [0, 6], sizes = [8, 250], strides = [1, 1]} : vector<8x256xf32> to vector<8x250xf32>
    %53 = tpu.concatenate %46, %47, %48, %49, %50, %51, %52 in 0 : vector<8x250xf32>, vector<8x250xf32>, vector<8x250xf32>, vector<8x250xf32>, vector<8x250xf32>, vector<8x250xf32>, vector<8x250xf32> -> vector<56x250xf32>
    %c0_19 = arith.constant 0 : index
    %c0_20 = arith.constant 0 : index
    %54 = vector.load %arg3[%c0_19, %c0_20] : memref<8x56xf32, #tpu.memory_space<vmem>>, vector<8x56xf32>
    %cst_21 = arith.constant dense<0.000000e+00> : vector<8x250xf32>
    %55 = tpu.matmul %54, %53, %cst_21 {dimension_numbers = #tpu.dot_dimension_numbers<[1], [0], [0], [1], [0, 0, 1, 1], [], []>} : vector<8x56xf32>, vector<56x250xf32>, vector<8x250xf32> -> vector<8x250xf32>
    %56 = vector.broadcast %45 : vector<8x1xf32> to vector<8x250xf32>
    %57 = arith.addf %55, %56 : vector<8x250xf32>
    %cst_22 = arith.constant 0.000000e+00 : f32
    %58 = vector.broadcast %cst_22 : f32 to vector<8x250xf32>
    %59 = arith.cmpf oge, %57, %58 : vector<8x250xf32>
    %cst_23 = arith.constant 2.000000e-01 : f32
    %60 = vector.broadcast %cst_23 : f32 to vector<8x250xf32>
    %61 = arith.mulf %60, %57 : vector<8x250xf32>
    %62 = arith.select %59, %57, %61 : vector<8x250xi1>, vector<8x250xf32>
    %63 = vector.extract_strided_slice %35 {offsets = [0, 3], sizes = [1, 250], strides = [1, 1]} : vector<1x256xf32> to vector<1x250xf32>
    %64 = vector.broadcast %63 : vector<1x250xf32> to vector<8x250xf32>
    %65 = arith.mulf %62, %64 : vector<8x250xf32>
    %c1 = arith.constant 1 : index
    %c0_24 = arith.constant 0 : index
    %c0_25 = arith.constant 0 : index
    %66 = vector.load %arg5[%c1, %c0_24, %c0_25] : memref<6x8x1xf32, #tpu.memory_space<vmem>>, vector<1x8x1xf32>
    %67 = vector.shape_cast %66 : vector<1x8x1xf32> to vector<8x1xf32>
    %68 = vector.extract_strided_slice %65 {offsets = [0, 0], sizes = [8, 244], strides = [1, 1]} : vector<8x250xf32> to vector<8x244xf32>
    %69 = vector.extract_strided_slice %65 {offsets = [0, 1], sizes = [8, 244], strides = [1, 1]} : vector<8x250xf32> to vector<8x244xf32>
    %70 = vector.extract_strided_slice %65 {offsets = [0, 2], sizes = [8, 244], strides = [1, 1]} : vector<8x250xf32> to vector<8x244xf32>
    %71 = vector.extract_strided_slice %65 {offsets = [0, 3], sizes = [8, 244], strides = [1, 1]} : vector<8x250xf32> to vector<8x244xf32>
    %72 = vector.extract_strided_slice %65 {offsets = [0, 4], sizes = [8, 244], strides = [1, 1]} : vector<8x250xf32> to vector<8x244xf32>
    %73 = vector.extract_strided_slice %65 {offsets = [0, 5], sizes = [8, 244], strides = [1, 1]} : vector<8x250xf32> to vector<8x244xf32>
    %74 = vector.extract_strided_slice %65 {offsets = [0, 6], sizes = [8, 244], strides = [1, 1]} : vector<8x250xf32> to vector<8x244xf32>
    %75 = tpu.concatenate %68, %69, %70, %71, %72, %73, %74 in 0 : vector<8x244xf32>, vector<8x244xf32>, vector<8x244xf32>, vector<8x244xf32>, vector<8x244xf32>, vector<8x244xf32>, vector<8x244xf32> -> vector<56x244xf32>
    %c0_26 = arith.constant 0 : index
    %c0_27 = arith.constant 0 : index
    %c0_28 = arith.constant 0 : index
    %76 = vector.load %arg4[%c0_26, %c0_27, %c0_28] : memref<5x8x56xf32, #tpu.memory_space<vmem>>, vector<1x8x56xf32>
    %77 = vector.shape_cast %76 : vector<1x8x56xf32> to vector<8x56xf32>
    %cst_29 = arith.constant dense<0.000000e+00> : vector<8x244xf32>
    %78 = tpu.matmul %77, %75, %cst_29 {dimension_numbers = #tpu.dot_dimension_numbers<[1], [0], [0], [1], [0, 0, 1, 1], [], []>} : vector<8x56xf32>, vector<56x244xf32>, vector<8x244xf32> -> vector<8x244xf32>
    %79 = vector.broadcast %67 : vector<8x1xf32> to vector<8x244xf32>
    %80 = arith.addf %78, %79 : vector<8x244xf32>
    %cst_30 = arith.constant 0.000000e+00 : f32
    %81 = vector.broadcast %cst_30 : f32 to vector<8x244xf32>
    %82 = arith.cmpf oge, %80, %81 : vector<8x244xf32>
    %cst_31 = arith.constant 2.000000e-01 : f32
    %83 = vector.broadcast %cst_31 : f32 to vector<8x244xf32>
    %84 = arith.mulf %83, %80 : vector<8x244xf32>
    %85 = arith.select %82, %80, %84 : vector<8x244xi1>, vector<8x244xf32>
    %86 = vector.extract_strided_slice %35 {offsets = [0, 6], sizes = [1, 244], strides = [1, 1]} : vector<1x256xf32> to vector<1x244xf32>
    %87 = vector.broadcast %86 : vector<1x244xf32> to vector<8x244xf32>
    %88 = arith.mulf %85, %87 : vector<8x244xf32>
    %c2 = arith.constant 2 : index
    %c0_32 = arith.constant 0 : index
    %c0_33 = arith.constant 0 : index
    %89 = vector.load %arg5[%c2, %c0_32, %c0_33] : memref<6x8x1xf32, #tpu.memory_space<vmem>>, vector<1x8x1xf32>
    %90 = vector.shape_cast %89 : vector<1x8x1xf32> to vector<8x1xf32>
    %91 = vector.extract_strided_slice %88 {offsets = [0, 0], sizes = [8, 226], strides = [1, 1]} : vector<8x244xf32> to vector<8x226xf32>
    %92 = vector.extract_strided_slice %88 {offsets = [0, 3], sizes = [8, 226], strides = [1, 1]} : vector<8x244xf32> to vector<8x226xf32>
    %93 = vector.extract_strided_slice %88 {offsets = [0, 6], sizes = [8, 226], strides = [1, 1]} : vector<8x244xf32> to vector<8x226xf32>
    %94 = vector.extract_strided_slice %88 {offsets = [0, 9], sizes = [8, 226], strides = [1, 1]} : vector<8x244xf32> to vector<8x226xf32>
    %95 = vector.extract_strided_slice %88 {offsets = [0, 12], sizes = [8, 226], strides = [1, 1]} : vector<8x244xf32> to vector<8x226xf32>
    %96 = vector.extract_strided_slice %88 {offsets = [0, 15], sizes = [8, 226], strides = [1, 1]} : vector<8x244xf32> to vector<8x226xf32>
    %97 = vector.extract_strided_slice %88 {offsets = [0, 18], sizes = [8, 226], strides = [1, 1]} : vector<8x244xf32> to vector<8x226xf32>
    %98 = tpu.concatenate %91, %92, %93, %94, %95, %96, %97 in 0 : vector<8x226xf32>, vector<8x226xf32>, vector<8x226xf32>, vector<8x226xf32>, vector<8x226xf32>, vector<8x226xf32>, vector<8x226xf32> -> vector<56x226xf32>
    %c1_34 = arith.constant 1 : index
    %c0_35 = arith.constant 0 : index
    %c0_36 = arith.constant 0 : index
    %99 = vector.load %arg4[%c1_34, %c0_35, %c0_36] : memref<5x8x56xf32, #tpu.memory_space<vmem>>, vector<1x8x56xf32>
    %100 = vector.shape_cast %99 : vector<1x8x56xf32> to vector<8x56xf32>
    %cst_37 = arith.constant dense<0.000000e+00> : vector<8x226xf32>
    %101 = tpu.matmul %100, %98, %cst_37 {dimension_numbers = #tpu.dot_dimension_numbers<[1], [0], [0], [1], [0, 0, 1, 1], [], []>} : vector<8x56xf32>, vector<56x226xf32>, vector<8x226xf32> -> vector<8x226xf32>
    %102 = vector.broadcast %90 : vector<8x1xf32> to vector<8x226xf32>
    %103 = arith.addf %101, %102 : vector<8x226xf32>
    %cst_38 = arith.constant 0.000000e+00 : f32
    %104 = vector.broadcast %cst_38 : f32 to vector<8x226xf32>
    %105 = arith.cmpf oge, %103, %104 : vector<8x226xf32>
    %cst_39 = arith.constant 2.000000e-01 : f32
    %106 = vector.broadcast %cst_39 : f32 to vector<8x226xf32>
    %107 = arith.mulf %106, %103 : vector<8x226xf32>
    %108 = arith.select %105, %103, %107 : vector<8x226xi1>, vector<8x226xf32>
    %109 = vector.extract_strided_slice %35 {offsets = [0, 15], sizes = [1, 226], strides = [1, 1]} : vector<1x256xf32> to vector<1x226xf32>
    %110 = vector.broadcast %109 : vector<1x226xf32> to vector<8x226xf32>
    %111 = arith.mulf %108, %110 : vector<8x226xf32>
    %c3 = arith.constant 3 : index
    %c0_40 = arith.constant 0 : index
    %c0_41 = arith.constant 0 : index
    %112 = vector.load %arg5[%c3, %c0_40, %c0_41] : memref<6x8x1xf32, #tpu.memory_space<vmem>>, vector<1x8x1xf32>
    %113 = vector.shape_cast %112 : vector<1x8x1xf32> to vector<8x1xf32>
    %114 = vector.extract_strided_slice %111 {offsets = [0, 0], sizes = [8, 208], strides = [1, 1]} : vector<8x226xf32> to vector<8x208xf32>
    %115 = vector.extract_strided_slice %111 {offsets = [0, 3], sizes = [8, 208], strides = [1, 1]} : vector<8x226xf32> to vector<8x208xf32>
    %116 = vector.extract_strided_slice %111 {offsets = [0, 6], sizes = [8, 208], strides = [1, 1]} : vector<8x226xf32> to vector<8x208xf32>
    %117 = vector.extract_strided_slice %111 {offsets = [0, 9], sizes = [8, 208], strides = [1, 1]} : vector<8x226xf32> to vector<8x208xf32>
    %118 = vector.extract_strided_slice %111 {offsets = [0, 12], sizes = [8, 208], strides = [1, 1]} : vector<8x226xf32> to vector<8x208xf32>
    %119 = vector.extract_strided_slice %111 {offsets = [0, 15], sizes = [8, 208], strides = [1, 1]} : vector<8x226xf32> to vector<8x208xf32>
    %120 = vector.extract_strided_slice %111 {offsets = [0, 18], sizes = [8, 208], strides = [1, 1]} : vector<8x226xf32> to vector<8x208xf32>
    %121 = tpu.concatenate %114, %115, %116, %117, %118, %119, %120 in 0 : vector<8x208xf32>, vector<8x208xf32>, vector<8x208xf32>, vector<8x208xf32>, vector<8x208xf32>, vector<8x208xf32>, vector<8x208xf32> -> vector<56x208xf32>
    %c2_42 = arith.constant 2 : index
    %c0_43 = arith.constant 0 : index
    %c0_44 = arith.constant 0 : index
    %122 = vector.load %arg4[%c2_42, %c0_43, %c0_44] : memref<5x8x56xf32, #tpu.memory_space<vmem>>, vector<1x8x56xf32>
    %123 = vector.shape_cast %122 : vector<1x8x56xf32> to vector<8x56xf32>
    %cst_45 = arith.constant dense<0.000000e+00> : vector<8x208xf32>
    %124 = tpu.matmul %123, %121, %cst_45 {dimension_numbers = #tpu.dot_dimension_numbers<[1], [0], [0], [1], [0, 0, 1, 1], [], []>} : vector<8x56xf32>, vector<56x208xf32>, vector<8x208xf32> -> vector<8x208xf32>
    %125 = vector.broadcast %113 : vector<8x1xf32> to vector<8x208xf32>
    %126 = arith.addf %124, %125 : vector<8x208xf32>
    %127 = vector.extract_strided_slice %80 {offsets = [0, 18], sizes = [8, 208], strides = [1, 1]} : vector<8x244xf32> to vector<8x208xf32>
    %128 = arith.addf %126, %127 : vector<8x208xf32>
    %cst_46 = arith.constant 0.000000e+00 : f32
    %129 = vector.broadcast %cst_46 : f32 to vector<8x208xf32>
    %130 = arith.cmpf oge, %128, %129 : vector<8x208xf32>
    %cst_47 = arith.constant 2.000000e-01 : f32
    %131 = vector.broadcast %cst_47 : f32 to vector<8x208xf32>
    %132 = arith.mulf %131, %128 : vector<8x208xf32>
    %133 = arith.select %130, %128, %132 : vector<8x208xi1>, vector<8x208xf32>
    %134 = vector.extract_strided_slice %35 {offsets = [0, 24], sizes = [1, 208], strides = [1, 1]} : vector<1x256xf32> to vector<1x208xf32>
    %135 = vector.broadcast %134 : vector<1x208xf32> to vector<8x208xf32>
    %136 = arith.mulf %133, %135 : vector<8x208xf32>
    %c4 = arith.constant 4 : index
    %c0_48 = arith.constant 0 : index
    %c0_49 = arith.constant 0 : index
    %137 = vector.load %arg5[%c4, %c0_48, %c0_49] : memref<6x8x1xf32, #tpu.memory_space<vmem>>, vector<1x8x1xf32>
    %138 = vector.shape_cast %137 : vector<1x8x1xf32> to vector<8x1xf32>
    %139 = vector.extract_strided_slice %136 {offsets = [0, 0], sizes = [8, 178], strides = [1, 1]} : vector<8x208xf32> to vector<8x178xf32>
    %140 = vector.extract_strided_slice %136 {offsets = [0, 5], sizes = [8, 178], strides = [1, 1]} : vector<8x208xf32> to vector<8x178xf32>
    %141 = vector.extract_strided_slice %136 {offsets = [0, 10], sizes = [8, 178], strides = [1, 1]} : vector<8x208xf32> to vector<8x178xf32>
    %142 = vector.extract_strided_slice %136 {offsets = [0, 15], sizes = [8, 178], strides = [1, 1]} : vector<8x208xf32> to vector<8x178xf32>
    %143 = vector.extract_strided_slice %136 {offsets = [0, 20], sizes = [8, 178], strides = [1, 1]} : vector<8x208xf32> to vector<8x178xf32>
    %144 = vector.extract_strided_slice %136 {offsets = [0, 25], sizes = [8, 178], strides = [1, 1]} : vector<8x208xf32> to vector<8x178xf32>
    %145 = vector.extract_strided_slice %136 {offsets = [0, 30], sizes = [8, 178], strides = [1, 1]} : vector<8x208xf32> to vector<8x178xf32>
    %146 = tpu.concatenate %139, %140, %141, %142, %143, %144, %145 in 0 : vector<8x178xf32>, vector<8x178xf32>, vector<8x178xf32>, vector<8x178xf32>, vector<8x178xf32>, vector<8x178xf32>, vector<8x178xf32> -> vector<56x178xf32>
    %c3_50 = arith.constant 3 : index
    %c0_51 = arith.constant 0 : index
    %c0_52 = arith.constant 0 : index
    %147 = vector.load %arg4[%c3_50, %c0_51, %c0_52] : memref<5x8x56xf32, #tpu.memory_space<vmem>>, vector<1x8x56xf32>
    %148 = vector.shape_cast %147 : vector<1x8x56xf32> to vector<8x56xf32>
    %cst_53 = arith.constant dense<0.000000e+00> : vector<8x178xf32>
    %149 = tpu.matmul %148, %146, %cst_53 {dimension_numbers = #tpu.dot_dimension_numbers<[1], [0], [0], [1], [0, 0, 1, 1], [], []>} : vector<8x56xf32>, vector<56x178xf32>, vector<8x178xf32> -> vector<8x178xf32>
    %150 = vector.broadcast %138 : vector<8x1xf32> to vector<8x178xf32>
    %151 = arith.addf %149, %150 : vector<8x178xf32>
    %cst_54 = arith.constant 0.000000e+00 : f32
    %152 = vector.broadcast %cst_54 : f32 to vector<8x178xf32>
    %153 = arith.cmpf oge, %151, %152 : vector<8x178xf32>
    %cst_55 = arith.constant 2.000000e-01 : f32
    %154 = vector.broadcast %cst_55 : f32 to vector<8x178xf32>
    %155 = arith.mulf %154, %151 : vector<8x178xf32>
    %156 = arith.select %153, %151, %155 : vector<8x178xi1>, vector<8x178xf32>
    %157 = vector.extract_strided_slice %35 {offsets = [0, 39], sizes = [1, 178], strides = [1, 1]} : vector<1x256xf32> to vector<1x178xf32>
    %158 = vector.broadcast %157 : vector<1x178xf32> to vector<8x178xf32>
    %159 = arith.mulf %156, %158 : vector<8x178xf32>
    %c5 = arith.constant 5 : index
    %c0_56 = arith.constant 0 : index
    %c0_57 = arith.constant 0 : index
    %160 = vector.load %arg5[%c5, %c0_56, %c0_57] : memref<6x8x1xf32, #tpu.memory_space<vmem>>, vector<1x8x1xf32>
    %161 = vector.shape_cast %160 : vector<1x8x1xf32> to vector<8x1xf32>
    %162 = vector.extract_strided_slice %159 {offsets = [0, 0], sizes = [8, 148], strides = [1, 1]} : vector<8x178xf32> to vector<8x148xf32>
    %163 = vector.extract_strided_slice %159 {offsets = [0, 5], sizes = [8, 148], strides = [1, 1]} : vector<8x178xf32> to vector<8x148xf32>
    %164 = vector.extract_strided_slice %159 {offsets = [0, 10], sizes = [8, 148], strides = [1, 1]} : vector<8x178xf32> to vector<8x148xf32>
    %165 = vector.extract_strided_slice %159 {offsets = [0, 15], sizes = [8, 148], strides = [1, 1]} : vector<8x178xf32> to vector<8x148xf32>
    %166 = vector.extract_strided_slice %159 {offsets = [0, 20], sizes = [8, 148], strides = [1, 1]} : vector<8x178xf32> to vector<8x148xf32>
    %167 = vector.extract_strided_slice %159 {offsets = [0, 25], sizes = [8, 148], strides = [1, 1]} : vector<8x178xf32> to vector<8x148xf32>
    %168 = vector.extract_strided_slice %159 {offsets = [0, 30], sizes = [8, 148], strides = [1, 1]} : vector<8x178xf32> to vector<8x148xf32>
    %169 = tpu.concatenate %162, %163, %164, %165, %166, %167, %168 in 0 : vector<8x148xf32>, vector<8x148xf32>, vector<8x148xf32>, vector<8x148xf32>, vector<8x148xf32>, vector<8x148xf32>, vector<8x148xf32> -> vector<56x148xf32>
    %c4_58 = arith.constant 4 : index
    %c0_59 = arith.constant 0 : index
    %c0_60 = arith.constant 0 : index
    %170 = vector.load %arg4[%c4_58, %c0_59, %c0_60] : memref<5x8x56xf32, #tpu.memory_space<vmem>>, vector<1x8x56xf32>
    %171 = vector.shape_cast %170 : vector<1x8x56xf32> to vector<8x56xf32>
    %cst_61 = arith.constant dense<0.000000e+00> : vector<8x148xf32>
    %172 = tpu.matmul %171, %169, %cst_61 {dimension_numbers = #tpu.dot_dimension_numbers<[1], [0], [0], [1], [0, 0, 1, 1], [], []>} : vector<8x56xf32>, vector<56x148xf32>, vector<8x148xf32> -> vector<8x148xf32>
    %173 = vector.broadcast %161 : vector<8x1xf32> to vector<8x148xf32>
    %174 = arith.addf %172, %173 : vector<8x148xf32>
    %175 = vector.extract_strided_slice %128 {offsets = [0, 30], sizes = [8, 148], strides = [1, 1]} : vector<8x208xf32> to vector<8x148xf32>
    %176 = arith.addf %174, %175 : vector<8x148xf32>
    %177 = vector.extract_strided_slice %176 {offsets = [0, 0], sizes = [8, 128], strides = [1, 1]} : vector<8x148xf32> to vector<8x128xf32>
    %c0_62 = arith.constant 0 : index
    %c0_63 = arith.constant 0 : index
    %c0_64 = arith.constant 0 : index
    %178 = vector.load %arg6[%c0_62, %c0_63, %c0_64] : memref<1x8x128xf32, #tpu.memory_space<vmem>>, vector<1x8x128xf32>
    %179 = vector.shape_cast %178 : vector<1x8x128xf32> to vector<8x128xf32>
    %180 = vector.shape_cast %177 : vector<8x128xf32> to vector<1x8x128xf32>
    tpu.vector_store %arg6[%c0_62, %c0_63, %c0_64], %180 {strides = array<i32>} : memref<1x8x128xf32, #tpu.memory_space<vmem>>, vector<1x8x128xf32>,
    return
  }
  func.func @transform_1(%arg0: i32, %arg1: i32) -> (i32, i32) {
    %c0_i32 = arith.constant 0 : i32
    %c0_i32_0 = arith.constant 0 : i32
    %c0_i32_1 = arith.constant 0 : i32
    return %c0_i32, %c0_i32_0 : i32, i32
  }
  func.func @transform_2(%arg0: i32, %arg1: i32) -> (i32, i32, i32) {
    %c0_i32 = arith.constant 0 : i32
    %c0_i32_0 = arith.constant 0 : i32
    %c0_i32_1 = arith.constant 0 : i32
    %c0_i32_2 = arith.constant 0 : i32
    return %c0_i32, %c0_i32_0, %c0_i32_1 : i32, i32, i32
  }
  func.func @transform_3(%arg0: i32, %arg1: i32) -> (i32, i32, i32) {
    %c0_i32 = arith.constant 0 : i32
    %c0_i32_0 = arith.constant 0 : i32
    %c0_i32_1 = arith.constant 0 : i32
    %c0_i32_2 = arith.constant 0 : i32
    return %c0_i32, %c0_i32_0, %c0_i32_1 : i32, i32, i32
  }
  func.func @transform_4(%arg0: i32, %arg1: i32) -> (i32, i32, i32) {
    %c0_i32 = arith.constant 0 : i32
    %c0_i32_0 = arith.constant 0 : i32
    return %arg0, %c0_i32, %arg1 : i32, i32, i32
  }
}

</mosaic_0001>

<bundles_post_ra>
// kernel: tpu_custom_call.1
= control target key start
LH: loop header
LB: loop body
LE: loop exit
PB: predicated region body
PF: predicated region fallthrough
CT: control target
= control target key end

     0   :  { %9 = vsyncpa [#allocation5], 0  ;;  %s2228_s0 = inlined_call_operand.hbm [shape: f32[2,8,512], index: 0, kind: input, shape index: {}]   ;;  %s2229_s1 = inlined_call_operand.vmem [shape: f32[8,56], index: 1, kind: input, shape index: {}]   ;;  %s2230_s2 = inlined_call_operand.vmem [shape: f32[5,8,56], index: 2, kind: input, shape index: {}]   ;;  %s2231_s3 = inlined_call_operand.vmem [shape: f32[6,8,1], index: 3, kind: input, shape index: {}]   ;;  %s2232_s4 = inlined_call_operand.hbm [shape: f32[2,8,384], index: 4, kind: output, shape index: {}]  }
   0x1   :  { %11 = vsyncpa [#allocation5 + $0x1], 0  ;;  %s1835_s15 = smov 0   ;;  %s1837_s16 = smov 0  }
   0x2   :  { %s1839_s17 = smov 0   ;;  %s1841_s18 = smov 0  }
   0x3   :  { %s1843_s19 = smov 0   ;;  %s1845_s20 = smov 0  }
   0x4   :  { %s1847_s21 = smov 0   ;;  %s1849_s22 = smov 0  }
   0x5 LB: > { %2245 = sst [smem:[#allocation14_spill]] %s1760_s15  ;;  %s1241_s23 = sadd.s32 4294967295, %s1788_s22   ;;  %s1788_s22 = sphi %s1849_s22, %s17_s22   ;;  %s1784_s21 = sphi %s1847_s21, %s2271_s21   ;;  %s1780_s20 = sphi %s1845_s20, %s2270_s20   ;;  %s1776_s19 = sphi %s1843_s19, %s2269_s19   ;;  %s1772_s18 = sphi %s1841_s18, %s2268_s18   ;;  %s1768_s17 = sphi %s1839_s17, %s2267_s17   ;;  %s1764_s16 = sphi %s1837_s16, %s2273_s16   ;;  %s1760_s15 = sphi %s1835_s15, %s2272_s15  }
   0x6   : > { %2246 = sst [smem:[#allocation15_spill]] %s1768_s17  ;;  %s1242_s24 = sadd.s32 4294967294, %s1788_s22  }
   0x7   : > { %2247 = sst [smem:[#allocation16_spill]] %s1780_s20  ;;  %s26_s25 = sadd.s32 1, %s1780_s20 }
   0x8   : > { %2248 = sst [smem:[#allocation17_spill]] %s1784_s21  ;;  %p27_p0 = scmp.ge.s32.totalorder %s26_s25, 3 }
   0x9   : > { %s29_s26 = sadd.s32 1, %s1784_s21  ;;  %p111_p1 = scmp.ne.s32.totalorder %s1768_s17, %s1764_s16 }
   0xa   : > { %p112_p2 = scmp.eq.s32.totalorder %s1241_s23, 5  ;;  %s2275_s25 = smov (%p27_p0, %s26_s25), 0 }
   0xb   : > { %2249 = sst [smem:[#allocation18_spill]] %s2275_s25  ;;  %s2277_s26 = smov (!%p27_p0, %s29_s26), %s1784_s21 }
   0xc   : > { %s97_s27 = ssub.s32 %s1780_s20, %s2275_s25  ;;  %p1886_p3 = por %p112_p2, %p111_p1 }
   0xd   : > { %p31_p4 = scmp.ge.s32.totalorder %s2277_s26, 2  ;;  %p117_p5 = scmp.ne.s32.totalorder %s1764_s16, %s1760_s15 }
   0xe   : > { %s2250_s28 = scalar_select %p1886_p3, 1, 0 }
   0xf   : > { %p118_p6 = scmp.eq.s32.totalorder %s1242_s24, 5  ;;  %p1244_p7 = scmp.ge.s32.totalorder %s1788_s22, 1 }
  0x10   : > { %s2279_s26 = smov (%p31_p4, %s2277_s26), 0  ;;  %p145_p9 = scmp.lt.s32.totalorder %s1788_s22, 7 }
  0x11   : > { %2251 = sst [smem:[#allocation19_spill]] %s2279_s26  ;;  %p1895_p8 = por %p118_p6, %p117_p5 }
  0x12   : > { %s96_s30 = ssub.s32 %s1784_s21, %s2279_s26  ;;  %s101_s5 = sadd.s32 1, %s1768_s17 }
  0x13   : > { %s2252_s29 = scalar_select %p1895_p8, 1, 0 }
  0x14   : > { %s98_s6 = sor.u32 %s97_s27, %s96_s30  ;;  %p146_p10 = pnand %p1244_p7, %p145_p9 }
  0x15   : > { %2253 = sst [smem:[#allocation20_spill]] %s2252_s29  ;;  %p99_p11 = scmp.eq.s32.totalorder %s98_s6, 0 }
  0x16   : > { %149 = sbr.rel (%p146_p10) target bundleno = 2232 (0x8b8), region = 32  ;;  %s2233_s8 = sand.u32 (!%p146_p10), 1, %s1764_s16  }
  0x17   : > { %s1904_s7 = scalar_select %p99_p11, %s1768_s17, %s101_s5  }
  0x18   : > { %p164_p12 = scmp.lt.s32.totalorder (!%p146_p10), %s1772_s18, 0  ;;  %s1910_s9 = sshll.u32 (!%p146_p10), %s2233_s8, 3 }
  0x19   : > { %2254 = sst [smem:[#allocation21_spill]] %s1904_s7  ;;  %s165_s10 = ssub.s32 (!%p146_p10), 0, %s1772_s18 }
  0x1a   : > { %s1246_s11 = smin.u32 (!%p146_p10), %s1772_s18, %s165_s10  ;;  %s1915_s14 = sshll.u32 (!%p146_p10), %s1772_s18, 7 }
  0x1b   : > { %s167_s12 = sand.u32 (!%p146_p10), 1, %s1246_s11   ;;  %s2236_s23 = sshll.u32 (!%p146_p10), %s1776_s19, 2 }
  0x1c   : > { %s168_s13 = ssub.s32 (!%p146_p10), 0, %s167_s12  ;;  %s181_s27 = sshra.s32 (!%p146_p10), %s1915_s14, 7 }
  0x1d   : > { %s2281_s13 = smov (!%p164_p12, %s168_s13), %s167_s12  ;;  %p1374_p0 = scmp.eq.s32.totalorder %s1772_s18, 0 }
  0x1e   : > { %p1248_p13 = scmp.lt.s32.totalorder %s2281_s13, 0  ;;  %s174_s24 = sadd.s32 2, %s2281_s13 }
  0x1f   : > { %s184_s30 = sadd.s32 %s2236_s23, %s181_s27 }
  0x20   : > { %s2283_s24 = smov (!%p1248_p13, %s174_s24), %s2281_s13  ;;  %s1252_s5 = sshll.u32 %s184_s30, 7 }
  0x21   : > { %s1286_s6 = sshll.u32 %s2283_s24, 4  ;;  %s1928_s12 = scalar_lea.hbm %s2228_s0, %s1252_s5 }
  0x22   : > { %s1930_s8 = scalar_lea.vmem [#allocation2], %s1286_s6  ;;  %s190_s26 = scalar_lea.sflag [#allocation3], %s2283_s24 }
  0x23   : > { %s198_s13 = sshll.u32 %s1930_s8, 4  ;;  %s1636_s25 = scalar_lea.hbm %s1928_s12, 256  ;;  %s199_s13 = int_to_ptr.vmem [resolvable:$true] %s198_s13 }
  0x24   : > { %p1637_p1 = scmp.ne.s32.totalorder %s1928_s12, %s1636_s25  ;;  %s2239_s5 = scalar_lea.hbm %s2228_s0, 1024 }
  0x25   : > { %p1641_p5 = scmp.lt.u32.totalorder %s1928_s12, %s2228_s0  ;;  %p1642_p6 = scmp.lt.u32.totalorder %s2239_s5, %s1636_s25 }
  0x26   : > { %p1638_p2 = pnand %p1637_p1, %p1374_p0  ;;  %p1644_p9 = scmp.lt.u32.totalorder %s1636_s25, %s1928_s12 }
  0x27   : > { %p1643_p7 = por %p1642_p6, %p1641_p5 }
  0x28   : > { %p1639_p4 = pneg %p1638_p2 }
  0x29   : > { %p1645_p10 = por %p1644_p9, %p1643_p7 }
  0x2b   : > { %p1646_p11 = pnand %p1645_p10, %p1639_p4 }
  0x2d   : > { %1649 = shalt.err (!%p1646_p11)  }
  0x2e   : > { %s1650_s21 = scalar_lea.vmem %s199_s13, 256  ;;  %s1790_s27 = smov [#allocation2]  }
  0x2f   : > { %p1651_p12 = scmp.ne.s32.totalorder %s199_s13, %s1650_s21  ;;  %s1654_s30 = sshll.u32 %s1790_s27, 4  ;;  %s1952_s30 = int_to_ptr.vmem [resolvable:$false] %s1654_s30 }
  0x30   : > { %s2238_s23 = scalar_lea.vmem %s1952_s30, 512  ;;  %p1657_p2 = scmp.lt.s32.totalorder %s199_s13, %s1952_s30 }
  0x31   : > { %p1652_p13 = pnand %p1651_p12, %p1374_p0  ;;  %p1658_p5 = scmp.lt.s32.totalorder %s2238_s23, %s1650_s21 }
  0x33   : > { %p1653_p1 = pneg %p1652_p13  ;;  %p1659_p6 = por %p1658_p5, %p1657_p2 }
  0x35   : > { %p1660_p4 = pnand %p1659_p6, %p1653_p1 }
  0x37   : > { %1663 = shalt.err (!%p1660_p4)  }
  0x38   : > { %1365 = dma.hbm_to_vmem [thread:$0]  (%p1374_p0), %s1928_s12, 256, %s199_s13, %s190_s26 }
  0x39   : > { %1752 = dma.done.wait %s190_s26, 256 }
  0x3a   : > { %1753 = vsyncadd %s190_s26, 4294967040  ;;  %s210_s10 = sadd.s32 1, %s1772_s18  ;;  %s215_s11 = ssub.s32 1, %s2283_s24 }
  0x3b   : > { %p1964_p7 = scmp.lt.s32.totalorder %s210_s10, 3  ;;  %s1289_s21 = sadd.s32 128, %s1915_s14 }
  0x3c   : > { %s1290_s27 = sshll.u32 %s215_s11, 4  ;;  %s217_s23 = sshra.s32 %s1289_s21, 7 }
  0x3d   : > { %s2256_s5 = sshll.u32 %s1776_s19, 2  ;;  %s225_s13 = scalar_lea.vmem [#allocation2], %s1290_s27 }
  0x3e   : > { %s220_s20 = sadd.s32 %s2256_s5, %s217_s23  ;;  %s234_s25 = sshll.u32 %s225_s13, 4  ;;  %s235_s25 = int_to_ptr.vmem [resolvable:$true] %s234_s25 }
  0x3f   : > { %s1260_s12 = sshll.u32 %s220_s20, 7  ;;  %s226_s29 = scalar_lea.sflag [#allocation3], %s215_s11 }
  0x40   : > { %s222_s17 = scalar_lea.hbm %s2228_s0, %s1260_s12  ;;  %s2257_s20 = scalar_lea.hbm %s2228_s0, 1024 }
  0x41   : > { %s1664_s24 = scalar_lea.hbm %s222_s17, 256  ;;  %p1669_p11 = scmp.lt.u32.totalorder %s222_s17, %s2228_s0 }
  0x42   : > { %p1665_p0 = scmp.ne.s32.totalorder %s222_s17, %s1664_s24  ;;  %p1670_p12 = scmp.lt.u32.totalorder %s2257_s20, %s1664_s24 }
  0x43   : > { %p1672_p1 = scmp.lt.u32.totalorder %s1664_s24, %s222_s17 }
  0x44   : > { %p1666_p9 = pnand %p1665_p0, %p1964_p7  ;;  %p1671_p13 = por %p1670_p12, %p1669_p11 }
  0x46   : > { %p1667_p10 = pneg %p1666_p9  ;;  %p1673_p2 = por %p1672_p1, %p1671_p13 }
  0x48   : > { %p1674_p5 = pnand %p1673_p2, %p1667_p10 }
  0x4a   : > { %1677 = shalt.err (!%p1674_p5)  }
  0x4b   : > { %s1678_s7 = scalar_lea.vmem %s235_s25, 256  ;;  %p1685_p9 = scmp.lt.s32.totalorder %s235_s25, %s1952_s30 }
  0x4c   : > { %p1679_p6 = scmp.ne.s32.totalorder %s235_s25, %s1678_s7  ;;  %s2258_s15 = scalar_lea.vmem %s1952_s30, 512 }
  0x4d   : > { %p1686_p8 = scmp.lt.s32.totalorder %s2258_s15, %s1678_s7 }
  0x4e   : > { %p1680_p4 = pnand %p1679_p6, %p1964_p7 }
  0x4f   : > { %p1687_p3 = por %p1686_p8, %p1685_p9 }
  0x50   : > { %p1681_p0 = pneg %p1680_p4 }
  0x52   : > { %p1688_p11 = pnand %p1687_p3, %p1681_p0 }
  0x54   : > { %1691 = shalt.err (!%p1688_p11)  }
  0x55   : > { %1367 = dma.hbm_to_vmem [thread:$0]  (%p1964_p7), %s222_s17, 256, %s235_s25, %s226_s29  ;;  %v1795_v7 = vmov 0.0   ;;  %v240_v8 = vlaneseq  ;;  %v1796_v9 = vmov 0   ;;  %v262_v12 = vld [vmem:[%s2231_s3] sm:$0xff]  ;;  %vm269_vm8 = vcmask 1039360  }
  0x56   : > { %v254_v0 = vld [vmem:[%s1930_s8] sm:$0xff]  ;;  %v255_v1 = vld [vmem:[%s1930_s8 + $0x8] sm:$0xff]  ;;  %s1791_s30 = smov 127   ;;  %s1792_s23 = smov 125   ;;  %387 = vmatprep.mubr.f32.mxu0 %v1795_v7  ;;  %530 = vmatprep.mubr.f32.mxu1 %v1795_v7  ;;  %vm285_vm9 = vcmask 1022976   ;;  %vm277_vm10 = vcmask 1031168  }
  0x57   : > { %vm256_vm0 = vcmp.ge.f32.partialorder %v254_v0, 0.0  ;;  %vm257_vm1 = vcmp.ge.f32.partialorder %v255_v1, 0.0  ;;  %v258_v2 = vmul.f32 0.2, %v254_v0  ;;  %v259_v3 = vmul.f32 0.2, %v255_v1  ;;  %1484 = vset.pattern.permute.xlu1 %v1796_v9  ;;  %1515 = vset.pattern.permute.xlu0 %v1796_v9 }
  0x58   : > { %s1793_s11 = smov 126   ;;  %s1794_s17 = smov 124   ;;  %v241_v11 = vand.u32 127, %v240_v8  ;;  %vm293_vm11 = vcmask 1014784   ;;  %vm301_vm12 = vcmask 1006592   ;;  %vm309_vm13 = vcmask 998400  }
  0x59   : > { %v260_v4 = vsel %vm256_vm0, %v254_v0, %v258_v2  ;;  %v261_v5 = vsel %vm257_vm1, %v255_v1, %v259_v3  ;;  %s1264_s29 = sadd.s32 4294967242, %s1915_s14  ;;  %s1797_s8 = smov 123   ;;  %v313_v48 = vld [vmem:[%s2229_s1] sm:$0xff]  ;;  %vm319_vm14 = vcmask 457728   ;;  %v1266_v1 = vld [vmem:[%s2231_s3 + $0x8] sm:$0xff] }
  0x5a   : > { %v1459_v6 = vpack.i.bf16 %v261_v5, %v260_v4  ;;  %v243_v10 = vstv %s1264_s29  ;;  %s1798_s25 = smov 122   ;;  %v242_v13 = vadd.s32 128, %v241_v11  ;;  %s1799_s21 = smov 116  }
  0x5b   : > { %v244_v14 = vadd.s32 %v243_v10, %v241_v11  ;;  %s1800_s5 = smov 119   ;;  %s1801_s20 = smov 110  }
  0x5c   : > { %1460 = vrot.lane.b32.xlu0 %v1459_v6, %s1791_s30  ;;  %1470 = vrot.lane.b32.xlu1 %v1459_v6, %s1792_s23  ;;  %v245_v15 = vadd.s32 %v243_v10, %v242_v13  ;;  %s1802_s7 = smov 113   ;;  %s1804_s14 = smov 118  }
  0x5d   : > { %vm246_vm2 = vcmp.ge.s32.totalorder %v244_v14, 0  ;;  %vm248_vm3 = vcmp.lt.s32.totalorder %v244_v14, 300  ;;  %s1805_s12 = smov 108   ;;  %s1806_s13 = smov 98  }
  0x5e   : > { %vm250_vm4 = vmand %vm246_vm2, %vm248_vm3  ;;  %vm247_vm5 = vcmp.ge.s32.totalorder %v245_v15, 0  ;;  %vm249_vm6 = vcmp.lt.s32.totalorder %v245_v15, 300  ;;  %vm574_vm3 = vcmask 973824   ;;  %s1807_s26 = smov 103   ;;  %s2259_s6 = scalar_lea.vmem [#allocation4], %s1910_s9 }
  0x5f   : > { %v252_v16 = vsel %vm250_vm4, 1.0, %v1795_v7  ;;  %vm251_vm7 = vmand %vm247_vm5, %vm249_vm6  ;;  %vm582_vm4 = vcmask 949248   ;;  %vm590_vm5 = vcmask 924672   ;;  %vm598_vm6 = vcmask 900096   ;;  %p2262_p8 = scmp.ne.s32.totalorder %s2250_s28, 0 }
  0x60   : > { %1465 = vrot.lane.b32.xlu0 %v1459_v6, %s1793_s11  ;;  %1475 = vrot.lane.b32.xlu1 %v1459_v6, %s1794_s17  ;;  %v253_v17 = vsel %vm251_vm7, 1.0, %v1795_v7 }
  0x61   : > { %v2007_v18 = vpack.i.bf16 %v253_v17, %v252_v16 }
  0x64   : > { %1480 = vrot.lane.b32.xlu0 %v1459_v6, %s1797_s8  ;;  %305 = vrot.lane.b32.xlu1 %v260_v4, %s1798_s25 }
  0x68   : > { %307 = vrot.lane.b32.xlu0 %v261_v5, %s1798_s25  ;;  %316 = vperm.xlu1 %1484, %v262_v12  }
  0x6c   : > { %1486 = vrot.lane.b32.xlu0 %v2007_v18, %s1792_s23 }
  0xce   : > { %v1461_v19 = vpop.permute.xlu0 %1460  ;;  %v1471_v20 = vpop.permute.xlu1 %1470 }
  0xcf   : > { %v1463_v21 = vunpack.i.h.bf16 %v1461_v19  ;;  %v1462_v22 = vunpack.i.l.bf16 %v1461_v19  ;;  %v1473_v23 = vunpack.i.h.bf16 %v1471_v20  ;;  %v1472_v24 = vunpack.i.l.bf16 %v1471_v20 }
  0xd1   : > { %v1291_v25 = vpack.c.bf16 %v1463_v21, %v261_v5  ;;  %v270_v26 = vsel %vm269_vm8, %v1462_v22, %v1463_v21  ;;  %v286_v30 = vsel %vm285_vm9, %v1472_v24, %v1473_v23 }
  0xd2   : > { %v1466_v27 = vpop.permute.xlu0 %1465  ;;  %v1293_v28 = vpack.c.bf16 %v270_v26, %v260_v4  ;;  %v1476_v29 = vpop.permute.xlu1 %1475 }
  0xd3   : > { %v1468_v31 = vunpack.i.h.bf16 %v1466_v27  ;;  %v1467_v32 = vunpack.i.l.bf16 %v1466_v27  ;;  %1292 = vmatprep.subr.bf16.mxu0 %v1291_v25  ;;  %v1478_v33 = vunpack.i.h.bf16 %v1476_v29  ;;  %v1477_v34 = vunpack.i.l.bf16 %v1476_v29 }
  0xd4   : > { %1294 = vmatpush1.bf16.msra.mxu0 %v1293_v28 }
  0xd5   : > { %v1295_v35 = vpack.c.bf16 %v1473_v23, %v1468_v31  ;;  %v278_v36 = vsel %vm277_vm10, %v1467_v32, %v1468_v31  ;;  %v294_v41 = vsel %vm293_vm11, %v1477_v34, %v1478_v33  ;;  %v457_v32 = vld [vmem:[%s2230_s2] sm:$0xff] }
  0xd6   : > { %v1481_v37 = vpop.permute.xlu0 %1480  ;;  %v1297_v38 = vpack.c.bf16 %v286_v30, %v278_v36  ;;  %v306_v45 = vpop.permute.xlu1 %305 }
  0xd7   : > { %v1483_v39 = vunpack.i.h.bf16 %v1481_v37  ;;  %v1482_v40 = vunpack.i.l.bf16 %v1481_v37  ;;  %1296 = vmatprep.subr.bf16.mxu0 %v1295_v35 }
  0xd8   : > { %1298 = vmatpush1.bf16.msra.mxu0 %v1297_v38 }
  0xd9   : > { %v1299_v42 = vpack.c.bf16 %v1483_v39, %v1478_v33  ;;  %v302_v43 = vsel %vm301_vm12, %v1482_v40, %v1483_v39 }
  0xda   : > { %v1301_v44 = vpack.c.bf16 %v302_v43, %v294_v41  ;;  %v308_v46 = vpop.permute.xlu0 %307 }
  0xdb   : > { %1300 = vmatprep.subr.bf16.mxu0 %v1299_v42  ;;  %v310_v47 = vsel %vm309_vm13, %v306_v45, %v308_v46 }
  0xdc   : > { %1302 = vmatpush1.bf16.msra.mxu0 %v1301_v44 }
  0xdd   : > { %335 = vmatprep.subr.mxu0 %v308_v46 }
  0xde   : > { %v1487_v49 = vpop.permute.xlu0 %1486 }
  0xdf   : > { %v1489_v51 = vunpack.i.h.bf16 %v1487_v49  ;;  %v1488_v52 = vunpack.i.l.bf16 %v1487_v49 }
  0xe0   : > { %336 = vmatpush1.msra.mxu0 %v310_v47 }
  0xe1   : > { %1265 = vmatmul.mubr.msk.f32.vlgmr.msra.gmra.mrb[0].mxu0 %vm319_vm14, %v313_v48  ;;  %v406_v58 = vsel %vm285_vm9, %v1488_v52, %v1489_v51 }
  0xe2   : > { %676 = vmatprep.mubr.f32.mxu0 %v1795_v7 }
  0xe7   : > { %v317_v50 = vpop.permute.xlu1 %316 }
 0x1b4   : > { %v389_v53 = vpop.f32.mrb[0].mxu0 }
 0x1b5   : > { %v390_v54 = vadd.f32 %v389_v53, %v317_v50  ;;  %v391_v55 = vpop.f32.mrb[1].mxu0 }
 0x1b6   : > { %v392_v56 = vadd.f32 %v391_v55, %v317_v50  ;;  %v1268_v50 = vld [vmem:[%s2231_s3 + $0x10] sm:$0xff] }
 0x1b7   : > { %vm394_vm15 = vcmp.ge.f32.partialorder %v390_v54, 0.0  ;;  %v396_v57 = vmul.f32 0.2, %v390_v54 }
 0x1b8   : > { %vm395_vm0 = vcmp.ge.f32.partialorder %v392_v56, 0.0  ;;  %v397_v59 = vmul.f32 0.2, %v392_v56 }
 0x1b9   : > { %v398_v60 = vsel %vm394_vm15, %v390_v54, %v396_v57  ;;  %vm882_vm15 = vcmask 883712  }
 0x1ba   : > { %v399_v61 = vsel %vm395_vm0, %v392_v56, %v397_v59  ;;  %v409_v62 = vmul.f32 %v406_v58, %v398_v60  ;;  %vm890_vm0 = vcmask 842752  }
 0x1bb   : > { %v410_v63 = vmul.f32 %v1489_v51, %v399_v61 }
 0x1bd   : > { %v1495_v0 = vpack.i.bf16 %v410_v63, %v409_v62 }
 0x1bf   : > { %1496 = vrot.lane.b32.xlu0 %v1495_v0, %s1793_s11  ;;  %1491 = vrot.lane.b32.xlu1 %v1495_v0, %s1791_s30  ;;  %s1363_s11 = smul.u32 3, %s1776_s19  ;;  %s2261_s19 = sand.u32 1, %s1764_s16  }
 0x1c3   : > { %1506 = vrot.lane.b32.xlu0 %v1495_v0, %s1794_s17  ;;  %1501 = vrot.lane.b32.xlu1 %v1495_v0, %s1792_s23  ;;  %s1147_s17 = sadd.s32 %s1772_s18, %s1363_s11  ;;  %s2260_s18 = smov %s2259_s6 }
 0x1c4   : > { %s1281_s29 = sshll.u32 %s1147_s17, 7 }
 0x1c7   : > { %450 = vrot.lane.b32.xlu0 %v409_v62, %s1798_s25  ;;  %1511 = vrot.lane.b32.xlu1 %v1495_v0, %s1797_s8 }
 0x1cb   : > { %452 = vrot.lane.b32.xlu1 %v410_v63, %s1798_s25  ;;  %460 = vperm.xlu0 %1515, %v1266_v1  }
 0x1cf   : > { %1517 = vrot.lane.b32.xlu1 %v2007_v18, %s1798_s25 }
 0x231   : > { %v1497_v2 = vpop.permute.xlu0 %1496  ;;  %v1492_v3 = vpop.permute.xlu1 %1491 }
 0x232   : > { %v1494_v4 = vunpack.i.h.bf16 %v1492_v3  ;;  %v1493_v5 = vunpack.i.l.bf16 %v1492_v3  ;;  %v1499_v6 = vunpack.i.h.bf16 %v1497_v2  ;;  %v1498_v8 = vunpack.i.l.bf16 %v1497_v2 }
 0x234   : > { %v1303_v9 = vpack.c.bf16 %v1494_v4, %v410_v63  ;;  %v419_v10 = vsel %vm269_vm8, %v1493_v5, %v1494_v4  ;;  %v426_v16 = vsel %vm277_vm10, %v1498_v8, %v1499_v6 }
 0x235   : > { %v1507_v11 = vpop.permute.xlu0 %1506  ;;  %v1502_v12 = vpop.permute.xlu1 %1501  ;;  %v1305_v13 = vpack.c.bf16 %v419_v10, %v409_v62 }
 0x236   : > { %v1504_v14 = vunpack.i.h.bf16 %v1502_v12  ;;  %v1503_v15 = vunpack.i.l.bf16 %v1502_v12  ;;  %1304 = vmatprep.subr.bf16.mxu1 %v1303_v9  ;;  %v1509_v17 = vunpack.i.h.bf16 %v1507_v11  ;;  %v1508_v19 = vunpack.i.l.bf16 %v1507_v11 }
 0x237   : > { %1306 = vmatpush1.bf16.msra.mxu1 %v1305_v13 }
 0x238   : > { %v1307_v20 = vpack.c.bf16 %v1504_v14, %v1499_v6  ;;  %v433_v21 = vsel %vm285_vm9, %v1503_v15, %v1504_v14  ;;  %v440_v27 = vsel %vm293_vm11, %v1508_v19, %v1509_v17 }
 0x239   : > { %v1512_v22 = vpop.permute.xlu1 %1511  ;;  %v1309_v23 = vpack.c.bf16 %v433_v21, %v426_v16  ;;  %v451_v31 = vpop.permute.xlu0 %450  ;;  %v1269_v16 = vld [vmem:[%s2230_s2 + $0x8] sm:$0xff] }
 0x23a   : > { %v1514_v24 = vunpack.i.h.bf16 %v1512_v22  ;;  %v1513_v25 = vunpack.i.l.bf16 %v1512_v22  ;;  %1308 = vmatprep.subr.bf16.mxu1 %v1307_v20 }
 0x23b   : > { %1310 = vmatpush1.bf16.msra.mxu1 %v1309_v23 }
 0x23c   : > { %v1311_v26 = vpack.c.bf16 %v1514_v24, %v1509_v17  ;;  %v447_v28 = vsel %vm301_vm12, %v1513_v25, %v1514_v24 }
 0x23d   : > { %v1313_v29 = vpack.c.bf16 %v447_v28, %v440_v27  ;;  %v453_v30 = vpop.permute.xlu1 %452 }
 0x23e   : > { %1312 = vmatprep.subr.bf16.mxu1 %v1311_v26  ;;  %v454_v33 = vsel %vm309_vm13, %v451_v31, %v453_v30 }
 0x23f   : > { %1314 = vmatpush1.bf16.msra.mxu1 %v1313_v29 }
 0x240   : > { %478 = vmatprep.subr.mxu1 %v453_v30 }
 0x241   : > { %v1518_v34 = vpop.permute.xlu1 %1517 }
 0x242   : > { %v1520_v36 = vunpack.i.h.bf16 %v1518_v34  ;;  %v1519_v37 = vunpack.i.l.bf16 %v1518_v34 }
 0x243   : > { %479 = vmatpush1.msra.mxu1 %v454_v33 }
 0x244   : > { %1267 = vmatmul.mubr.msk.f32.vlgmr.msra.gmra.mrb[0].mxu1 %vm319_vm14, %v457_v32  ;;  %v547_v43 = vsel %vm309_vm13, %v1519_v37, %v1520_v36 }
 0x245   : > { %818 = vmatprep.mubr.f32.mxu1 %v1795_v7 }
 0x24a   : > { %v461_v35 = vpop.permute.xlu0 %460 }
 0x317   : > { %v532_v38 = vpop.f32.mrb[0].mxu1 }
 0x318   : > { %v2046_v39 = vadd.f32 %v532_v38, %v461_v35  ;;  %v534_v40 = vpop.f32.mrb[1].mxu1 }
 0x319   : > { %v2048_v41 = vadd.f32 %v534_v40, %v461_v35  ;;  %v1271_v35 = vld [vmem:[%s2231_s3 + $0x18] sm:$0xff] }
 0x31a   : > { %vm537_vm1 = vcmp.ge.f32.partialorder %v2046_v39, 0.0  ;;  %v539_v42 = vmul.f32 0.2, %v2046_v39 }
 0x31b   : > { %v540_v44 = vmul.f32 0.2, %v2048_v41  ;;  %vm538_vm2 = vcmp.ge.f32.partialorder %v2048_v41, 0.0 }
 0x31c   : > { %v541_v45 = vsel %vm537_vm1, %v2046_v39, %v539_v42  ;;  %vm898_vm1 = vcmask 801792  }
 0x31d   : > { %v542_v46 = vsel %vm538_vm2, %v2048_v41, %v540_v44  ;;  %v550_v47 = vmul.f32 %v547_v43, %v541_v45  ;;  %vm993_vm2 = vcmask 728064  }
 0x31e   : > { %v551_v48 = vmul.f32 %v1520_v36, %v542_v46 }
 0x320   : > { %v1526_v49 = vpack.i.bf16 %v551_v48, %v550_v47 }
 0x322   : > { %1527 = vrot.lane.b32.xlu0 %v1526_v49, %s1798_s25  ;;  %1522 = vrot.lane.b32.xlu1 %v1526_v49, %s1792_s23 }
 0x326   : > { %1537 = vrot.lane.b32.xlu0 %v1526_v49, %s1799_s21  ;;  %1532 = vrot.lane.b32.xlu1 %v1526_v49, %s1800_s5 }
 0x32a   : > { %594 = vrot.lane.b32.xlu0 %v550_v47, %s1801_s20  ;;  %1542 = vrot.lane.b32.xlu1 %v1526_v49, %s1802_s7 }
 0x32e   : > { %606 = vperm.xlu0 %1515, %v1268_v50   ;;  %596 = vrot.lane.b32.xlu1 %v551_v48, %s1801_s20 }
 0x332   : > { %1547 = vrot.lane.b32.xlu1 %v2007_v18, %s1802_s7 }
 0x394   : > { %v1528_v51 = vpop.permute.xlu0 %1527  ;;  %v1523_v52 = vpop.permute.xlu1 %1522 }
 0x395   : > { %v1525_v53 = vunpack.i.h.bf16 %v1523_v52  ;;  %v1524_v54 = vunpack.i.l.bf16 %v1523_v52  ;;  %v1530_v55 = vunpack.i.h.bf16 %v1528_v51  ;;  %v1529_v56 = vunpack.i.l.bf16 %v1528_v51 }
 0x397   : > { %v1315_v57 = vpack.c.bf16 %v1525_v53, %v551_v48  ;;  %v560_v58 = vsel %vm285_vm9, %v1524_v54, %v1525_v53  ;;  %v567_v0 = vsel %vm309_vm13, %v1529_v56, %v1530_v55 }
 0x398   : > { %v1317_v59 = vpack.c.bf16 %v560_v58, %v550_v47  ;;  %v1538_v60 = vpop.permute.xlu0 %1537  ;;  %v1533_v61 = vpop.permute.xlu1 %1532 }
 0x399   : > { %v1535_v62 = vunpack.i.h.bf16 %v1533_v61  ;;  %v1534_v63 = vunpack.i.l.bf16 %v1533_v61  ;;  %1316 = vmatprep.subr.bf16.mxu0 %v1315_v57  ;;  %v1540_v1 = vunpack.i.h.bf16 %v1538_v60  ;;  %v1539_v2 = vunpack.i.l.bf16 %v1538_v60 }
 0x39a   : > { %1318 = vmatpush1.bf16.msra.mxu0 %v1317_v59 }
 0x39b   : > { %v1319_v3 = vpack.c.bf16 %v1535_v62, %v1530_v55  ;;  %v575_v4 = vsel %vm574_vm3, %v1534_v63, %v1535_v62  ;;  %v583_v10 = vsel %vm582_vm4, %v1539_v2, %v1540_v1 }
 0x39c   : > { %v1321_v5 = vpack.c.bf16 %v575_v4, %v567_v0  ;;  %v1543_v6 = vpop.permute.xlu1 %1542  ;;  %v595_v15 = vpop.permute.xlu0 %594  ;;  %v1272_v0 = vld [vmem:[%s2230_s2 + $0x10] sm:$0xff] }
 0x39d   : > { %v1545_v8 = vunpack.i.h.bf16 %v1543_v6  ;;  %v1544_v9 = vunpack.i.l.bf16 %v1543_v6  ;;  %1320 = vmatprep.subr.bf16.mxu0 %v1319_v3 }
 0x39e   : > { %1322 = vmatpush1.bf16.msra.mxu0 %v1321_v5 }
 0x39f   : > { %v1323_v11 = vpack.c.bf16 %v1545_v8, %v1540_v1  ;;  %v591_v12 = vsel %vm590_vm5, %v1544_v9, %v1545_v8 }
 0x3a0   : > { %v1325_v13 = vpack.c.bf16 %v591_v12, %v583_v10  ;;  %v597_v14 = vpop.permute.xlu1 %596 }
 0x3a1   : > { %1324 = vmatprep.subr.bf16.mxu0 %v1323_v11  ;;  %v599_v17 = vsel %vm598_vm6, %v595_v15, %v597_v14 }
 0x3a2   : > { %1326 = vmatpush1.bf16.msra.mxu0 %v1325_v13 }
 0x3a3   : > { %624 = vmatprep.subr.mxu0 %v597_v14 }
 0x3a4   : > { %v1548_v19 = vpop.permute.xlu1 %1547 }
 0x3a5   : > { %v1550_v20 = vunpack.i.h.bf16 %v1548_v19  ;;  %v1549_v21 = vunpack.i.l.bf16 %v1548_v19 }
 0x3a6   : > { %625 = vmatpush1.msra.mxu0 %v599_v17 }
 0x3a7   : > { %1270 = vmatmul.mubr.msk.f32.vlgmr.msra.gmra.mrb[2].mxu0 %vm319_vm14, %v1269_v16  ;;  %v693_v28 = vsel %vm590_vm5, %v1549_v21, %v1550_v20 }
 0x3a8   : > { %976 = vmatprep.mubr.f32.mxu0 %v1795_v7 }
 0x3ad   : > { %v607_v22 = vpop.permute.xlu0 %606 }
 0x47a   : > { %v678_v23 = vpop.f32.mrb[2].mxu0 }
 0x47b   : > { %v679_v24 = vadd.f32 %v678_v23, %v607_v22  ;;  %v680_v25 = vpop.f32.mrb[3].mxu0 }
 0x47c   : > { %v681_v26 = vadd.f32 %v680_v25, %v607_v22 }
 0x47d   : > { %vm683_vm7 = vcmp.ge.f32.partialorder %v679_v24, 0.0  ;;  %v685_v27 = vmul.f32 0.2, %v679_v24 }
 0x47e   : > { %vm684_vm8 = vcmp.ge.f32.partialorder %v681_v26, 0.0  ;;  %v686_v29 = vmul.f32 0.2, %v681_v26 }
 0x47f   : > { %v687_v30 = vsel %vm683_vm7, %v679_v24, %v685_v27  ;;  %v1274_v24 = vld [vmem:[%s2231_s3 + $0x20] sm:$0xff] }
 0x480   : > { %v688_v31 = vsel %vm684_vm8, %v681_v26, %v686_v29  ;;  %v696_v32 = vmul.f32 %v693_v28, %v687_v30 }
 0x481   : > { %v697_v33 = vmul.f32 %v1550_v20, %v688_v31 }
 0x483   : > { %v1556_v34 = vpack.i.bf16 %v697_v33, %v696_v32 }
 0x485   : > { %1557 = vrot.lane.b32.xlu1 %v1556_v34, %s1798_s25  ;;  %1552 = vrot.lane.b32.xlu0 %v1556_v34, %s1792_s23  ;;  %s1803_s23 = smov 104  }
 0x489   : > { %1567 = vrot.lane.b32.xlu1 %v1556_v34, %s1799_s21  ;;  %1562 = vrot.lane.b32.xlu0 %v1556_v34, %s1800_s5  ;;  %s1808_s21 = smov 89  }
 0x48d   : > { %737 = vrot.lane.b32.xlu1 %v696_v32, %s1801_s20  ;;  %1572 = vrot.lane.b32.xlu0 %v1556_v34, %s1802_s7 }
 0x491   : > { %748 = vperm.xlu1 %1484, %v1271_v35   ;;  %739 = vrot.lane.b32.xlu0 %v697_v33, %s1801_s20 }
 0x495   : > { %829 = vrot.lane.b32.xlu1 %v2048_v41, %s1801_s20  ;;  %827 = vrot.lane.b32.xlu0 %v2046_v39, %s1801_s20 }
 0x499   : > { %1577 = vrot.lane.b32.xlu0 %v2007_v18, %s1803_s23  ;;  %s1151_s23 = sshll.u32 %s2259_s6, 4  ;;  %s2173_s23 = int_to_ptr.vmem [resolvable:$true] %s1151_s23 }
 0x4f7   : > { %v1558_v36 = vpop.permute.xlu1 %1557  ;;  %v1553_v37 = vpop.permute.xlu0 %1552 }
 0x4f8   : > { %v1555_v38 = vunpack.i.h.bf16 %v1553_v37  ;;  %v1554_v40 = vunpack.i.l.bf16 %v1553_v37  ;;  %v1560_v42 = vunpack.i.h.bf16 %v1558_v36  ;;  %v1559_v43 = vunpack.i.l.bf16 %v1558_v36 }
 0x4fa   : > { %v1327_v44 = vpack.c.bf16 %v1555_v38, %v697_v33  ;;  %v706_v45 = vsel %vm285_vm9, %v1554_v40, %v1555_v38  ;;  %v713_v39 = vsel %vm309_vm13, %v1559_v43, %v1560_v42  ;;  %vm846_vm9 = vcmask 850944  }
 0x4fb   : > { %v1329_v46 = vpack.c.bf16 %v706_v45, %v696_v32  ;;  %v1568_v47 = vpop.permute.xlu1 %1567  ;;  %v1563_v48 = vpop.permute.xlu0 %1562  ;;  %vm867_vm13 = vcmask 965632  }
 0x4fc   : > { %v1565_v49 = vunpack.i.h.bf16 %v1563_v48  ;;  %v1564_v41 = vunpack.i.l.bf16 %v1563_v48  ;;  %1328 = vmatprep.subr.bf16.mxu1 %v1327_v44  ;;  %v1570_v50 = vunpack.i.h.bf16 %v1568_v47  ;;  %v1569_v51 = vunpack.i.l.bf16 %v1568_v47 }
 0x4fd   : > { %1330 = vmatpush1.bf16.msra.mxu1 %v1329_v46 }
 0x4fe   : > { %v1331_v52 = vpack.c.bf16 %v1565_v49, %v1560_v42  ;;  %v720_v53 = vsel %vm574_vm3, %v1564_v41, %v1565_v49  ;;  %v727_v58 = vsel %vm582_vm4, %v1569_v51, %v1570_v50 }
 0x4ff   : > { %v1333_v54 = vpack.c.bf16 %v720_v53, %v713_v39  ;;  %v1573_v55 = vpop.permute.xlu0 %1572  ;;  %v738_v63 = vpop.permute.xlu1 %737 }
 0x500   : > { %v1575_v56 = vunpack.i.h.bf16 %v1573_v55  ;;  %v1574_v57 = vunpack.i.l.bf16 %v1573_v55  ;;  %1332 = vmatprep.subr.bf16.mxu1 %v1331_v52  ;;  %v1275_v52 = vld [vmem:[%s2230_s2 + $0x18] sm:$0xff] }
 0x501   : > { %1334 = vmatpush1.bf16.msra.mxu1 %v1333_v54 }
 0x502   : > { %v1335_v59 = vpack.c.bf16 %v1575_v56, %v1570_v50  ;;  %v734_v60 = vsel %vm590_vm5, %v1574_v57, %v1575_v56 }
 0x503   : > { %v1337_v61 = vpack.c.bf16 %v734_v60, %v727_v58  ;;  %v740_v62 = vpop.permute.xlu0 %739 }
 0x504   : > { %1336 = vmatprep.subr.bf16.mxu1 %v1335_v59  ;;  %v741_v1 = vsel %vm598_vm6, %v738_v63, %v740_v62 }
 0x505   : > { %1338 = vmatpush1.bf16.msra.mxu1 %v1337_v61 }
 0x506   : > { %766 = vmatprep.subr.mxu1 %v740_v62 }
 0x507   : > { %v828_v3 = vpop.permute.xlu0 %827 }
 0x509   : > { %767 = vmatpush1.msra.mxu1 %v741_v1 }
 0x50a   : > { %1273 = vmatmul.mubr.msk.f32.vlgmr.msra.gmra.mrb[2].mxu1 %vm319_vm14, %v1272_v0 }
 0x50b   : > { %1119 = vmatprep.mubr.f32.mxu1 %v1795_v7  ;;  %v1578_v4 = vpop.permute.xlu0 %1577 }
 0x50c   : > { %v1580_v10 = vunpack.i.h.bf16 %v1578_v4  ;;  %v1579_v11 = vunpack.i.l.bf16 %v1578_v4 }
 0x50e   : > { %v847_v7 = vsel %vm846_vm9, %v1579_v11, %v1580_v10 }
 0x510   : > { %v749_v2 = vpop.permute.xlu1 %748 }
 0x514   : > { %v830_v5 = vpop.permute.xlu1 %829 }
 0x515   : > { %v831_v12 = vsel %vm598_vm6, %v828_v3, %v830_v5 }
 0x5dd   : > { %v820_v6 = vpop.f32.mrb[2].mxu1 }
 0x5de   : > { %v821_v8 = vadd.f32 %v820_v6, %v749_v2  ;;  %v822_v9 = vpop.f32.mrb[3].mxu1  ;;  %v1277_v6 = vld [vmem:[%s2231_s3 + $0x28] sm:$0xff] }
 0x5df   : > { %v823_v13 = vadd.f32 %v822_v9, %v749_v2 }
 0x5e0   : > { %v2108_v14 = vadd.f32 %v831_v12, %v821_v8 }
 0x5e1   : > { %v2110_v15 = vadd.f32 %v830_v5, %v823_v13 }
 0x5e2   : > { %v838_v16 = vmul.f32 0.2, %v2108_v14  ;;  %vm836_vm10 = vcmp.ge.f32.partialorder %v2108_v14, 0.0 }
 0x5e3   : > { %vm837_vm11 = vcmp.ge.f32.partialorder %v2110_v15, 0.0  ;;  %v839_v17 = vmul.f32 0.2, %v2110_v15 }
 0x5e4   : > { %v840_v19 = vsel %vm836_vm10, %v2108_v14, %v838_v16 }
 0x5e5   : > { %v841_v20 = vsel %vm837_vm11, %v2110_v15, %v839_v17  ;;  %v850_v21 = vmul.f32 %v847_v7, %v840_v19 }
 0x5e6   : > { %v851_v22 = vmul.f32 %v1580_v10, %v841_v20 }
 0x5e8   : > { %v1586_v23 = vpack.i.bf16 %v851_v22, %v850_v21 }
 0x5ea   : > { %1587 = vrot.lane.b32.xlu0 %v1586_v23, %s1804_s14  ;;  %1582 = vrot.lane.b32.xlu1 %v1586_v23, %s1797_s8 }
 0x5ee   : > { %1597 = vrot.lane.b32.xlu0 %v1586_v23, %s1805_s12  ;;  %1592 = vrot.lane.b32.xlu1 %v1586_v23, %s1802_s7 }
 0x5f2   : > { %894 = vrot.lane.b32.xlu0 %v850_v21, %s1806_s13  ;;  %1602 = vrot.lane.b32.xlu1 %v1586_v23, %s1807_s26 }
 0x5f6   : > { %906 = vperm.xlu0 %1515, %v1274_v24   ;;  %896 = vrot.lane.b32.xlu1 %v851_v22, %s1806_s13 }
 0x5fa   : > { %1607 = vrot.lane.b32.xlu1 %v2007_v18, %s1808_s21 }
 0x65c   : > { %v1588_v25 = vpop.permute.xlu0 %1587  ;;  %v1583_v26 = vpop.permute.xlu1 %1582 }
 0x65d   : > { %v1585_v27 = vunpack.i.h.bf16 %v1583_v26  ;;  %v1584_v28 = vunpack.i.l.bf16 %v1583_v26  ;;  %v1590_v29 = vunpack.i.h.bf16 %v1588_v25  ;;  %v1589_v30 = vunpack.i.l.bf16 %v1588_v25 }
 0x65f   : > { %v1339_v31 = vpack.c.bf16 %v1585_v27, %v851_v22  ;;  %v860_v32 = vsel %vm301_vm12, %v1584_v28, %v1585_v27  ;;  %v868_v38 = vsel %vm867_vm13, %v1589_v30, %v1590_v29 }
 0x660   : > { %v1341_v33 = vpack.c.bf16 %v860_v32, %v850_v21  ;;  %v1598_v34 = vpop.permute.xlu0 %1597  ;;  %v1593_v35 = vpop.permute.xlu1 %1592 }
 0x661   : > { %v1595_v36 = vunpack.i.h.bf16 %v1593_v35  ;;  %v1594_v37 = vunpack.i.l.bf16 %v1593_v35  ;;  %1340 = vmatprep.subr.bf16.mxu0 %v1339_v31  ;;  %v1600_v18 = vunpack.i.h.bf16 %v1598_v34  ;;  %v1599_v40 = vunpack.i.l.bf16 %v1598_v34 }
 0x662   : > { %1342 = vmatpush1.bf16.msra.mxu0 %v1341_v33 }
 0x663   : > { %v1343_v42 = vpack.c.bf16 %v1595_v36, %v1590_v29  ;;  %v875_v43 = vsel %vm590_vm5, %v1594_v37, %v1595_v36  ;;  %v883_v48 = vsel %vm882_vm15, %v1599_v40, %v1600_v18  ;;  %v1278_v36 = vld [vmem:[%s2230_s2 + $0x20] sm:$0xff] }
 0x664   : > { %v1345_v44 = vpack.c.bf16 %v875_v43, %v868_v38  ;;  %v1603_v45 = vpop.permute.xlu1 %1602  ;;  %v895_v51 = vpop.permute.xlu0 %894 }
 0x665   : > { %v1605_v46 = vunpack.i.h.bf16 %v1603_v45  ;;  %v1604_v47 = vunpack.i.l.bf16 %v1603_v45  ;;  %1344 = vmatprep.subr.bf16.mxu0 %v1343_v42 }
 0x666   : > { %1346 = vmatpush1.bf16.msra.mxu0 %v1345_v44 }
 0x667   : > { %v1347_v49 = vpack.c.bf16 %v1605_v46, %v1600_v18  ;;  %v891_v41 = vsel %vm890_vm0, %v1604_v47, %v1605_v46 }
 0x668   : > { %v1349_v39 = vpack.c.bf16 %v891_v41, %v883_v48  ;;  %v897_v50 = vpop.permute.xlu1 %896 }
 0x669   : > { %1348 = vmatprep.subr.bf16.mxu0 %v1347_v49  ;;  %v899_v53 = vsel %vm898_vm1, %v895_v51, %v897_v50 }
 0x66a   : > { %1350 = vmatpush1.bf16.msra.mxu0 %v1349_v39 }
 0x66b   : > { %924 = vmatprep.subr.mxu0 %v897_v50 }
 0x66c   : > { %v1608_v54 = vpop.permute.xlu1 %1607 }
 0x66d   : > { %v1610_v55 = vunpack.i.h.bf16 %v1608_v54  ;;  %v1609_v56 = vunpack.i.l.bf16 %v1608_v54 }
 0x66e   : > { %925 = vmatpush1.msra.mxu0 %v899_v53 }
 0x66f   : > { %1276 = vmatmul.mubr.msk.f32.vlgmr.msra.gmra.mrb[4].mxu0 %vm319_vm14, %v1275_v52  ;;  %v994_v63 = vsel %vm993_vm2, %v1609_v56, %v1610_v55 }
 0x675   : > { %v907_v57 = vpop.permute.xlu0 %906 }
 0x742   : > { %v978_v58 = vpop.f32.mrb[4].mxu0 }
 0x743   : > { %v979_v59 = vadd.f32 %v978_v58, %v907_v57  ;;  %v980_v60 = vpop.f32.mrb[5].mxu0 }
 0x744   : > { %v981_v61 = vadd.f32 %v980_v60, %v907_v57 }
 0x745   : > { %vm983_vm3 = vcmp.ge.f32.partialorder %v979_v59, 0.0  ;;  %v985_v62 = vmul.f32 0.2, %v979_v59 }
 0x746   : > { %vm984_vm4 = vcmp.ge.f32.partialorder %v981_v61, 0.0  ;;  %v986_v0 = vmul.f32 0.2, %v981_v61 }
 0x747   : > { %v987_v1 = vsel %vm983_vm3, %v979_v59, %v985_v62 }
 0x748   : > { %v988_v2 = vsel %vm984_vm4, %v981_v61, %v986_v0  ;;  %v997_v3 = vmul.f32 %v994_v63, %v987_v1 }
 0x749   : > { %v998_v4 = vmul.f32 %v1610_v55, %v988_v2 }
 0x74b   : > { %v1616_v5 = vpack.i.bf16 %v998_v4, %v997_v3 }
 0x74d   : > { %1617 = vrot.lane.b32.xlu1 %v1616_v5, %s1804_s14  ;;  %1612 = vrot.lane.b32.xlu0 %v1616_v5, %s1797_s8  ;;  %s2171_s14 = scalar_lea.hbm %s2232_s4, %s1281_s29 }
 0x751   : > { %1627 = vrot.lane.b32.xlu1 %v1616_v5, %s1805_s12  ;;  %1622 = vrot.lane.b32.xlu0 %v1616_v5, %s1802_s7  ;;  %s1136_s12 = scalar_lea.sflag [#allocation5], %s2261_s19 }
 0x755   : > { %1038 = vrot.lane.b32.xlu1 %v997_v3, %s1806_s13  ;;  %1632 = vrot.lane.b32.xlu0 %v1616_v5, %s1807_s26  ;;  %s1809_s26 = smov [#allocation4]  }
 0x756   : > { %s1696_s24 = sshll.u32 %s1809_s26, 4  ;;  %s1697_s24 = int_to_ptr.vmem [resolvable:$false] %s1696_s24 }
 0x757   : > { %s1698_s10 = scalar_lea.vmem %s1697_s24, 256  ;;  %p1699_p12 = scmp.lt.s32.totalorder %s2173_s23, %s1697_s24 }
 0x759   : > { %1049 = vperm.xlu1 %1484, %v1277_v6   ;;  %1040 = vrot.lane.b32.xlu0 %v998_v4, %s1806_s13 }
 0x75d   : > { %1129 = vrot.lane.b32.xlu1 %v2110_v15, %s1806_s13  ;;  %1127 = vrot.lane.b32.xlu0 %v2108_v14, %s1806_s13  ;;  %s1692_s13 = scalar_lea.vmem %s2173_s23, 128 }
 0x75e   : > { %p1693_p3 = scmp.ne.s32.totalorder %s2173_s23, %s1692_s13  ;;  %p1700_p13 = scmp.lt.s32.totalorder %s1698_s10, %s1692_s13 }
 0x760   : > { %p1694_p7 = pnand %p1693_p3, %p2262_p8  ;;  %p1701_p1 = por %p1700_p13, %p1699_p12 }
 0x762   : > { %p1695_p10 = pneg %p1694_p7 }
 0x764   : > { %p1702_p2 = pnand %p1701_p1, %p1695_p10 }
 0x7bf   : > { %v1618_v8 = vpop.permute.xlu1 %1617  ;;  %v1613_v9 = vpop.permute.xlu0 %1612 }
 0x7c0   : > { %v1615_v10 = vunpack.i.h.bf16 %v1613_v9  ;;  %v1614_v11 = vunpack.i.l.bf16 %v1613_v9  ;;  %v1620_v12 = vunpack.i.h.bf16 %v1618_v8  ;;  %v1619_v13 = vunpack.i.l.bf16 %v1618_v8 }
 0x7c2   : > { %v1351_v16 = vpack.c.bf16 %v1615_v10, %v998_v4  ;;  %v1007_v7 = vsel %vm301_vm12, %v1614_v11, %v1615_v10  ;;  %v1014_v15 = vsel %vm867_vm13, %v1619_v13, %v1620_v12 }
 0x7c3   : > { %v1353_v17 = vpack.c.bf16 %v1007_v7, %v997_v3  ;;  %v1628_v19 = vpop.permute.xlu1 %1627  ;;  %v1623_v20 = vpop.permute.xlu0 %1622 }
 0x7c4   : > { %v1625_v21 = vunpack.i.h.bf16 %v1623_v20  ;;  %v1624_v22 = vunpack.i.l.bf16 %v1623_v20  ;;  %1352 = vmatprep.subr.bf16.mxu1 %v1351_v16  ;;  %v1630_v23 = vunpack.i.h.bf16 %v1628_v19  ;;  %v1629_v14 = vunpack.i.l.bf16 %v1628_v19 }
 0x7c5   : > { %1354 = vmatpush1.bf16.msra.mxu1 %v1353_v17 }
 0x7c6   : > { %v1355_v24 = vpack.c.bf16 %v1625_v21, %v1620_v12  ;;  %v1021_v25 = vsel %vm590_vm5, %v1624_v22, %v1625_v21  ;;  %v1028_v30 = vsel %vm882_vm15, %v1629_v14, %v1630_v23 }
 0x7c7   : > { %v1357_v26 = vpack.c.bf16 %v1021_v25, %v1014_v15  ;;  %v1633_v27 = vpop.permute.xlu0 %1632  ;;  %v1039_v35 = vpop.permute.xlu1 %1038 }
 0x7c8   : > { %v1635_v28 = vunpack.i.h.bf16 %v1633_v27  ;;  %v1634_v29 = vunpack.i.l.bf16 %v1633_v27  ;;  %1356 = vmatprep.subr.bf16.mxu1 %v1355_v24 }
 0x7c9   : > { %1358 = vmatpush1.bf16.msra.mxu1 %v1357_v26 }
 0x7ca   : > { %v1359_v31 = vpack.c.bf16 %v1635_v28, %v1630_v23  ;;  %v1035_v32 = vsel %vm890_vm0, %v1634_v29, %v1635_v28 }
 0x7cb   : > { %v1361_v33 = vpack.c.bf16 %v1035_v32, %v1028_v30  ;;  %v1041_v34 = vpop.permute.xlu0 %1040 }
 0x7cc   : > { %1360 = vmatprep.subr.bf16.mxu1 %v1359_v31  ;;  %v1042_v37 = vsel %vm898_vm1, %v1039_v35, %v1041_v34 }
 0x7cd   : > { %1362 = vmatpush1.bf16.msra.mxu1 %v1361_v33 }
 0x7ce   : > { %1067 = vmatprep.subr.mxu1 %v1041_v34 }
 0x7cf   : > { %v1128_v42 = vpop.permute.xlu0 %1127 }
 0x7d1   : > { %1068 = vmatpush1.msra.mxu1 %v1042_v37 }
 0x7d2   : > { %1279 = vmatmul.mubr.msk.f32.vlgmr.msra.gmra.mrb[4].mxu1 %vm319_vm14, %v1278_v36 }
 0x7d8   : > { %v1050_v38 = vpop.permute.xlu1 %1049 }
 0x7dc   : > { %v1130_v18 = vpop.permute.xlu1 %1129 }
 0x7dd   : > { %v1131_v45 = vsel %vm898_vm1, %v1128_v42, %v1130_v18 }
 0x8a5   : > { %v1121_v40 = vpop.f32.mrb[4].mxu1 }
 0x8a6   : > { %v1122_v43 = vadd.f32 %v1121_v40, %v1050_v38  ;;  %v1123_v44 = vpop.f32.mrb[5].mxu1 }
 0x8a8   : > { %v1133_v46 = vadd.f32 %v1131_v45, %v1122_v43 }
 0x8aa   : > { %1134 = vst [vmem:[%s2260_s18] sm:$0xff] %v1133_v46 }
 0x8ab   : > { %1705 = shalt.err (!%p1702_p2)
}
 0x8ac   : > { %s1706_s9 = scalar_lea.hbm %s2171_s14, 128  ;;  %s1710_s20 = scalar_lea.hbm %s2232_s4, 768 }
 0x8ad   : > { %p1707_p5 = scmp.ne.s32.totalorder %s2171_s14, %s1706_s9  ;;  %p1711_p0 = scmp.lt.u32.totalorder %s2171_s14, %s2232_s4 }
 0x8ae   : > { %p1712_p9 = scmp.lt.u32.totalorder %s1710_s20, %s1706_s9  ;;  %p1714_p3 = scmp.lt.u32.totalorder %s1706_s9, %s2171_s14 }
 0x8af   : > { %p1708_p6 = pnand %p1707_p5, %p2262_p8 }
 0x8b0   : > { %p1713_p11 = por %p1712_p9, %p1711_p0 }
 0x8b1   : > { %p1709_p4 = pneg %p1708_p6 }
 0x8b2   : > { %p1715_p7 = por %p1714_p3, %p1713_p11 }
 0x8b4   : > { %p1716_p10 = pnand %p1715_p7, %p1709_p4 }
 0x8b6   : > { %1719 = shalt.err (!%p1716_p10)
}
 0x8b7   : > { %1368 = dma.vmem_to_hbm [thread:$0]  (%p2262_p8), %s2173_s23, 128, %s2171_s14, %s1136_s12  }
 0x8b8 PF: > { %s2263_s8 = sld [smem:[#allocation14_spill]]  ;;  %s2264_s7 = sld [smem:[#allocation20_spill]] }
 0x8b9   : > { %p1376_p12 = scmp.ge.s32.totalorder %s1788_s22, 2 }
 0x8be   : > { %s1163_s11 = sand.u32 1, %s2263_s8   ;;  %p2265_p13 = scmp.ne.s32.totalorder %s2264_s7, 0 }
 0x8bf   : > { %s1164_s17 = scalar_lea.sflag [#allocation5], %s1163_s11 }
 0x8c0   : > { %p1371_p1 = pnand %p1376_p12, %p2265_p13 }
 0x8c2   : > { %1755 = dma.done.wait (!%p1371_p1), %s1164_s17, 128  }
 0x8c3   : > { %1757 = vsyncadd (!%p1371_p1), %s1164_s17, 4294967168  ;;  %s17_s22 = sadd.s32 1, %s1788_s22   ;;  %s2266_s29 = sld [smem:[#allocation15_spill]] }
 0x8c4   : > { %p14_p2 = scmp.ge.s32.totalorder %s17_s22, 8   ;;  %s2267_s17 = sld [smem:[#allocation21_spill]] }
 0x8c5   : > { %s2268_s18 = sld [smem:[#allocation16_spill]]  ;;  %s2269_s19 = sld [smem:[#allocation17_spill]] }
 0x8c6   : > { %s2270_s20 = sld [smem:[#allocation18_spill]]  ;;  %s2271_s21 = sld [smem:[#allocation19_spill]] }
 0x8c7   : > { %s2272_s15 = smov %s1764_s16  ;;  %16 = sbr.rel (!%p14_p2) target bundleno = 5 (0x5), region = 98 }
 0x8c9   : > { %s2273_s16 = smov %s2266_s29 }
 0x8ce   :  { %1169 = vsyncpa [#allocation5], 1 }
 0x8cf   :  { %1171 = vsyncpa [#allocation5 + $0x1], 1 }
 0x8d0   :  { %1172 = vsyncmov [#allocation3] }
 0x8d3   :  { %s1173_s28 = vpop.sfrf %1172 }
 0x8d4   :  { %p1284_p8 = scmp.ne.s32.totalorder %s1173_s28, 0 }
 0x8d6   :  { %1177 = shalt.err (%p1284_p8)  }
 0x8d7   :  { %1179 = vsyncmov [#allocation3 + $0x1] }
 0x8da   :  { %s1180_s6 = vpop.sfrf %1179 }
 0x8db   :  { %p1285_p5 = scmp.ne.s32.totalorder %s1180_s6, 0 }
 0x8dd   :  { %1184 = shalt.err (%p1285_p5)  }

// kernel: tpu_custom_call.1
= control target key start
LH: loop header
LB: loop body
LE: loop exit
PB: predicated region body
PF: predicated region fallthrough
CT: control target
= control target key end

     0   :  { %9 = vsyncpa [#allocation5], 0  ;;  %s2228_s0 = inlined_call_operand.hbm [shape: f32[2,8,512], index: 0, kind: input, shape index: {}]   ;;  %s2229_s1 = inlined_call_operand.vmem [shape: f32[8,56], index: 1, kind: input, shape index: {}]   ;;  %s2230_s2 = inlined_call_operand.vmem [shape: f32[5,8,56], index: 2, kind: input, shape index: {}]   ;;  %s2231_s3 = inlined_call_operand.vmem [shape: f32[6,8,1], index: 3, kind: input, shape index: {}]   ;;  %s2232_s4 = inlined_call_operand.hbm [shape: f32[2,8,384], index: 4, kind: output, shape index: {}]  }
   0x1   :  { %11 = vsyncpa [#allocation5 + $0x1], 0  ;;  %s1835_s15 = smov 0   ;;  %s1837_s16 = smov 0  }
   0x2   :  { %s1839_s17 = smov 0   ;;  %s1841_s18 = smov 0  }
   0x3   :  { %s1843_s19 = smov 0   ;;  %s1845_s20 = smov 0  }
   0x4   :  { %s1847_s21 = smov 0   ;;  %s1849_s22 = smov 0  }
   0x5 LB: > { %2245 = sst [smem:[#allocation14_spill]] %s1760_s15  ;;  %s1241_s23 = sadd.s32 4294967295, %s1788_s22   ;;  %s1788_s22 = sphi %s1849_s22, %s17_s22   ;;  %s1784_s21 = sphi %s1847_s21, %s2271_s21   ;;  %s1780_s20 = sphi %s1845_s20, %s2270_s20   ;;  %s1776_s19 = sphi %s1843_s19, %s2269_s19   ;;  %s1772_s18 = sphi %s1841_s18, %s2268_s18   ;;  %s1768_s17 = sphi %s1839_s17, %s2267_s17   ;;  %s1764_s16 = sphi %s1837_s16, %s2273_s16   ;;  %s1760_s15 = sphi %s1835_s15, %s2272_s15  }
   0x6   : > { %2246 = sst [smem:[#allocation15_spill]] %s1768_s17  ;;  %s1242_s24 = sadd.s32 4294967294, %s1788_s22  }
   0x7   : > { %2247 = sst [smem:[#allocation16_spill]] %s1780_s20  ;;  %s26_s25 = sadd.s32 1, %s1780_s20 }
   0x8   : > { %2248 = sst [smem:[#allocation17_spill]] %s1784_s21  ;;  %p27_p0 = scmp.ge.s32.totalorder %s26_s25, 3 }
   0x9   : > { %s29_s26 = sadd.s32 1, %s1784_s21  ;;  %p111_p1 = scmp.ne.s32.totalorder %s1768_s17, %s1764_s16 }
   0xa   : > { %p112_p2 = scmp.eq.s32.totalorder %s1241_s23, 5  ;;  %s2275_s25 = smov (%p27_p0, %s26_s25), 0 }
   0xb   : > { %2249 = sst [smem:[#allocation18_spill]] %s2275_s25  ;;  %s2277_s26 = smov (!%p27_p0, %s29_s26), %s1784_s21 }
   0xc   : > { %s97_s27 = ssub.s32 %s1780_s20, %s2275_s25  ;;  %p1886_p3 = por %p112_p2, %p111_p1 }
   0xd   : > { %p31_p4 = scmp.ge.s32.totalorder %s2277_s26, 2  ;;  %p117_p5 = scmp.ne.s32.totalorder %s1764_s16, %s1760_s15 }
   0xe   : > { %s2250_s28 = scalar_select %p1886_p3, 1, 0 }
   0xf   : > { %p118_p6 = scmp.eq.s32.totalorder %s1242_s24, 5  ;;  %p1244_p7 = scmp.ge.s32.totalorder %s1788_s22, 1 }
  0x10   : > { %s2279_s26 = smov (%p31_p4, %s2277_s26), 0  ;;  %p145_p9 = scmp.lt.s32.totalorder %s1788_s22, 7 }
  0x11   : > { %2251 = sst [smem:[#allocation19_spill]] %s2279_s26  ;;  %p1895_p8 = por %p118_p6, %p117_p5 }
  0x12   : > { %s96_s30 = ssub.s32 %s1784_s21, %s2279_s26  ;;  %s101_s5 = sadd.s32 1, %s1768_s17 }
  0x13   : > { %s2252_s29 = scalar_select %p1895_p8, 1, 0 }
  0x14   : > { %s98_s6 = sor.u32 %s97_s27, %s96_s30  ;;  %p146_p10 = pnand %p1244_p7, %p145_p9 }
  0x15   : > { %2253 = sst [smem:[#allocation20_spill]] %s2252_s29  ;;  %p99_p11 = scmp.eq.s32.totalorder %s98_s6, 0 }
  0x16   : > { %149 = sbr.rel (%p146_p10) target bundleno = 2232 (0x8b8), region = 32  ;;  %s2233_s8 = sand.u32 (!%p146_p10), 1, %s1764_s16  }
  0x17   : > { %s1904_s7 = scalar_select %p99_p11, %s1768_s17, %s101_s5  }
  0x18   : > { %p164_p12 = scmp.lt.s32.totalorder (!%p146_p10), %s1772_s18, 0  ;;  %s1910_s9 = sshll.u32 (!%p146_p10), %s2233_s8, 3 }
  0x19   : > { %2254 = sst [smem:[#allocation21_spill]] %s1904_s7  ;;  %s165_s10 = ssub.s32 (!%p146_p10), 0, %s1772_s18 }
  0x1a   : > { %s1246_s11 = smin.u32 (!%p146_p10), %s1772_s18, %s165_s10  ;;  %s1915_s14 = sshll.u32 (!%p146_p10), %s1772_s18, 7 }
  0x1b   : > { %s167_s12 = sand.u32 (!%p146_p10), 1, %s1246_s11   ;;  %s2236_s23 = sshll.u32 (!%p146_p10), %s1776_s19, 2 }
  0x1c   : > { %s168_s13 = ssub.s32 (!%p146_p10), 0, %s167_s12  ;;  %s181_s27 = sshra.s32 (!%p146_p10), %s1915_s14, 7 }
  0x1d   : > { %s2281_s13 = smov (!%p164_p12, %s168_s13), %s167_s12  ;;  %p1374_p0 = scmp.eq.s32.totalorder %s1772_s18, 0 }
  0x1e   : > { %p1248_p13 = scmp.lt.s32.totalorder %s2281_s13, 0  ;;  %s174_s24 = sadd.s32 2, %s2281_s13 }
  0x1f   : > { %s184_s30 = sadd.s32 %s2236_s23, %s181_s27 }
  0x20   : > { %s2283_s24 = smov (!%p1248_p13, %s174_s24), %s2281_s13  ;;  %s1252_s5 = sshll.u32 %s184_s30, 7 }
  0x21   : > { %s1286_s6 = sshll.u32 %s2283_s24, 4  ;;  %s1928_s12 = scalar_lea.hbm %s2228_s0, %s1252_s5 }
  0x22   : > { %s1930_s8 = scalar_lea.vmem [#allocation2], %s1286_s6  ;;  %s190_s26 = scalar_lea.sflag [#allocation3], %s2283_s24 }
  0x23   : > { %s198_s13 = sshll.u32 %s1930_s8, 4  ;;  %s1636_s25 = scalar_lea.hbm %s1928_s12, 256  ;;  %s199_s13 = int_to_ptr.vmem [resolvable:$true] %s198_s13 }
  0x24   : > { %p1637_p1 = scmp.ne.s32.totalorder %s1928_s12, %s1636_s25  ;;  %s2239_s5 = scalar_lea.hbm %s2228_s0, 1024 }
  0x25   : > { %p1641_p5 = scmp.lt.u32.totalorder %s1928_s12, %s2228_s0  ;;  %p1642_p6 = scmp.lt.u32.totalorder %s2239_s5, %s1636_s25 }
  0x26   : > { %p1638_p2 = pnand %p1637_p1, %p1374_p0  ;;  %p1644_p9 = scmp.lt.u32.totalorder %s1636_s25, %s1928_s12 }
  0x27   : > { %p1643_p7 = por %p1642_p6, %p1641_p5 }
  0x28   : > { %p1639_p4 = pneg %p1638_p2 }
  0x29   : > { %p1645_p10 = por %p1644_p9, %p1643_p7 }
  0x2b   : > { %p1646_p11 = pnand %p1645_p10, %p1639_p4 }
  0x2d   : > { %1649 = shalt.err (!%p1646_p11)  }
  0x2e   : > { %s1650_s21 = scalar_lea.vmem %s199_s13, 256  ;;  %s1790_s27 = smov [#allocation2]  }
  0x2f   : > { %p1651_p12 = scmp.ne.s32.totalorder %s199_s13, %s1650_s21  ;;  %s1654_s30 = sshll.u32 %s1790_s27, 4  ;;  %s1952_s30 = int_to_ptr.vmem [resolvable:$false] %s1654_s30 }
  0x30   : > { %s2238_s23 = scalar_lea.vmem %s1952_s30, 512  ;;  %p1657_p2 = scmp.lt.s32.totalorder %s199_s13, %s1952_s30 }
  0x31   : > { %p1652_p13 = pnand %p1651_p12, %p1374_p0  ;;  %p1658_p5 = scmp.lt.s32.totalorder %s2238_s23, %s1650_s21 }
  0x33   : > { %p1653_p1 = pneg %p1652_p13  ;;  %p1659_p6 = por %p1658_p5, %p1657_p2 }
  0x35   : > { %p1660_p4 = pnand %p1659_p6, %p1653_p1 }
  0x37   : > { %1663 = shalt.err (!%p1660_p4)  }
  0x38   : > { %1365 = dma.hbm_to_vmem [thread:$0]  (%p1374_p0), %s1928_s12, 256, %s199_s13, %s190_s26 }
  0x39   : > { %1752 = dma.done.wait %s190_s26, 256 }
  0x3a   : > { %1753 = vsyncadd %s190_s26, 4294967040  ;;  %s210_s10 = sadd.s32 1, %s1772_s18  ;;  %s215_s11 = ssub.s32 1, %s2283_s24 }
  0x3b   : > { %p1964_p7 = scmp.lt.s32.totalorder %s210_s10, 3  ;;  %s1289_s21 = sadd.s32 128, %s1915_s14 }
  0x3c   : > { %s1290_s27 = sshll.u32 %s215_s11, 4  ;;  %s217_s23 = sshra.s32 %s1289_s21, 7 }
  0x3d   : > { %s2256_s5 = sshll.u32 %s1776_s19, 2  ;;  %s225_s13 = scalar_lea.vmem [#allocation2], %s1290_s27 }
  0x3e   : > { %s220_s20 = sadd.s32 %s2256_s5, %s217_s23  ;;  %s234_s25 = sshll.u32 %s225_s13, 4  ;;  %s235_s25 = int_to_ptr.vmem [resolvable:$true] %s234_s25 }
  0x3f   : > { %s1260_s12 = sshll.u32 %s220_s20, 7  ;;  %s226_s29 = scalar_lea.sflag [#allocation3], %s215_s11 }
  0x40   : > { %s222_s17 = scalar_lea.hbm %s2228_s0, %s1260_s12  ;;  %s2257_s20 = scalar_lea.hbm %s2228_s0, 1024 }
  0x41   : > { %s1664_s24 = scalar_lea.hbm %s222_s17, 256  ;;  %p1669_p11 = scmp.lt.u32.totalorder %s222_s17, %s2228_s0 }
  0x42   : > { %p1665_p0 = scmp.ne.s32.totalorder %s222_s17, %s1664_s24  ;;  %p1670_p12 = scmp.lt.u32.totalorder %s2257_s20, %s1664_s24 }
  0x43   : > { %p1672_p1 = scmp.lt.u32.totalorder %s1664_s24, %s222_s17 }
  0x44   : > { %p1666_p9 = pnand %p1665_p0, %p1964_p7  ;;  %p1671_p13 = por %p1670_p12, %p1669_p11 }
  0x46   : > { %p1667_p10 = pneg %p1666_p9  ;;  %p1673_p2 = por %p1672_p1, %p1671_p13 }
  0x48   : > { %p1674_p5 = pnand %p1673_p2, %p1667_p10 }
  0x4a   : > { %1677 = shalt.err (!%p1674_p5)  }
  0x4b   : > { %s1678_s7 = scalar_lea.vmem %s235_s25, 256  ;;  %p1685_p9 = scmp.lt.s32.totalorder %s235_s25, %s1952_s30 }
  0x4c   : > { %p1679_p6 = scmp.ne.s32.totalorder %s235_s25, %s1678_s7  ;;  %s2258_s15 = scalar_lea.vmem %s1952_s30, 512 }
  0x4d   : > { %p1686_p8 = scmp.lt.s32.totalorder %s2258_s15, %s1678_s7 }
  0x4e   : > { %p1680_p4 = pnand %p1679_p6, %p1964_p7 }
  0x4f   : > { %p1687_p3 = por %p1686_p8, %p1685_p9 }
  0x50   : > { %p1681_p0 = pneg %p1680_p4 }
  0x52   : > { %p1688_p11 = pnand %p1687_p3, %p1681_p0 }
  0x54   : > { %1691 = shalt.err (!%p1688_p11)  }
  0x55   : > { %1367 = dma.hbm_to_vmem [thread:$0]  (%p1964_p7), %s222_s17, 256, %s235_s25, %s226_s29  ;;  %v1795_v7 = vmov 0.0   ;;  %v240_v8 = vlaneseq  ;;  %v1796_v9 = vmov 0   ;;  %v262_v12 = vld [vmem:[%s2231_s3] sm:$0xff]  ;;  %vm269_vm8 = vcmask 1039360  }
  0x56   : > { %v254_v0 = vld [vmem:[%s1930_s8] sm:$0xff]  ;;  %v255_v1 = vld [vmem:[%s1930_s8 + $0x8] sm:$0xff]  ;;  %s1791_s30 = smov 127   ;;  %s1792_s23 = smov 125   ;;  %387 = vmatprep.mubr.f32.mxu0 %v1795_v7  ;;  %530 = vmatprep.mubr.f32.mxu1 %v1795_v7  ;;  %vm285_vm9 = vcmask 1022976   ;;  %vm277_vm10 = vcmask 1031168  }
  0x57   : > { %vm256_vm0 = vcmp.ge.f32.partialorder %v254_v0, 0.0  ;;  %vm257_vm1 = vcmp.ge.f32.partialorder %v255_v1, 0.0  ;;  %v258_v2 = vmul.f32 0.2, %v254_v0  ;;  %v259_v3 = vmul.f32 0.2, %v255_v1  ;;  %1484 = vset.pattern.permute.xlu1 %v1796_v9  ;;  %1515 = vset.pattern.permute.xlu0 %v1796_v9 }
  0x58   : > { %s1793_s11 = smov 126   ;;  %s1794_s17 = smov 124   ;;  %v241_v11 = vand.u32 127, %v240_v8  ;;  %vm293_vm11 = vcmask 1014784   ;;  %vm301_vm12 = vcmask 1006592   ;;  %vm309_vm13 = vcmask 998400  }
  0x59   : > { %v260_v4 = vsel %vm256_vm0, %v254_v0, %v258_v2  ;;  %v261_v5 = vsel %vm257_vm1, %v255_v1, %v259_v3  ;;  %s1264_s29 = sadd.s32 4294967242, %s1915_s14  ;;  %s1797_s8 = smov 123   ;;  %v313_v48 = vld [vmem:[%s2229_s1] sm:$0xff]  ;;  %vm319_vm14 = vcmask 457728   ;;  %v1266_v1 = vld [vmem:[%s2231_s3 + $0x8] sm:$0xff] }
  0x5a   : > { %v1459_v6 = vpack.i.bf16 %v261_v5, %v260_v4  ;;  %v243_v10 = vstv %s1264_s29  ;;  %s1798_s25 = smov 122   ;;  %v242_v13 = vadd.s32 128, %v241_v11  ;;  %s1799_s21 = smov 116  }
  0x5b   : > { %v244_v14 = vadd.s32 %v243_v10, %v241_v11  ;;  %s1800_s5 = smov 119   ;;  %s1801_s20 = smov 110  }
  0x5c   : > { %1460 = vrot.lane.b32.xlu0 %v1459_v6, %s1791_s30  ;;  %1470 = vrot.lane.b32.xlu1 %v1459_v6, %s1792_s23  ;;  %v245_v15 = vadd.s32 %v243_v10, %v242_v13  ;;  %s1802_s7 = smov 113   ;;  %s1804_s14 = smov 118  }
  0x5d   : > { %vm246_vm2 = vcmp.ge.s32.totalorder %v244_v14, 0  ;;  %vm248_vm3 = vcmp.lt.s32.totalorder %v244_v14, 300  ;;  %s1805_s12 = smov 108   ;;  %s1806_s13 = smov 98  }
  0x5e   : > { %vm250_vm4 = vmand %vm246_vm2, %vm248_vm3  ;;  %vm247_vm5 = vcmp.ge.s32.totalorder %v245_v15, 0  ;;  %vm249_vm6 = vcmp.lt.s32.totalorder %v245_v15, 300  ;;  %vm574_vm3 = vcmask 973824   ;;  %s1807_s26 = smov 103   ;;  %s2259_s6 = scalar_lea.vmem [#allocation4], %s1910_s9 }
  0x5f   : > { %v252_v16 = vsel %vm250_vm4, 1.0, %v1795_v7  ;;  %vm251_vm7 = vmand %vm247_vm5, %vm249_vm6  ;;  %vm582_vm4 = vcmask 949248   ;;  %vm590_vm5 = vcmask 924672   ;;  %vm598_vm6 = vcmask 900096   ;;  %p2262_p8 = scmp.ne.s32.totalorder %s2250_s28, 0 }
  0x60   : > { %1465 = vrot.lane.b32.xlu0 %v1459_v6, %s1793_s11  ;;  %1475 = vrot.lane.b32.xlu1 %v1459_v6, %s1794_s17  ;;  %v253_v17 = vsel %vm251_vm7, 1.0, %v1795_v7 }
  0x61   : > { %v2007_v18 = vpack.i.bf16 %v253_v17, %v252_v16 }
  0x64   : > { %1480 = vrot.lane.b32.xlu0 %v1459_v6, %s1797_s8  ;;  %305 = vrot.lane.b32.xlu1 %v260_v4, %s1798_s25 }
  0x68   : > { %307 = vrot.lane.b32.xlu0 %v261_v5, %s1798_s25  ;;  %316 = vperm.xlu1 %1484, %v262_v12  }
  0x6c   : > { %1486 = vrot.lane.b32.xlu0 %v2007_v18, %s1792_s23 }
  0xce   : > { %v1461_v19 = vpop.permute.xlu0 %1460  ;;  %v1471_v20 = vpop.permute.xlu1 %1470 }
  0xcf   : > { %v1463_v21 = vunpack.i.h.bf16 %v1461_v19  ;;  %v1462_v22 = vunpack.i.l.bf16 %v1461_v19  ;;  %v1473_v23 = vunpack.i.h.bf16 %v1471_v20  ;;  %v1472_v24 = vunpack.i.l.bf16 %v1471_v20 }
  0xd1   : > { %v1291_v25 = vpack.c.bf16 %v1463_v21, %v261_v5  ;;  %v270_v26 = vsel %vm269_vm8, %v1462_v22, %v1463_v21  ;;  %v286_v30 = vsel %vm285_vm9, %v1472_v24, %v1473_v23 }
  0xd2   : > { %v1466_v27 = vpop.permute.xlu0 %1465  ;;  %v1293_v28 = vpack.c.bf16 %v270_v26, %v260_v4  ;;  %v1476_v29 = vpop.permute.xlu1 %1475 }
  0xd3   : > { %v1468_v31 = vunpack.i.h.bf16 %v1466_v27  ;;  %v1467_v32 = vunpack.i.l.bf16 %v1466_v27  ;;  %1292 = vmatprep.subr.bf16.mxu0 %v1291_v25  ;;  %v1478_v33 = vunpack.i.h.bf16 %v1476_v29  ;;  %v1477_v34 = vunpack.i.l.bf16 %v1476_v29 }
  0xd4   : > { %1294 = vmatpush1.bf16.msra.mxu0 %v1293_v28 }
  0xd5   : > { %v1295_v35 = vpack.c.bf16 %v1473_v23, %v1468_v31  ;;  %v278_v36 = vsel %vm277_vm10, %v1467_v32, %v1468_v31  ;;  %v294_v41 = vsel %vm293_vm11, %v1477_v34, %v1478_v33  ;;  %v457_v32 = vld [vmem:[%s2230_s2] sm:$0xff] }
  0xd6   : > { %v1481_v37 = vpop.permute.xlu0 %1480  ;;  %v1297_v38 = vpack.c.bf16 %v286_v30, %v278_v36  ;;  %v306_v45 = vpop.permute.xlu1 %305 }
  0xd7   : > { %v1483_v39 = vunpack.i.h.bf16 %v1481_v37  ;;  %v1482_v40 = vunpack.i.l.bf16 %v1481_v37  ;;  %1296 = vmatprep.subr.bf16.mxu0 %v1295_v35 }
  0xd8   : > { %1298 = vmatpush1.bf16.msra.mxu0 %v1297_v38 }
  0xd9   : > { %v1299_v42 = vpack.c.bf16 %v1483_v39, %v1478_v33  ;;  %v302_v43 = vsel %vm301_vm12, %v1482_v40, %v1483_v39 }
  0xda   : > { %v1301_v44 = vpack.c.bf16 %v302_v43, %v294_v41  ;;  %v308_v46 = vpop.permute.xlu0 %307 }
  0xdb   : > { %1300 = vmatprep.subr.bf16.mxu0 %v1299_v42  ;;  %v310_v47 = vsel %vm309_vm13, %v306_v45, %v308_v46 }
  0xdc   : > { %1302 = vmatpush1.bf16.msra.mxu0 %v1301_v44 }
  0xdd   : > { %335 = vmatprep.subr.mxu0 %v308_v46 }
  0xde   : > { %v1487_v49 = vpop.permute.xlu0 %1486 }
  0xdf   : > { %v1489_v51 = vunpack.i.h.bf16 %v1487_v49  ;;  %v1488_v52 = vunpack.i.l.bf16 %v1487_v49 }
  0xe0   : > { %336 = vmatpush1.msra.mxu0 %v310_v47 }
  0xe1   : > { %1265 = vmatmul.mubr.msk.f32.vlgmr.msra.gmra.mrb[0].mxu0 %vm319_vm14, %v313_v48  ;;  %v406_v58 = vsel %vm285_vm9, %v1488_v52, %v1489_v51 }
  0xe2   : > { %676 = vmatprep.mubr.f32.mxu0 %v1795_v7 }
  0xe7   : > { %v317_v50 = vpop.permute.xlu1 %316 }
 0x1b4   : > { %v389_v53 = vpop.f32.mrb[0].mxu0 }
 0x1b5   : > { %v390_v54 = vadd.f32 %v389_v53, %v317_v50  ;;  %v391_v55 = vpop.f32.mrb[1].mxu0 }
 0x1b6   : > { %v392_v56 = vadd.f32 %v391_v55, %v317_v50  ;;  %v1268_v50 = vld [vmem:[%s2231_s3 + $0x10] sm:$0xff] }
 0x1b7   : > { %vm394_vm15 = vcmp.ge.f32.partialorder %v390_v54, 0.0  ;;  %v396_v57 = vmul.f32 0.2, %v390_v54 }
 0x1b8   : > { %vm395_vm0 = vcmp.ge.f32.partialorder %v392_v56, 0.0  ;;  %v397_v59 = vmul.f32 0.2, %v392_v56 }
 0x1b9   : > { %v398_v60 = vsel %vm394_vm15, %v390_v54, %v396_v57  ;;  %vm882_vm15 = vcmask 883712  }
 0x1ba   : > { %v399_v61 = vsel %vm395_vm0, %v392_v56, %v397_v59  ;;  %v409_v62 = vmul.f32 %v406_v58, %v398_v60  ;;  %vm890_vm0 = vcmask 842752  }
 0x1bb   : > { %v410_v63 = vmul.f32 %v1489_v51, %v399_v61 }
 0x1bd   : > { %v1495_v0 = vpack.i.bf16 %v410_v63, %v409_v62 }
 0x1bf   : > { %1496 = vrot.lane.b32.xlu0 %v1495_v0, %s1793_s11  ;;  %1491 = vrot.lane.b32.xlu1 %v1495_v0, %s1791_s30  ;;  %s1363_s11 = smul.u32 3, %s1776_s19  ;;  %s2261_s19 = sand.u32 1, %s1764_s16  }
 0x1c3   : > { %1506 = vrot.lane.b32.xlu0 %v1495_v0, %s1794_s17  ;;  %1501 = vrot.lane.b32.xlu1 %v1495_v0, %s1792_s23  ;;  %s1147_s17 = sadd.s32 %s1772_s18, %s1363_s11  ;;  %s2260_s18 = smov %s2259_s6 }
 0x1c4   : > { %s1281_s29 = sshll.u32 %s1147_s17, 7 }
 0x1c7   : > { %450 = vrot.lane.b32.xlu0 %v409_v62, %s1798_s25  ;;  %1511 = vrot.lane.b32.xlu1 %v1495_v0, %s1797_s8 }
 0x1cb   : > { %452 = vrot.lane.b32.xlu1 %v410_v63, %s1798_s25  ;;  %460 = vperm.xlu0 %1515, %v1266_v1  }
 0x1cf   : > { %1517 = vrot.lane.b32.xlu1 %v2007_v18, %s1798_s25 }
 0x231   : > { %v1497_v2 = vpop.permute.xlu0 %1496  ;;  %v1492_v3 = vpop.permute.xlu1 %1491 }
 0x232   : > { %v1494_v4 = vunpack.i.h.bf16 %v1492_v3  ;;  %v1493_v5 = vunpack.i.l.bf16 %v1492_v3  ;;  %v1499_v6 = vunpack.i.h.bf16 %v1497_v2  ;;  %v1498_v8 = vunpack.i.l.bf16 %v1497_v2 }
 0x234   : > { %v1303_v9 = vpack.c.bf16 %v1494_v4, %v410_v63  ;;  %v419_v10 = vsel %vm269_vm8, %v1493_v5, %v1494_v4  ;;  %v426_v16 = vsel %vm277_vm10, %v1498_v8, %v1499_v6 }
 0x235   : > { %v1507_v11 = vpop.permute.xlu0 %1506  ;;  %v1502_v12 = vpop.permute.xlu1 %1501  ;;  %v1305_v13 = vpack.c.bf16 %v419_v10, %v409_v62 }
 0x236   : > { %v1504_v14 = vunpack.i.h.bf16 %v1502_v12  ;;  %v1503_v15 = vunpack.i.l.bf16 %v1502_v12  ;;  %1304 = vmatprep.subr.bf16.mxu1 %v1303_v9  ;;  %v1509_v17 = vunpack.i.h.bf16 %v1507_v11  ;;  %v1508_v19 = vunpack.i.l.bf16 %v1507_v11 }
 0x237   : > { %1306 = vmatpush1.bf16.msra.mxu1 %v1305_v13 }
 0x238   : > { %v1307_v20 = vpack.c.bf16 %v1504_v14, %v1499_v6  ;;  %v433_v21 = vsel %vm285_vm9, %v1503_v15, %v1504_v14  ;;  %v440_v27 = vsel %vm293_vm11, %v1508_v19, %v1509_v17 }
 0x239   : > { %v1512_v22 = vpop.permute.xlu1 %1511  ;;  %v1309_v23 = vpack.c.bf16 %v433_v21, %v426_v16  ;;  %v451_v31 = vpop.permute.xlu0 %450  ;;  %v1269_v16 = vld [vmem:[%s2230_s2 + $0x8] sm:$0xff] }
 0x23a   : > { %v1514_v24 = vunpack.i.h.bf16 %v1512_v22  ;;  %v1513_v25 = vunpack.i.l.bf16 %v1512_v22  ;;  %1308 = vmatprep.subr.bf16.mxu1 %v1307_v20 }
 0x23b   : > { %1310 = vmatpush1.bf16.msra.mxu1 %v1309_v23 }
 0x23c   : > { %v1311_v26 = vpack.c.bf16 %v1514_v24, %v1509_v17  ;;  %v447_v28 = vsel %vm301_vm12, %v1513_v25, %v1514_v24 }
 0x23d   : > { %v1313_v29 = vpack.c.bf16 %v447_v28, %v440_v27  ;;  %v453_v30 = vpop.permute.xlu1 %452 }
 0x23e   : > { %1312 = vmatprep.subr.bf16.mxu1 %v1311_v26  ;;  %v454_v33 = vsel %vm309_vm13, %v451_v31, %v453_v30 }
 0x23f   : > { %1314 = vmatpush1.bf16.msra.mxu1 %v1313_v29 }
 0x240   : > { %478 = vmatprep.subr.mxu1 %v453_v30 }
 0x241   : > { %v1518_v34 = vpop.permute.xlu1 %1517 }
 0x242   : > { %v1520_v36 = vunpack.i.h.bf16 %v1518_v34  ;;  %v1519_v37 = vunpack.i.l.bf16 %v1518_v34 }
 0x243   : > { %479 = vmatpush1.msra.mxu1 %v454_v33 }
 0x244   : > { %1267 = vmatmul.mubr.msk.f32.vlgmr.msra.gmra.mrb[0].mxu1 %vm319_vm14, %v457_v32  ;;  %v547_v43 = vsel %vm309_vm13, %v1519_v37, %v1520_v36 }
 0x245   : > { %818 = vmatprep.mubr.f32.mxu1 %v1795_v7 }
 0x24a   : > { %v461_v35 = vpop.permute.xlu0 %460 }
 0x317   : > { %v532_v38 = vpop.f32.mrb[0].mxu1 }
 0x318   : > { %v2046_v39 = vadd.f32 %v532_v38, %v461_v35  ;;  %v534_v40 = vpop.f32.mrb[1].mxu1 }
 0x319   : > { %v2048_v41 = vadd.f32 %v534_v40, %v461_v35  ;;  %v1271_v35 = vld [vmem:[%s2231_s3 + $0x18] sm:$0xff] }
 0x31a   : > { %vm537_vm1 = vcmp.ge.f32.partialorder %v2046_v39, 0.0  ;;  %v539_v42 = vmul.f32 0.2, %v2046_v39 }
 0x31b   : > { %v540_v44 = vmul.f32 0.2, %v2048_v41  ;;  %vm538_vm2 = vcmp.ge.f32.partialorder %v2048_v41, 0.0 }
 0x31c   : > { %v541_v45 = vsel %vm537_vm1, %v2046_v39, %v539_v42  ;;  %vm898_vm1 = vcmask 801792  }
 0x31d   : > { %v542_v46 = vsel %vm538_vm2, %v2048_v41, %v540_v44  ;;  %v550_v47 = vmul.f32 %v547_v43, %v541_v45  ;;  %vm993_vm2 = vcmask 728064  }
 0x31e   : > { %v551_v48 = vmul.f32 %v1520_v36, %v542_v46 }
 0x320   : > { %v1526_v49 = vpack.i.bf16 %v551_v48, %v550_v47 }
 0x322   : > { %1527 = vrot.lane.b32.xlu0 %v1526_v49, %s1798_s25  ;;  %1522 = vrot.lane.b32.xlu1 %v1526_v49, %s1792_s23 }
 0x326   : > { %1537 = vrot.lane.b32.xlu0 %v1526_v49, %s1799_s21  ;;  %1532 = vrot.lane.b32.xlu1 %v1526_v49, %s1800_s5 }
 0x32a   : > { %594 = vrot.lane.b32.xlu0 %v550_v47, %s1801_s20  ;;  %1542 = vrot.lane.b32.xlu1 %v1526_v49, %s1802_s7 }
 0x32e   : > { %606 = vperm.xlu0 %1515, %v1268_v50   ;;  %596 = vrot.lane.b32.xlu1 %v551_v48, %s1801_s20 }
 0x332   : > { %1547 = vrot.lane.b32.xlu1 %v2007_v18, %s1802_s7 }
 0x394   : > { %v1528_v51 = vpop.permute.xlu0 %1527  ;;  %v1523_v52 = vpop.permute.xlu1 %1522 }
 0x395   : > { %v1525_v53 = vunpack.i.h.bf16 %v1523_v52  ;;  %v1524_v54 = vunpack.i.l.bf16 %v1523_v52  ;;  %v1530_v55 = vunpack.i.h.bf16 %v1528_v51  ;;  %v1529_v56 = vunpack.i.l.bf16 %v1528_v51 }
 0x397   : > { %v1315_v57 = vpack.c.bf16 %v1525_v53, %v551_v48  ;;  %v560_v58 = vsel %vm285_vm9, %v1524_v54, %v1525_v53  ;;  %v567_v0 = vsel %vm309_vm13, %v1529_v56, %v1530_v55 }
 0x398   : > { %v1317_v59 = vpack.c.bf16 %v560_v58, %v550_v47  ;;  %v1538_v60 = vpop.permute.xlu0 %1537  ;;  %v1533_v61 = vpop.permute.xlu1 %1532 }
 0x399   : > { %v1535_v62 = vunpack.i.h.bf16 %v1533_v61  ;;  %v1534_v63 = vunpack.i.l.bf16 %v1533_v61  ;;  %1316 = vmatprep.subr.bf16.mxu0 %v1315_v57  ;;  %v1540_v1 = vunpack.i.h.bf16 %v1538_v60  ;;  %v1539_v2 = vunpack.i.l.bf16 %v1538_v60 }
 0x39a   : > { %1318 = vmatpush1.bf16.msra.mxu0 %v1317_v59 }
 0x39b   : > { %v1319_v3 = vpack.c.bf16 %v1535_v62, %v1530_v55  ;;  %v575_v4 = vsel %vm574_vm3, %v1534_v63, %v1535_v62  ;;  %v583_v10 = vsel %vm582_vm4, %v1539_v2, %v1540_v1 }
 0x39c   : > { %v1321_v5 = vpack.c.bf16 %v575_v4, %v567_v0  ;;  %v1543_v6 = vpop.permute.xlu1 %1542  ;;  %v595_v15 = vpop.permute.xlu0 %594  ;;  %v1272_v0 = vld [vmem:[%s2230_s2 + $0x10] sm:$0xff] }
 0x39d   : > { %v1545_v8 = vunpack.i.h.bf16 %v1543_v6  ;;  %v1544_v9 = vunpack.i.l.bf16 %v1543_v6  ;;  %1320 = vmatprep.subr.bf16.mxu0 %v1319_v3 }
 0x39e   : > { %1322 = vmatpush1.bf16.msra.mxu0 %v1321_v5 }
 0x39f   : > { %v1323_v11 = vpack.c.bf16 %v1545_v8, %v1540_v1  ;;  %v591_v12 = vsel %vm590_vm5, %v1544_v9, %v1545_v8 }
 0x3a0   : > { %v1325_v13 = vpack.c.bf16 %v591_v12, %v583_v10  ;;  %v597_v14 = vpop.permute.xlu1 %596 }
 0x3a1   : > { %1324 = vmatprep.subr.bf16.mxu0 %v1323_v11  ;;  %v599_v17 = vsel %vm598_vm6, %v595_v15, %v597_v14 }
 0x3a2   : > { %1326 = vmatpush1.bf16.msra.mxu0 %v1325_v13 }
 0x3a3   : > { %624 = vmatprep.subr.mxu0 %v597_v14 }
 0x3a4   : > { %v1548_v19 = vpop.permute.xlu1 %1547 }
 0x3a5   : > { %v1550_v20 = vunpack.i.h.bf16 %v1548_v19  ;;  %v1549_v21 = vunpack.i.l.bf16 %v1548_v19 }
 0x3a6   : > { %625 = vmatpush1.msra.mxu0 %v599_v17 }
 0x3a7   : > { %1270 = vmatmul.mubr.msk.f32.vlgmr.msra.gmra.mrb[2].mxu0 %vm319_vm14, %v1269_v16  ;;  %v693_v28 = vsel %vm590_vm5, %v1549_v21, %v1550_v20 }
 0x3a8   : > { %976 = vmatprep.mubr.f32.mxu0 %v1795_v7 }
 0x3ad   : > { %v607_v22 = vpop.permute.xlu0 %606 }
 0x47a   : > { %v678_v23 = vpop.f32.mrb[2].mxu0 }
 0x47b   : > { %v679_v24 = vadd.f32 %v678_v23, %v607_v22  ;;  %v680_v25 = vpop.f32.mrb[3].mxu0 }
 0x47c   : > { %v681_v26 = vadd.f32 %v680_v25, %v607_v22 }
 0x47d   : > { %vm683_vm7 = vcmp.ge.f32.partialorder %v679_v24, 0.0  ;;  %v685_v27 = vmul.f32 0.2, %v679_v24 }
 0x47e   : > { %vm684_vm8 = vcmp.ge.f32.partialorder %v681_v26, 0.0  ;;  %v686_v29 = vmul.f32 0.2, %v681_v26 }
 0x47f   : > { %v687_v30 = vsel %vm683_vm7, %v679_v24, %v685_v27  ;;  %v1274_v24 = vld [vmem:[%s2231_s3 + $0x20] sm:$0xff] }
 0x480   : > { %v688_v31 = vsel %vm684_vm8, %v681_v26, %v686_v29  ;;  %v696_v32 = vmul.f32 %v693_v28, %v687_v30 }
 0x481   : > { %v697_v33 = vmul.f32 %v1550_v20, %v688_v31 }
 0x483   : > { %v1556_v34 = vpack.i.bf16 %v697_v33, %v696_v32 }
 0x485   : > { %1557 = vrot.lane.b32.xlu1 %v1556_v34, %s1798_s25  ;;  %1552 = vrot.lane.b32.xlu0 %v1556_v34, %s1792_s23  ;;  %s1803_s23 = smov 104  }
 0x489   : > { %1567 = vrot.lane.b32.xlu1 %v1556_v34, %s1799_s21  ;;  %1562 = vrot.lane.b32.xlu0 %v1556_v34, %s1800_s5  ;;  %s1808_s21 = smov 89  }
 0x48d   : > { %737 = vrot.lane.b32.xlu1 %v696_v32, %s1801_s20  ;;  %1572 = vrot.lane.b32.xlu0 %v1556_v34, %s1802_s7 }
 0x491   : > { %748 = vperm.xlu1 %1484, %v1271_v35   ;;  %739 = vrot.lane.b32.xlu0 %v697_v33, %s1801_s20 }
 0x495   : > { %829 = vrot.lane.b32.xlu1 %v2048_v41, %s1801_s20  ;;  %827 = vrot.lane.b32.xlu0 %v2046_v39, %s1801_s20 }
 0x499   : > { %1577 = vrot.lane.b32.xlu0 %v2007_v18, %s1803_s23  ;;  %s1151_s23 = sshll.u32 %s2259_s6, 4  ;;  %s2173_s23 = int_to_ptr.vmem [resolvable:$true] %s1151_s23 }
 0x4f7   : > { %v1558_v36 = vpop.permute.xlu1 %1557  ;;  %v1553_v37 = vpop.permute.xlu0 %1552 }
 0x4f8   : > { %v1555_v38 = vunpack.i.h.bf16 %v1553_v37  ;;  %v1554_v40 = vunpack.i.l.bf16 %v1553_v37  ;;  %v1560_v42 = vunpack.i.h.bf16 %v1558_v36  ;;  %v1559_v43 = vunpack.i.l.bf16 %v1558_v36 }
 0x4fa   : > { %v1327_v44 = vpack.c.bf16 %v1555_v38, %v697_v33  ;;  %v706_v45 = vsel %vm285_vm9, %v1554_v40, %v1555_v38  ;;  %v713_v39 = vsel %vm309_vm13, %v1559_v43, %v1560_v42  ;;  %vm846_vm9 = vcmask 850944  }
 0x4fb   : > { %v1329_v46 = vpack.c.bf16 %v706_v45, %v696_v32  ;;  %v1568_v47 = vpop.permute.xlu1 %1567  ;;  %v1563_v48 = vpop.permute.xlu0 %1562  ;;  %vm867_vm13 = vcmask 965632  }
 0x4fc   : > { %v1565_v49 = vunpack.i.h.bf16 %v1563_v48  ;;  %v1564_v41 = vunpack.i.l.bf16 %v1563_v48  ;;  %1328 = vmatprep.subr.bf16.mxu1 %v1327_v44  ;;  %v1570_v50 = vunpack.i.h.bf16 %v1568_v47  ;;  %v1569_v51 = vunpack.i.l.bf16 %v1568_v47 }
 0x4fd   : > { %1330 = vmatpush1.bf16.msra.mxu1 %v1329_v46 }
 0x4fe   : > { %v1331_v52 = vpack.c.bf16 %v1565_v49, %v1560_v42  ;;  %v720_v53 = vsel %vm574_vm3, %v1564_v41, %v1565_v49  ;;  %v727_v58 = vsel %vm582_vm4, %v1569_v51, %v1570_v50 }
 0x4ff   : > { %v1333_v54 = vpack.c.bf16 %v720_v53, %v713_v39  ;;  %v1573_v55 = vpop.permute.xlu0 %1572  ;;  %v738_v63 = vpop.permute.xlu1 %737 }
 0x500   : > { %v1575_v56 = vunpack.i.h.bf16 %v1573_v55  ;;  %v1574_v57 = vunpack.i.l.bf16 %v1573_v55  ;;  %1332 = vmatprep.subr.bf16.mxu1 %v1331_v52  ;;  %v1275_v52 = vld [vmem:[%s2230_s2 + $0x18] sm:$0xff] }
 0x501   : > { %1334 = vmatpush1.bf16.msra.mxu1 %v1333_v54 }
 0x502   : > { %v1335_v59 = vpack.c.bf16 %v1575_v56, %v1570_v50  ;;  %v734_v60 = vsel %vm590_vm5, %v1574_v57, %v1575_v56 }
 0x503   : > { %v1337_v61 = vpack.c.bf16 %v734_v60, %v727_v58  ;;  %v740_v62 = vpop.permute.xlu0 %739 }
 0x504   : > { %1336 = vmatprep.subr.bf16.mxu1 %v1335_v59  ;;  %v741_v1 = vsel %vm598_vm6, %v738_v63, %v740_v62 }
 0x505   : > { %1338 = vmatpush1.bf16.msra.mxu1 %v1337_v61 }
 0x506   : > { %766 = vmatprep.subr.mxu1 %v740_v62 }
 0x507   : > { %v828_v3 = vpop.permute.xlu0 %827 }
 0x509   : > { %767 = vmatpush1.msra.mxu1 %v741_v1 }
 0x50a   : > { %1273 = vmatmul.mubr.msk.f32.vlgmr.msra.gmra.mrb[2].mxu1 %vm319_vm14, %v1272_v0 }
 0x50b   : > { %1119 = vmatprep.mubr.f32.mxu1 %v1795_v7  ;;  %v1578_v4 = vpop.permute.xlu0 %1577 }
 0x50c   : > { %v1580_v10 = vunpack.i.h.bf16 %v1578_v4  ;;  %v1579_v11 = vunpack.i.l.bf16 %v1578_v4 }
 0x50e   : > { %v847_v7 = vsel %vm846_vm9, %v1579_v11, %v1580_v10 }
 0x510   : > { %v749_v2 = vpop.permute.xlu1 %748 }
 0x514   : > { %v830_v5 = vpop.permute.xlu1 %829 }
 0x515   : > { %v831_v12 = vsel %vm598_vm6, %v828_v3, %v830_v5 }
 0x5dd   : > { %v820_v6 = vpop.f32.mrb[2].mxu1 }
 0x5de   : > { %v821_v8 = vadd.f32 %v820_v6, %v749_v2  ;;  %v822_v9 = vpop.f32.mrb[3].mxu1  ;;  %v1277_v6 = vld [vmem:[%s2231_s3 + $0x28] sm:$0xff] }
 0x5df   : > { %v823_v13 = vadd.f32 %v822_v9, %v749_v2 }
 0x5e0   : > { %v2108_v14 = vadd.f32 %v831_v12, %v821_v8 }
 0x5e1   : > { %v2110_v15 = vadd.f32 %v830_v5, %v823_v13 }
 0x5e2   : > { %v838_v16 = vmul.f32 0.2, %v2108_v14  ;;  %vm836_vm10 = vcmp.ge.f32.partialorder %v2108_v14, 0.0 }
 0x5e3   : > { %vm837_vm11 = vcmp.ge.f32.partialorder %v2110_v15, 0.0  ;;  %v839_v17 = vmul.f32 0.2, %v2110_v15 }
 0x5e4   : > { %v840_v19 = vsel %vm836_vm10, %v2108_v14, %v838_v16 }
 0x5e5   : > { %v841_v20 = vsel %vm837_vm11, %v2110_v15, %v839_v17  ;;  %v850_v21 = vmul.f32 %v847_v7, %v840_v19 }
 0x5e6   : > { %v851_v22 = vmul.f32 %v1580_v10, %v841_v20 }
 0x5e8   : > { %v1586_v23 = vpack.i.bf16 %v851_v22, %v850_v21 }
 0x5ea   : > { %1587 = vrot.lane.b32.xlu0 %v1586_v23, %s1804_s14  ;;  %1582 = vrot.lane.b32.xlu1 %v1586_v23, %s1797_s8 }
 0x5ee   : > { %1597 = vrot.lane.b32.xlu0 %v1586_v23, %s1805_s12  ;;  %1592 = vrot.lane.b32.xlu1 %v1586_v23, %s1802_s7 }
 0x5f2   : > { %894 = vrot.lane.b32.xlu0 %v850_v21, %s1806_s13  ;;  %1602 = vrot.lane.b32.xlu1 %v1586_v23, %s1807_s26 }
 0x5f6   : > { %906 = vperm.xlu0 %1515, %v1274_v24   ;;  %896 = vrot.lane.b32.xlu1 %v851_v22, %s1806_s13 }
 0x5fa   : > { %1607 = vrot.lane.b32.xlu1 %v2007_v18, %s1808_s21 }
 0x65c   : > { %v1588_v25 = vpop.permute.xlu0 %1587  ;;  %v1583_v26 = vpop.permute.xlu1 %1582 }
 0x65d   : > { %v1585_v27 = vunpack.i.h.bf16 %v1583_v26  ;;  %v1584_v28 = vunpack.i.l.bf16 %v1583_v26  ;;  %v1590_v29 = vunpack.i.h.bf16 %v1588_v25  ;;  %v1589_v30 = vunpack.i.l.bf16 %v1588_v25 }
 0x65f   : > { %v1339_v31 = vpack.c.bf16 %v1585_v27, %v851_v22  ;;  %v860_v32 = vsel %vm301_vm12, %v1584_v28, %v1585_v27  ;;  %v868_v38 = vsel %vm867_vm13, %v1589_v30, %v1590_v29 }
 0x660   : > { %v1341_v33 = vpack.c.bf16 %v860_v32, %v850_v21  ;;  %v1598_v34 = vpop.permute.xlu0 %1597  ;;  %v1593_v35 = vpop.permute.xlu1 %1592 }
 0x661   : > { %v1595_v36 = vunpack.i.h.bf16 %v1593_v35  ;;  %v1594_v37 = vunpack.i.l.bf16 %v1593_v35  ;;  %1340 = vmatprep.subr.bf16.mxu0 %v1339_v31  ;;  %v1600_v18 = vunpack.i.h.bf16 %v1598_v34  ;;  %v1599_v40 = vunpack.i.l.bf16 %v1598_v34 }
 0x662   : > { %1342 = vmatpush1.bf16.msra.mxu0 %v1341_v33 }
 0x663   : > { %v1343_v42 = vpack.c.bf16 %v1595_v36, %v1590_v29  ;;  %v875_v43 = vsel %vm590_vm5, %v1594_v37, %v1595_v36  ;;  %v883_v48 = vsel %vm882_vm15, %v1599_v40, %v1600_v18  ;;  %v1278_v36 = vld [vmem:[%s2230_s2 + $0x20] sm:$0xff] }
 0x664   : > { %v1345_v44 = vpack.c.bf16 %v875_v43, %v868_v38  ;;  %v1603_v45 = vpop.permute.xlu1 %1602  ;;  %v895_v51 = vpop.permute.xlu0 %894 }
 0x665   : > { %v1605_v46 = vunpack.i.h.bf16 %v1603_v45  ;;  %v1604_v47 = vunpack.i.l.bf16 %v1603_v45  ;;  %1344 = vmatprep.subr.bf16.mxu0 %v1343_v42 }
 0x666   : > { %1346 = vmatpush1.bf16.msra.mxu0 %v1345_v44 }
 0x667   : > { %v1347_v49 = vpack.c.bf16 %v1605_v46, %v1600_v18  ;;  %v891_v41 = vsel %vm890_vm0, %v1604_v47, %v1605_v46 }
 0x668   : > { %v1349_v39 = vpack.c.bf16 %v891_v41, %v883_v48  ;;  %v897_v50 = vpop.permute.xlu1 %896 }
 0x669   : > { %1348 = vmatprep.subr.bf16.mxu0 %v1347_v49  ;;  %v899_v53 = vsel %vm898_vm1, %v895_v51, %v897_v50 }
 0x66a   : > { %1350 = vmatpush1.bf16.msra.mxu0 %v1349_v39 }
 0x66b   : > { %924 = vmatprep.subr.mxu0 %v897_v50 }
 0x66c   : > { %v1608_v54 = vpop.permute.xlu1 %1607 }
 0x66d   : > { %v1610_v55 = vunpack.i.h.bf16 %v1608_v54  ;;  %v1609_v56 = vunpack.i.l.bf16 %v1608_v54 }
 0x66e   : > { %925 = vmatpush1.msra.mxu0 %v899_v53 }
 0x66f   : > { %1276 = vmatmul.mubr.msk.f32.vlgmr.msra.gmra.mrb[4].mxu0 %vm319_vm14, %v1275_v52  ;;  %v994_v63 = vsel %vm993_vm2, %v1609_v56, %v1610_v55 }
 0x675   : > { %v907_v57 = vpop.permute.xlu0 %906 }
 0x742   : > { %v978_v58 = vpop.f32.mrb[4].mxu0 }
 0x743   : > { %v979_v59 = vadd.f32 %v978_v58, %v907_v57  ;;  %v980_v60 = vpop.f32.mrb[5].mxu0 }
 0x744   : > { %v981_v61 = vadd.f32 %v980_v60, %v907_v57 }
 0x745   : > { %vm983_vm3 = vcmp.ge.f32.partialorder %v979_v59, 0.0  ;;  %v985_v62 = vmul.f32 0.2, %v979_v59 }
 0x746   : > { %vm984_vm4 = vcmp.ge.f32.partialorder %v981_v61, 0.0  ;;  %v986_v0 = vmul.f32 0.2, %v981_v61 }
 0x747   : > { %v987_v1 = vsel %vm983_vm3, %v979_v59, %v985_v62 }
 0x748   : > { %v988_v2 = vsel %vm984_vm4, %v981_v61, %v986_v0  ;;  %v997_v3 = vmul.f32 %v994_v63, %v987_v1 }
 0x749   : > { %v998_v4 = vmul.f32 %v1610_v55, %v988_v2 }
 0x74b   : > { %v1616_v5 = vpack.i.bf16 %v998_v4, %v997_v3 }
 0x74d   : > { %1617 = vrot.lane.b32.xlu1 %v1616_v5, %s1804_s14  ;;  %1612 = vrot.lane.b32.xlu0 %v1616_v5, %s1797_s8  ;;  %s2171_s14 = scalar_lea.hbm %s2232_s4, %s1281_s29 }
 0x751   : > { %1627 = vrot.lane.b32.xlu1 %v1616_v5, %s1805_s12  ;;  %1622 = vrot.lane.b32.xlu0 %v1616_v5, %s1802_s7  ;;  %s1136_s12 = scalar_lea.sflag [#allocation5], %s2261_s19 }
 0x755   : > { %1038 = vrot.lane.b32.xlu1 %v997_v3, %s1806_s13  ;;  %1632 = vrot.lane.b32.xlu0 %v1616_v5, %s1807_s26  ;;  %s1809_s26 = smov [#allocation4]  }
 0x756   : > { %s1696_s24 = sshll.u32 %s1809_s26, 4  ;;  %s1697_s24 = int_to_ptr.vmem [resolvable:$false] %s1696_s24 }
 0x757   : > { %s1698_s10 = scalar_lea.vmem %s1697_s24, 256  ;;  %p1699_p12 = scmp.lt.s32.totalorder %s2173_s23, %s1697_s24 }
 0x759   : > { %1049 = vperm.xlu1 %1484, %v1277_v6   ;;  %1040 = vrot.lane.b32.xlu0 %v998_v4, %s1806_s13 }
 0x75d   : > { %1129 = vrot.lane.b32.xlu1 %v2110_v15, %s1806_s13  ;;  %1127 = vrot.lane.b32.xlu0 %v2108_v14, %s1806_s13  ;;  %s1692_s13 = scalar_lea.vmem %s2173_s23, 128 }
 0x75e   : > { %p1693_p3 = scmp.ne.s32.totalorder %s2173_s23, %s1692_s13  ;;  %p1700_p13 = scmp.lt.s32.totalorder %s1698_s10, %s1692_s13 }
 0x760   : > { %p1694_p7 = pnand %p1693_p3, %p2262_p8  ;;  %p1701_p1 = por %p1700_p13, %p1699_p12 }
 0x762   : > { %p1695_p10 = pneg %p1694_p7 }
 0x764   : > { %p1702_p2 = pnand %p1701_p1, %p1695_p10 }
 0x7bf   : > { %v1618_v8 = vpop.permute.xlu1 %1617  ;;  %v1613_v9 = vpop.permute.xlu0 %1612 }
 0x7c0   : > { %v1615_v10 = vunpack.i.h.bf16 %v1613_v9  ;;  %v1614_v11 = vunpack.i.l.bf16 %v1613_v9  ;;  %v1620_v12 = vunpack.i.h.bf16 %v1618_v8  ;;  %v1619_v13 = vunpack.i.l.bf16 %v1618_v8 }
 0x7c2   : > { %v1351_v16 = vpack.c.bf16 %v1615_v10, %v998_v4  ;;  %v1007_v7 = vsel %vm301_vm12, %v1614_v11, %v1615_v10  ;;  %v1014_v15 = vsel %vm867_vm13, %v1619_v13, %v1620_v12 }
 0x7c3   : > { %v1353_v17 = vpack.c.bf16 %v1007_v7, %v997_v3  ;;  %v1628_v19 = vpop.permute.xlu1 %1627  ;;  %v1623_v20 = vpop.permute.xlu0 %1622 }
 0x7c4   : > { %v1625_v21 = vunpack.i.h.bf16 %v1623_v20  ;;  %v1624_v22 = vunpack.i.l.bf16 %v1623_v20  ;;  %1352 = vmatprep.subr.bf16.mxu1 %v1351_v16  ;;  %v1630_v23 = vunpack.i.h.bf16 %v1628_v19  ;;  %v1629_v14 = vunpack.i.l.bf16 %v1628_v19 }
 0x7c5   : > { %1354 = vmatpush1.bf16.msra.mxu1 %v1353_v17 }
 0x7c6   : > { %v1355_v24 = vpack.c.bf16 %v1625_v21, %v1620_v12  ;;  %v1021_v25 = vsel %vm590_vm5, %v1624_v22, %v1625_v21  ;;  %v1028_v30 = vsel %vm882_vm15, %v1629_v14, %v1630_v23 }
 0x7c7   : > { %v1357_v26 = vpack.c.bf16 %v1021_v25, %v1014_v15  ;;  %v1633_v27 = vpop.permute.xlu0 %1632  ;;  %v1039_v35 = vpop.permute.xlu1 %1038 }
 0x7c8   : > { %v1635_v28 = vunpack.i.h.bf16 %v1633_v27  ;;  %v1634_v29 = vunpack.i.l.bf16 %v1633_v27  ;;  %1356 = vmatprep.subr.bf16.mxu1 %v1355_v24 }
 0x7c9   : > { %1358 = vmatpush1.bf16.msra.mxu1 %v1357_v26 }
 0x7ca   : > { %v1359_v31 = vpack.c.bf16 %v1635_v28, %v1630_v23  ;;  %v1035_v32 = vsel %vm890_vm0, %v1634_v29, %v1635_v28 }
 0x7cb   : > { %v1361_v33 = vpack.c.bf16 %v1035_v32, %v1028_v30  ;;  %v1041_v34 = vpop.permute.xlu0 %1040 }
 0x7cc   : > { %1360 = vmatprep.subr.bf16.mxu1 %v1359_v31  ;;  %v1042_v37 = vsel %vm898_vm1, %v1039_v35, %v1041_v34 }
 0x7cd   : > { %1362 = vmatpush1.bf16.msra.mxu1 %v1361_v33 }
 0x7ce   : > { %1067 = vmatprep.subr.mxu1 %v1041_v34 }
 0x7cf   : > { %v1128_v42 = vpop.permute.xlu0 %1127 }
 0x7d1   : > { %1068 = vmatpush1.msra.mxu1 %v1042_v37 }
 0x7d2   : > { %1279 = vmatmul.mubr.msk.f32.vlgmr.msra.gmra.mrb[4].mxu1 %vm319_vm14, %v1278_v36 }
 0x7d8   : > { %v1050_v38 = vpop.permute.xlu1 %1049 }
 0x7dc   : > { %v1130_v18 = vpop.permute.xlu1 %1129 }
 0x7dd   : > { %v1131_v45 = vsel %vm898_vm1, %v1128_v42, %v1130_v18 }
 0x8a5   : > { %v1121_v40 = vpop.f32.mrb[4].mxu1 }
 0x8a6   : > { %v1122_v43 = vadd.f32 %v1121_v40, %v1050_v38  ;;  %v1123_v44 = vpop.f32.mrb[5].mxu1 }
 0x8a8   : > { %v1133_v46 = vadd.f32 %v1131_v45, %v1122_v43 }
 0x8aa   : > { %1134 = vst [vmem:[%s2260_s18] sm:$0xff] %v1133_v46 }
 0x8ab   : > { %1705 = shalt.err (!%p1702_p2)
}
 0x8ac   : > { %s1706_s9 = scalar_lea.hbm %s2171_s14, 128  ;;  %s1710_s20 = scalar_lea.hbm %s2232_s4, 768 }
 0x8ad   : > { %p1707_p5 = scmp.ne.s32.totalorder %s2171_s14, %s1706_s9  ;;  %p1711_p0 = scmp.lt.u32.totalorder %s2171_s14, %s2232_s4 }
 0x8ae   : > { %p1712_p9 = scmp.lt.u32.totalorder %s1710_s20, %s1706_s9  ;;  %p1714_p3 = scmp.lt.u32.totalorder %s1706_s9, %s2171_s14 }
 0x8af   : > { %p1708_p6 = pnand %p1707_p5, %p2262_p8 }
 0x8b0   : > { %p1713_p11 = por %p1712_p9, %p1711_p0 }
 0x8b1   : > { %p1709_p4 = pneg %p1708_p6 }
 0x8b2   : > { %p1715_p7 = por %p1714_p3, %p1713_p11 }
 0x8b4   : > { %p1716_p10 = pnand %p1715_p7, %p1709_p4 }
 0x8b6   : > { %1719 = shalt.err (!%p1716_p10)
}
 0x8b7   : > { %1368 = dma.vmem_to_hbm [thread:$0]  (%p2262_p8), %s2173_s23, 128, %s2171_s14, %s1136_s12  }
 0x8b8 PF: > { %s2263_s8 = sld [smem:[#allocation14_spill]]  ;;  %s2264_s7 = sld [smem:[#allocation20_spill]] }
 0x8b9   : > { %p1376_p12 = scmp.ge.s32.totalorder %s1788_s22, 2 }
 0x8be   : > { %s1163_s11 = sand.u32 1, %s2263_s8   ;;  %p2265_p13 = scmp.ne.s32.totalorder %s2264_s7, 0 }
 0x8bf   : > { %s1164_s17 = scalar_lea.sflag [#allocation5], %s1163_s11 }
 0x8c0   : > { %p1371_p1 = pnand %p1376_p12, %p2265_p13 }
 0x8c2   : > { %1755 = dma.done.wait (!%p1371_p1), %s1164_s17, 128  }
 0x8c3   : > { %1757 = vsyncadd (!%p1371_p1), %s1164_s17, 4294967168  ;;  %s17_s22 = sadd.s32 1, %s1788_s22   ;;  %s2266_s29 = sld [smem:[#allocation15_spill]] }
 0x8c4   : > { %p14_p2 = scmp.ge.s32.totalorder %s17_s22, 8   ;;  %s2267_s17 = sld [smem:[#allocation21_spill]] }
 0x8c5   : > { %s2268_s18 = sld [smem:[#allocation16_spill]]  ;;  %s2269_s19 = sld [smem:[#allocation17_spill]] }
 0x8c6   : > { %s2270_s20 = sld [smem:[#allocation18_spill]]  ;;  %s2271_s21 = sld [smem:[#allocation19_spill]] }
 0x8c7   : > { %s2272_s15 = smov %s1764_s16  ;;  %16 = sbr.rel (!%p14_p2) target bundleno = 5 (0x5), region = 98 }
 0x8c9   : > { %s2273_s16 = smov %s2266_s29 }
 0x8ce   :  { %1169 = vsyncpa [#allocation5], 1 }
 0x8cf   :  { %1171 = vsyncpa [#allocation5 + $0x1], 1 }
 0x8d0   :  { %1172 = vsyncmov [#allocation3] }
 0x8d3   :  { %s1173_s28 = vpop.sfrf %1172 }
 0x8d4   :  { %p1284_p8 = scmp.ne.s32.totalorder %s1173_s28, 0 }
 0x8d6   :  { %1177 = shalt.err (%p1284_p8)  }
 0x8d7   :  { %1179 = vsyncmov [#allocation3 + $0x1] }
 0x8da   :  { %s1180_s6 = vpop.sfrf %1179 }
 0x8db   :  { %p1285_p5 = scmp.ne.s32.totalorder %s1180_s6, 0 }
 0x8dd   :  { %1184 = shalt.err (%p1285_p5)  }

</bundles_post_ra>
